<compile_context>
chip_gen: v7x
topology: tpu7x:2x2x1
jax: 0.10.0
libtpu: 0.0.40
codegen_flags: <defaults>
</compile_context>

<pallas_src>
import functools

import jax
import jax.numpy as jnp
from jax import lax
from jax.experimental import pallas as pl
from jax.experimental.pallas import tpu as pltpu

FEATURE_DIM = 29
LSTM_H_DIM = 128
HOLDING_PERIOD = 12        # window size K must equal this (nn.Linear(12, 1))
STOCK_POOL = 7


def _round_up(n, m):
    return ((n + m - 1) // m) * m


def _sigmoid(x):
    # sigmoid(x) = 0.5 * tanh(0.5 * x) + 0.5 : one EUP pass (tanh) + cheap VPU ops
    # instead of exp + reciprocal.
    return 0.5 * jnp.tanh(0.5 * x) + 0.5


# ----------------------------------------------------------------------------
# Pallas kernel: hoisted input projection + LSTM recurrence + time pooling + scorer
# ----------------------------------------------------------------------------
def _lstm_score_kernel(x_ref, wih_ref, whh_ref, w2_ref, w1_ref, sc_ref,
                       score_ref, gates_sc):
    # x_ref    : (T, tBN, F+1)   VMEM  bf16  (time-major BN tile; last col == 1.0)
    # wih_ref  : (F+1, 4H)       VMEM  bf16  (W_ih^T with bias row appended, [i,f,g,o])
    # whh_ref  : (H, 4H)         VMEM  bf16  (W_hh^T)
    # w2_ref   : (1, H)          VMEM  f32   (scoring Linear(128->1) weight row)
    # w1_ref   : (T,)            SMEM  f32   (time-pooling Linear(12->1) weight)
    # sc_ref   : (2,)            SMEM  f32   [b_ll1, b_ll2]
    # score_ref: (1, 1, tBN)     output f32  (lane-dense score row for this tile)
    # gates_sc : (T, tBN, 4H)    VMEM  bf16 scratch (precomputed input-side gates)
    T, tBN, FA = x_ref.shape
    H = w2_ref.shape[-1]

    # ---- Hoisted input projection: ONE big MXU matmul over all T*tBN rows.
    # Bias is folded in via the constant-1 feature column, so no broadcast-add here.
    x_flat = x_ref[...].reshape(T * tBN, FA)                      # bf16
    gi = jnp.dot(x_flat, wih_ref[...], preferred_element_type=jnp.float32)
    gates_sc[...] = gi.reshape(T, tBN, 4 * H).astype(gates_sc.dtype)   # bf16 store

    # ---- Serial recurrence: only h @ W_hh^T per step, as two gate-PAIR matmuls
    # ([i|f] and [g|o], N=256 each) to fill the 256-wide MXU on v6e/v7x.
    def step(t, carry):
        h, c, ha = carry
        h_b = h.astype(whh_ref.dtype)                             # bf16 MXU operand

        if_pre = (gates_sc[t, :, :2 * H].astype(jnp.float32)
                  + jnp.dot(h_b, whh_ref[:, :2 * H],
                            preferred_element_type=jnp.float32))
        go_pre = (gates_sc[t, :, 2 * H:].astype(jnp.float32)
                  + jnp.dot(h_b, whh_ref[:, 2 * H:],
                            preferred_element_type=jnp.float32))

        i_g = _sigmoid(if_pre[:, :H])
        f_g = _sigmoid(if_pre[:, H:])
        g_g = jnp.tanh(go_pre[:, :H])
        o_g = _sigmoid(go_pre[:, H:])
        c_new = f_g * c + i_g * g_g
        h_new = o_g * jnp.tanh(c_new)
        # Linear(HOLDING_PERIOD -> 1) over time, accumulated online:
        # ha[bn, h] = sum_t w1[t] * h_t[bn, h]
        ha_new = ha + w1_ref[t] * h_new
        return h_new, c_new, ha_new

    zero = jnp.zeros((tBN, H), jnp.float32)
    _, _, ha = lax.fori_loop(0, T, step, (zero, zero, zero), unroll=True)

    # ---- Scoring Linear(H -> 1): VPU multiply + lane reduction (no (H,1) MXU matmul).
    ha = ha + sc_ref[0]                                           # + b_ll1
    score = jnp.sum(ha * w2_ref[...], axis=-1) + sc_ref[1]        # (tBN,)  + b_ll2
    score_ref[...] = score.reshape(1, 1, tBN)                     # lane-dense store


def _lstm_scores_pallas(x_tbn, params, block_bn=None):
    T, BN, FA = x_tbn.shape
    H = LSTM_H_DIM

    if block_bn is None:
        block_bn = min(256, _round_up(BN, 16))
        # v7x has 2 TensorCores; make sure the ("parallel",) grid has >= 2 tiles
        # whenever BN allows, so neither core idles.
        if BN > 16:
            block_bn = min(block_bn, _round_up((BN + 1) // 2, 16))
    block_bn = max(16, _round_up(block_bn, 16))
    bn_pad = _round_up(BN, block_bn)
    if bn_pad != BN:
        x_tbn = jnp.pad(x_tbn, ((0, 0), (0, bn_pad - BN), (0, 0)))
    num_tiles = bn_pad // block_bn

    scalars = jnp.stack([params["b_ll1"], params["b_ll2"]]).astype(jnp.float32)
    smem = pltpu.MemorySpace.SMEM

    grid_spec = pltpu.PrefetchScalarGridSpec(
        num_scalar_prefetch=0,
        grid=(num_tiles,),
        in_specs=[
            pl.BlockSpec((T, block_bn, FA), lambda i: (0, i, 0)),  # x tile (streamed)
            pl.BlockSpec((FA, 4 * H), lambda i: (0, 0)),           # W_ih^T+bias (res.)
            pl.BlockSpec((H, 4 * H), lambda i: (0, 0)),            # W_hh^T (resident)
            pl.BlockSpec((1, H), lambda i: (0, 0)),                # w_ll2 row
            pl.BlockSpec(memory_space=smem),                       # w_ll1 (T,)
            pl.BlockSpec(memory_space=smem),                       # [b_ll1, b_ll2]
        ],
        out_specs=pl.BlockSpec((1, 1, block_bn), lambda i: (i, 0, 0)),
        scratch_shapes=[pltpu.VMEM((T, block_bn, 4 * H), jnp.bfloat16)],
    )

    out = pl.pallas_call(
        _lstm_score_kernel,
        out_shape=jax.ShapeDtypeStruct((num_tiles, 1, block_bn), jnp.float32),
        grid_spec=grid_spec,
        compiler_params=pltpu.CompilerParams(
            dimension_semantics=("parallel",),
            vmem_limit_bytes=32 * 1024 * 1024),
    )(x_tbn, params["wih_aug"], params["whh_t"],
      params["w_ll2"], params["w_ll1"], scalars)

    scores = out.reshape(bn_pad)
    return scores[:BN]


# ----------------------------------------------------------------------------
# PGNetwork forward (glue in plain JAX)
# ----------------------------------------------------------------------------
def pg_scores(params, x, block_bn=None):
    """stock_score of shape (B, N) computed by the Pallas kernel."""
    if x.ndim == 3:
        x = x[None]
    B, N, K, F = x.shape
    assert K == HOLDING_PERIOD and F == FEATURE_DIM
    x_bf = x.astype(jnp.bfloat16)                       # cast BEFORE transpose
    x_flat = x_bf.reshape(B * N, K, F)
    x_tbn = jnp.transpose(x_flat, (1, 0, 2))            # (T, BN, F) time-major
    ones = jnp.ones((K, B * N, 1), jnp.bfloat16)        # bias-folding constant column
    x_aug = jnp.concatenate([x_tbn, ones], axis=-1)     # (T, BN, F+1)
    score = _lstm_scores_pallas(x_aug, params, block_bn=block_bn)   # (BN,)
    return score.reshape(B, N)


def pgnetwork_forward(params, x):
    stock_score = pg_scores(params, x)                  # (B, N)
    # TODO(synk): torch.sort / winner-loser softmax head kept in plain JAX
    # (no clean Pallas TPU sort primitive; it is O(N) tiny work anyway).
    sorted_indices = jnp.argsort(-stock_score, axis=-1)
    sorted_x = jnp.take_along_axis(stock_score, sorted_indices, axis=-1)
    winner_assets_x = sorted_x[:, :STOCK_POOL]
    loser_assets_x = sorted_x[:, -STOCK_POOL:]
    winner_proportion = jax.nn.softmax(winner_assets_x, axis=-1)
    loser_proportion = -jax.nn.softmax(1.0 - loser_assets_x, axis=-1)
    zeros_assets = jnp.zeros_like(sorted_x[:, STOCK_POOL:-STOCK_POOL])
    b_c = jnp.concatenate([winner_proportion, zeros_assets, loser_proportion],
                          axis=1)
    return b_c, sorted_indices


# ----------------------------------------------------------------------------
# Deterministic parameter init (matches PyTorch module shapes)
# ----------------------------------------------------------------------------
def init_params(key):
    H, F, T = LSTM_H_DIM, FEATURE_DIM, HOLDING_PERIOD
    ks = jax.random.split(key, 8)
    k_l = 1.0 / jnp.sqrt(jnp.float32(H))
    w_ih = jax.random.uniform(ks[0], (4 * H, F), jnp.float32, -k_l, k_l)
    w_hh = jax.random.uniform(ks[1], (4 * H, H), jnp.float32, -k_l, k_l)
    b_ih = jax.random.uniform(ks[2], (4 * H,), jnp.float32, -k_l, k_l)
    b_hh = jax.random.uniform(ks[3], (4 * H,), jnp.float32, -k_l, k_l)
    k1 = 1.0 / jnp.sqrt(jnp.float32(T))
    w_ll1 = jax.random.uniform(ks[4], (T,), jnp.float32, -k1, k1)
    b_ll1 = jax.random.uniform(ks[5], (), jnp.float32, -k1, k1)
    k2 = 1.0 / jnp.sqrt(jnp.float32(H))
    w_ll2 = jax.random.uniform(ks[6], (1, H), jnp.float32, -k2, k2)
    b_ll2 = jax.random.uniform(ks[7], (), jnp.float32, -k2, k2)
    # NOTE: nn.LSTM dropout=0.2 is a no-op for num_layers=1 (inference); omitted.
    wih_t = w_ih.T                                      # (F, 4H), gate order [i,f,g,o]
    b_gates = (b_ih + b_hh)[None, :]                    # (1, 4H)
    wih_aug = jnp.concatenate([wih_t, b_gates], axis=0).astype(jnp.bfloat16)  # (F+1,4H)
    return dict(
        wih_aug=wih_aug,                                 # W_ih^T with bias row folded in
        whh_t=jnp.asarray(w_hh.T).astype(jnp.bfloat16),  # (H, 4H)
        w_ll1=w_ll1, b_ll1=b_ll1,                        # Linear(12 -> 1)
        w_ll2=w_ll2, b_ll2=b_ll2,                        # Linear(128 -> 1), (1, H)
    )


# ----------------------------------------------------------------------------
# Pure-JAX reference (same bf16-rounded operands / f32 accumulation as the kernel,
# but all dots run with f32 operands so they dispatch on any XLA backend).
# ----------------------------------------------------------------------------
def _reference_scores(params, x):
    if x.ndim == 3:
        x = x[None]
    B, N, K, F = x.shape
    H = LSTM_H_DIM
    xs = x.astype(jnp.bfloat16).reshape(B * N, K, F)
    ones = jnp.ones((B * N, K, 1), jnp.bfloat16)
    xa = jnp.concatenate([xs, ones], axis=-1).astype(jnp.float32)     # bf16-exact in f32
    wih = params["wih_aug"].astype(jnp.float32)
    gates_in = jnp.einsum("bkf,fg->kbg", xa, wih)                     # (K, BN, 4H) f32
    gates_in = gates_in.astype(jnp.bfloat16).astype(jnp.float32)      # mirror bf16 scratch
    whh = params["whh_t"].astype(jnp.float32)

    def step(carry, g_in_t):
        h, c = carry
        hb = h.astype(jnp.bfloat16).astype(jnp.float32)               # mirror bf16 h
        gates = g_in_t + jnp.dot(hb, whh)
        i = _sigmoid(gates[:, :H])
        f = _sigmoid(gates[:, H:2 * H])
        g = jnp.tanh(gates[:, 2 * H:3 * H])
        o = _sigmoid(gates[:, 3 * H:])
        c = f * c + i * g
        h = o * jnp.tanh(c)
        return (h, c), h

    h0 = jnp.zeros((B * N, H), jnp.float32)
    (_, _), hs = lax.scan(step, (h0, h0), gates_in)
    ha = jnp.einsum("t,tbh->bh", params["w_ll1"], hs) + params["b_ll1"]
    score = jnp.sum(ha * params["w_ll2"], axis=-1) + params["b_ll2"]
    return score.reshape(B, N)


if __name__ == "__main__":
    key = jax.random.PRNGKey(0)
    kx, kp = jax.random.split(key)

    B, N, K, F = 2, 16, HOLDING_PERIOD, FEATURE_DIM   # x: (2, 16, 12, 29)
    x = jax.random.normal(kx, (B, N, K, F), dtype=jnp.float32)
    params = init_params(kp)

    fwd = jax.jit(functools.partial(pgnetwork_forward, params))
    b_c, sorted_indices = fwd(x)
    jax.block_until_ready((b_c, sorted_indices))

    assert b_c.shape == (B, N) and sorted_indices.shape == (B, N)
    assert bool(jnp.all(jnp.isfinite(b_c)))

    # correctness check of the Pallas hot path against a pure-JAX reference using the
    # same bf16-rounded operands / f32 accumulation
    score_kernel = jax.jit(functools.partial(pg_scores, params))(x)
    score_ref = _reference_scores(params, x)
    jax.block_until_ready((score_kernel, score_ref))
    assert score_kernel.shape == (B, N)
    assert jnp.allclose(score_kernel, score_ref, atol=2e-2, rtol=2e-2), (
        float(jnp.max(jnp.abs(score_kernel - score_ref))))

    print("KERNEL_OK")
</pallas_src>

<mosaic_0001>
module attributes {stable_mosaic.version = 11 : i64} {
  func.func @_lstm_score_kernel(%arg0: i32, %arg1: memref<12x16x30xbf16, #tpu.memory_space<vmem>>, %arg2: memref<30x512xbf16, #tpu.memory_space<vmem>>, %arg3: memref<128x512xbf16, #tpu.memory_space<vmem>>, %arg4: memref<1x128xf32, #tpu.memory_space<vmem>>, %arg5: memref<12xf32, #tpu.memory_space<smem>>, %arg6: memref<2xf32, #tpu.memory_space<smem>>, %arg7: memref<1x1x16xf32, #tpu.memory_space<vmem>>, %arg8: memref<12x16x512xbf16, #tpu.memory_space<vmem>>) attributes {dimension_semantics = [#tpu.dimension_semantics<parallel>], iteration_bounds = array<i64: 2>, scalar_prefetch = 0 : i64, scratch_operands = 1 : i64, tpu.core_type = #tpu.core_type<tc>, window_params = [{transform_indices = @transform_0, window_bounds = array<i64: 12, 16, 30>}, {pipeline_mode = #tpu.pipeline_mode<synchronous>, transform_indices = @transform_1, window_bounds = array<i64: 30, 512>}, {pipeline_mode = #tpu.pipeline_mode<synchronous>, transform_indices = @transform_2, window_bounds = array<i64: 128, 512>}, {pipeline_mode = #tpu.pipeline_mode<synchronous>, transform_indices = @transform_3, window_bounds = array<i64: 1, 128>}, {transform_indices = @transform_4, window_bounds = array<i64: 12>}, {transform_indices = @transform_5, window_bounds = array<i64: 2>}, {transform_indices = @transform_6, window_bounds = array<i64: 1, 1, 16>}]} {
    %c0 = arith.constant 0 : index
    %c0_0 = arith.constant 0 : index
    %c0_1 = arith.constant 0 : index
    %0 = vector.load %arg1[%c0, %c0_0, %c0_1] : memref<12x16x30xbf16, #tpu.memory_space<vmem>>, vector<12x16x30xbf16>
    %1 = vector.shape_cast %0 : vector<12x16x30xbf16> to vector<192x30xbf16>
    %c0_2 = arith.constant 0 : index
    %c0_3 = arith.constant 0 : index
    %2 = vector.load %arg2[%c0_2, %c0_3] : memref<30x512xbf16, #tpu.memory_space<vmem>>, vector<30x512xbf16>
    %cst = arith.constant dense<0.000000e+00> : vector<192x512xf32>
    %3 = tpu.matmul %1, %2, %cst {dimension_numbers = #tpu.dot_dimension_numbers<[1], [0], [0], [1], [0, 0, 1, 1], [], []>} : vector<192x30xbf16>, vector<30x512xbf16>, vector<192x512xf32> -> vector<192x512xf32>
    %4 = vector.shape_cast %3 : vector<192x512xf32> to vector<12x16x512xf32>
    %5 = arith.truncf %4 : vector<12x16x512xf32> to vector<12x16x512xbf16>
    %c0_4 = arith.constant 0 : index
    %c0_5 = arith.constant 0 : index
    %c0_6 = arith.constant 0 : index
    %6 = vector.load %arg8[%c0_4, %c0_5, %c0_6] : memref<12x16x512xbf16, #tpu.memory_space<vmem>>, vector<12x16x512xbf16>
    tpu.vector_store %arg8[%c0_4, %c0_5, %c0_6], %5 {strides = array<i32>} : memref<12x16x512xbf16, #tpu.memory_space<vmem>>, vector<12x16x512xbf16>,
    %cst_7 = arith.constant 0.000000e+00 : f32
    %7 = vector.broadcast %cst_7 : f32 to vector<16x128xf32>
    %c0_i32 = arith.constant 0 : i32
    %8 = arith.truncf %7 : vector<16x128xf32> to vector<16x128xbf16>
    %9 = arith.index_cast %c0_i32 : i32 to index
    %c0_8 = arith.constant 0 : index
    %c0_9 = arith.constant 0 : index
    %10 = vector.load %arg8[%9, %c0_8, %c0_9] : memref<12x16x512xbf16, #tpu.memory_space<vmem>>, vector<1x16x256xbf16>
    %11 = vector.shape_cast %10 : vector<1x16x256xbf16> to vector<16x256xbf16>
    %12 = arith.extf %11 : vector<16x256xbf16> to vector<16x256xf32>
    %c0_10 = arith.constant 0 : index
    %c0_11 = arith.constant 0 : index
    %13 = vector.load %arg3[%c0_10, %c0_11] : memref<128x512xbf16, #tpu.memory_space<vmem>>, vector<128x256xbf16>
    %cst_12 = arith.constant dense<0.000000e+00> : vector<16x256xf32>
    %14 = tpu.matmul %8, %13, %cst_12 {dimension_numbers = #tpu.dot_dimension_numbers<[1], [0], [0], [1], [0, 0, 1, 1], [], []>} : vector<16x128xbf16>, vector<128x256xbf16>, vector<16x256xf32> -> vector<16x256xf32>
    %15 = arith.addf %12, %14 : vector<16x256xf32>
    %16 = arith.index_cast %c0_i32 : i32 to index
    %c0_13 = arith.constant 0 : index
    %c256 = arith.constant 256 : index
    %17 = vector.load %arg8[%16, %c0_13, %c256] : memref<12x16x512xbf16, #tpu.memory_space<vmem>>, vector<1x16x256xbf16>
    %18 = vector.shape_cast %17 : vector<1x16x256xbf16> to vector<16x256xbf16>
    %19 = arith.extf %18 : vector<16x256xbf16> to vector<16x256xf32>
    %c0_14 = arith.constant 0 : index
    %c256_15 = arith.constant 256 : index
    %20 = vector.load %arg3[%c0_14, %c256_15] : memref<128x512xbf16, #tpu.memory_space<vmem>>, vector<128x256xbf16>
    %cst_16 = arith.constant dense<0.000000e+00> : vector<16x256xf32>
    %21 = tpu.matmul %8, %20, %cst_16 {dimension_numbers = #tpu.dot_dimension_numbers<[1], [0], [0], [1], [0, 0, 1, 1], [], []>} : vector<16x128xbf16>, vector<128x256xbf16>, vector<16x256xf32> -> vector<16x256xf32>
    %22 = arith.addf %19, %21 : vector<16x256xf32>
    %23 = vector.extract_strided_slice %15 {offsets = [0, 0], sizes = [16, 128], strides = [1, 1]} : vector<16x256xf32> to vector<16x128xf32>
    %cst_17 = arith.constant 5.000000e-01 : f32
    %24 = vector.broadcast %cst_17 : f32 to vector<16x128xf32>
    %25 = arith.mulf %24, %23 : vector<16x128xf32>
    %26 = math.tanh %25 : vector<16x128xf32>
    %cst_18 = arith.constant 5.000000e-01 : f32
    %27 = vector.broadcast %cst_18 : f32 to vector<16x128xf32>
    %28 = arith.mulf %27, %26 : vector<16x128xf32>
    %cst_19 = arith.constant 5.000000e-01 : f32
    %29 = vector.broadcast %cst_19 : f32 to vector<16x128xf32>
    %30 = arith.addf %28, %29 : vector<16x128xf32>
    %31 = vector.extract_strided_slice %15 {offsets = [0, 128], sizes = [16, 128], strides = [1, 1]} : vector<16x256xf32> to vector<16x128xf32>
    %cst_20 = arith.constant 5.000000e-01 : f32
    %32 = vector.broadcast %cst_20 : f32 to vector<16x128xf32>
    %33 = arith.mulf %32, %31 : vector<16x128xf32>
    %34 = math.tanh %33 : vector<16x128xf32>
    %cst_21 = arith.constant 5.000000e-01 : f32
    %35 = vector.broadcast %cst_21 : f32 to vector<16x128xf32>
    %36 = arith.mulf %35, %34 : vector<16x128xf32>
    %cst_22 = arith.constant 5.000000e-01 : f32
    %37 = vector.broadcast %cst_22 : f32 to vector<16x128xf32>
    %38 = arith.addf %36, %37 : vector<16x128xf32>
    %39 = vector.extract_strided_slice %22 {offsets = [0, 0], sizes = [16, 128], strides = [1, 1]} : vector<16x256xf32> to vector<16x128xf32>
    %40 = math.tanh %39 : vector<16x128xf32>
    %41 = vector.extract_strided_slice %22 {offsets = [0, 128], sizes = [16, 128], strides = [1, 1]} : vector<16x256xf32> to vector<16x128xf32>
    %cst_23 = arith.constant 5.000000e-01 : f32
    %42 = vector.broadcast %cst_23 : f32 to vector<16x128xf32>
    %43 = arith.mulf %42, %41 : vector<16x128xf32>
    %44 = math.tanh %43 : vector<16x128xf32>
    %cst_24 = arith.constant 5.000000e-01 : f32
    %45 = vector.broadcast %cst_24 : f32 to vector<16x128xf32>
    %46 = arith.mulf %45, %44 : vector<16x128xf32>
    %cst_25 = arith.constant 5.000000e-01 : f32
    %47 = vector.broadcast %cst_25 : f32 to vector<16x128xf32>
    %48 = arith.addf %46, %47 : vector<16x128xf32>
    %49 = arith.mulf %38, %7 : vector<16x128xf32>
    %50 = arith.mulf %30, %40 : vector<16x128xf32>
    %51 = arith.addf %49, %50 : vector<16x128xf32>
    %52 = math.tanh %51 : vector<16x128xf32>
    %53 = arith.mulf %48, %52 : vector<16x128xf32>
    %54 = arith.index_cast %c0_i32 : i32 to index
    %55 = memref.load %arg5[%54] : memref<12xf32, #tpu.memory_space<smem>>
    %56 = vector.broadcast %55 : f32 to vector<16x128xf32>
    %57 = arith.mulf %56, %53 : vector<16x128xf32>
    %58 = arith.addf %7, %57 : vector<16x128xf32>
    %c1_i32 = arith.constant 1 : i32
    %59 = arith.truncf %53 : vector<16x128xf32> to vector<16x128xbf16>
    %60 = arith.index_cast %c1_i32 : i32 to index
    %c0_26 = arith.constant 0 : index
    %c0_27 = arith.constant 0 : index
    %61 = vector.load %arg8[%60, %c0_26, %c0_27] : memref<12x16x512xbf16, #tpu.memory_space<vmem>>, vector<1x16x256xbf16>
    %62 = vector.shape_cast %61 : vector<1x16x256xbf16> to vector<16x256xbf16>
    %63 = arith.extf %62 : vector<16x256xbf16> to vector<16x256xf32>
    %c0_28 = arith.constant 0 : index
    %c0_29 = arith.constant 0 : index
    %64 = vector.load %arg3[%c0_28, %c0_29] : memref<128x512xbf16, #tpu.memory_space<vmem>>, vector<128x256xbf16>
    %cst_30 = arith.constant dense<0.000000e+00> : vector<16x256xf32>
    %65 = tpu.matmul %59, %64, %cst_30 {dimension_numbers = #tpu.dot_dimension_numbers<[1], [0], [0], [1], [0, 0, 1, 1], [], []>} : vector<16x128xbf16>, vector<128x256xbf16>, vector<16x256xf32> -> vector<16x256xf32>
    %66 = arith.addf %63, %65 : vector<16x256xf32>
    %67 = arith.index_cast %c1_i32 : i32 to index
    %c0_31 = arith.constant 0 : index
    %c256_32 = arith.constant 256 : index
    %68 = vector.load %arg8[%67, %c0_31, %c256_32] : memref<12x16x512xbf16, #tpu.memory_space<vmem>>, vector<1x16x256xbf16>
    %69 = vector.shape_cast %68 : vector<1x16x256xbf16> to vector<16x256xbf16>
    %70 = arith.extf %69 : vector<16x256xbf16> to vector<16x256xf32>
    %c0_33 = arith.constant 0 : index
    %c256_34 = arith.constant 256 : index
    %71 = vector.load %arg3[%c0_33, %c256_34] : memref<128x512xbf16, #tpu.memory_space<vmem>>, vector<128x256xbf16>
    %cst_35 = arith.constant dense<0.000000e+00> : vector<16x256xf32>
    %72 = tpu.matmul %59, %71, %cst_35 {dimension_numbers = #tpu.dot_dimension_numbers<[1], [0], [0], [1], [0, 0, 1, 1], [], []>} : vector<16x128xbf16>, vector<128x256xbf16>, vector<16x256xf32> -> vector<16x256xf32>
    %73 = arith.addf %70, %72 : vector<16x256xf32>
    %74 = vector.extract_strided_slice %66 {offsets = [0, 0], sizes = [16, 128], strides = [1, 1]} : vector<16x256xf32> to vector<16x128xf32>
    %cst_36 = arith.constant 5.000000e-01 : f32
    %75 = vector.broadcast %cst_36 : f32 to vector<16x128xf32>
    %76 = arith.mulf %75, %74 : vector<16x128xf32>
    %77 = math.tanh %76 : vector<16x128xf32>
    %cst_37 = arith.constant 5.000000e-01 : f32
    %78 = vector.broadcast %cst_37 : f32 to vector<16x128xf32>
    %79 = arith.mulf %78, %77 : vector<16x128xf32>
    %cst_38 = arith.constant 5.000000e-01 : f32
    %80 = vector.broadcast %cst_38 : f32 to vector<16x128xf32>
    %81 = arith.addf %79, %80 : vector<16x128xf32>
    %82 = vector.extract_strided_slice %66 {offsets = [0, 128], sizes = [16, 128], strides = [1, 1]} : vector<16x256xf32> to vector<16x128xf32>
    %cst_39 = arith.constant 5.000000e-01 : f32
    %83 = vector.broadcast %cst_39 : f32 to vector<16x128xf32>
    %84 = arith.mulf %83, %82 : vector<16x128xf32>
    %85 = math.tanh %84 : vector<16x128xf32>
    %cst_40 = arith.constant 5.000000e-01 : f32
    %86 = vector.broadcast %cst_40 : f32 to vector<16x128xf32>
    %87 = arith.mulf %86, %85 : vector<16x128xf32>
    %cst_41 = arith.constant 5.000000e-01 : f32
    %88 = vector.broadcast %cst_41 : f32 to vector<16x128xf32>
    %89 = arith.addf %87, %88 : vector<16x128xf32>
    %90 = vector.extract_strided_slice %73 {offsets = [0, 0], sizes = [16, 128], strides = [1, 1]} : vector<16x256xf32> to vector<16x128xf32>
    %91 = math.tanh %90 : vector<16x128xf32>
    %92 = vector.extract_strided_slice %73 {offsets = [0, 128], sizes = [16, 128], strides = [1, 1]} : vector<16x256xf32> to vector<16x128xf32>
    %cst_42 = arith.constant 5.000000e-01 : f32
    %93 = vector.broadcast %cst_42 : f32 to vector<16x128xf32>
    %94 = arith.mulf %93, %92 : vector<16x128xf32>
    %95 = math.tanh %94 : vector<16x128xf32>
    %cst_43 = arith.constant 5.000000e-01 : f32
    %96 = vector.broadcast %cst_43 : f32 to vector<16x128xf32>
    %97 = arith.mulf %96, %95 : vector<16x128xf32>
    %cst_44 = arith.constant 5.000000e-01 : f32
    %98 = vector.broadcast %cst_44 : f32 to vector<16x128xf32>
    %99 = arith.addf %97, %98 : vector<16x128xf32>
    %100 = arith.mulf %89, %51 : vector<16x128xf32>
    %101 = arith.mulf %81, %91 : vector<16x128xf32>
    %102 = arith.addf %100, %101 : vector<16x128xf32>
    %103 = math.tanh %102 : vector<16x128xf32>
    %104 = arith.mulf %99, %103 : vector<16x128xf32>
    %105 = arith.index_cast %c1_i32 : i32 to index
    %106 = memref.load %arg5[%105] : memref<12xf32, #tpu.memory_space<smem>>
    %107 = vector.broadcast %106 : f32 to vector<16x128xf32>
    %108 = arith.mulf %107, %104 : vector<16x128xf32>
    %109 = arith.addf %58, %108 : vector<16x128xf32>
    %c2_i32 = arith.constant 2 : i32
    %110 = arith.truncf %104 : vector<16x128xf32> to vector<16x128xbf16>
    %111 = arith.index_cast %c2_i32 : i32 to index
    %c0_45 = arith.constant 0 : index
    %c0_46 = arith.constant 0 : index
    %112 = vector.load %arg8[%111, %c0_45, %c0_46] : memref<12x16x512xbf16, #tpu.memory_space<vmem>>, vector<1x16x256xbf16>
    %113 = vector.shape_cast %112 : vector<1x16x256xbf16> to vector<16x256xbf16>
    %114 = arith.extf %113 : vector<16x256xbf16> to vector<16x256xf32>
    %c0_47 = arith.constant 0 : index
    %c0_48 = arith.constant 0 : index
    %115 = vector.load %arg3[%c0_47, %c0_48] : memref<128x512xbf16, #tpu.memory_space<vmem>>, vector<128x256xbf16>
    %cst_49 = arith.constant dense<0.000000e+00> : vector<16x256xf32>
    %116 = tpu.matmul %110, %115, %cst_49 {dimension_numbers = #tpu.dot_dimension_numbers<[1], [0], [0], [1], [0, 0, 1, 1], [], []>} : vector<16x128xbf16>, vector<128x256xbf16>, vector<16x256xf32> -> vector<16x256xf32>
    %117 = arith.addf %114, %116 : vector<16x256xf32>
    %118 = arith.index_cast %c2_i32 : i32 to index
    %c0_50 = arith.constant 0 : index
    %c256_51 = arith.constant 256 : index
    %119 = vector.load %arg8[%118, %c0_50, %c256_51] : memref<12x16x512xbf16, #tpu.memory_space<vmem>>, vector<1x16x256xbf16>
    %120 = vector.shape_cast %119 : vector<1x16x256xbf16> to vector<16x256xbf16>
    %121 = arith.extf %120 : vector<16x256xbf16> to vector<16x256xf32>
    %c0_52 = arith.constant 0 : index
    %c256_53 = arith.constant 256 : index
    %122 = vector.load %arg3[%c0_52, %c256_53] : memref<128x512xbf16, #tpu.memory_space<vmem>>, vector<128x256xbf16>
    %cst_54 = arith.constant dense<0.000000e+00> : vector<16x256xf32>
    %123 = tpu.matmul %110, %122, %cst_54 {dimension_numbers = #tpu.dot_dimension_numbers<[1], [0], [0], [1], [0, 0, 1, 1], [], []>} : vector<16x128xbf16>, vector<128x256xbf16>, vector<16x256xf32> -> vector<16x256xf32>
    %124 = arith.addf %121, %123 : vector<16x256xf32>
    %125 = vector.extract_strided_slice %117 {offsets = [0, 0], sizes = [16, 128], strides = [1, 1]} : vector<16x256xf32> to vector<16x128xf32>
    %cst_55 = arith.constant 5.000000e-01 : f32
    %126 = vector.broadcast %cst_55 : f32 to vector<16x128xf32>
    %127 = arith.mulf %126, %125 : vector<16x128xf32>
    %128 = math.tanh %127 : vector<16x128xf32>
    %cst_56 = arith.constant 5.000000e-01 : f32
    %129 = vector.broadcast %cst_56 : f32 to vector<16x128xf32>
    %130 = arith.mulf %129, %128 : vector<16x128xf32>
    %cst_57 = arith.constant 5.000000e-01 : f32
    %131 = vector.broadcast %cst_57 : f32 to vector<16x128xf32>
    %132 = arith.addf %130, %131 : vector<16x128xf32>
    %133 = vector.extract_strided_slice %117 {offsets = [0, 128], sizes = [16, 128], strides = [1, 1]} : vector<16x256xf32> to vector<16x128xf32>
    %cst_58 = arith.constant 5.000000e-01 : f32
    %134 = vector.broadcast %cst_58 : f32 to vector<16x128xf32>
    %135 = arith.mulf %134, %133 : vector<16x128xf32>
    %136 = math.tanh %135 : vector<16x128xf32>
    %cst_59 = arith.constant 5.000000e-01 : f32
    %137 = vector.broadcast %cst_59 : f32 to vector<16x128xf32>
    %138 = arith.mulf %137, %136 : vector<16x128xf32>
    %cst_60 = arith.constant 5.000000e-01 : f32
    %139 = vector.broadcast %cst_60 : f32 to vector<16x128xf32>
    %140 = arith.addf %138, %139 : vector<16x128xf32>
    %141 = vector.extract_strided_slice %124 {offsets = [0, 0], sizes = [16, 128], strides = [1, 1]} : vector<16x256xf32> to vector<16x128xf32>
    %142 = math.tanh %141 : vector<16x128xf32>
    %143 = vector.extract_strided_slice %124 {offsets = [0, 128], sizes = [16, 128], strides = [1, 1]} : vector<16x256xf32> to vector<16x128xf32>
    %cst_61 = arith.constant 5.000000e-01 : f32
    %144 = vector.broadcast %cst_61 : f32 to vector<16x128xf32>
    %145 = arith.mulf %144, %143 : vector<16x128xf32>
    %146 = math.tanh %145 : vector<16x128xf32>
    %cst_62 = arith.constant 5.000000e-01 : f32
    %147 = vector.broadcast %cst_62 : f32 to vector<16x128xf32>
    %148 = arith.mulf %147, %146 : vector<16x128xf32>
    %cst_63 = arith.constant 5.000000e-01 : f32
    %149 = vector.broadcast %cst_63 : f32 to vector<16x128xf32>
    %150 = arith.addf %148, %149 : vector<16x128xf32>
    %151 = arith.mulf %140, %102 : vector<16x128xf32>
    %152 = arith.mulf %132, %142 : vector<16x128xf32>
    %153 = arith.addf %151, %152 : vector<16x128xf32>
    %154 = math.tanh %153 : vector<16x128xf32>
    %155 = arith.mulf %150, %154 : vector<16x128xf32>
    %156 = arith.index_cast %c2_i32 : i32 to index
    %157 = memref.load %arg5[%156] : memref<12xf32, #tpu.memory_space<smem>>
    %158 = vector.broadcast %157 : f32 to vector<16x128xf32>
    %159 = arith.mulf %158, %155 : vector<16x128xf32>
    %160 = arith.addf %109, %159 : vector<16x128xf32>
    %c3_i32 = arith.constant 3 : i32
    %161 = arith.truncf %155 : vector<16x128xf32> to vector<16x128xbf16>
    %162 = arith.index_cast %c3_i32 : i32 to index
    %c0_64 = arith.constant 0 : index
    %c0_65 = arith.constant 0 : index
    %163 = vector.load %arg8[%162, %c0_64, %c0_65] : memref<12x16x512xbf16, #tpu.memory_space<vmem>>, vector<1x16x256xbf16>
    %164 = vector.shape_cast %163 : vector<1x16x256xbf16> to vector<16x256xbf16>
    %165 = arith.extf %164 : vector<16x256xbf16> to vector<16x256xf32>
    %c0_66 = arith.constant 0 : index
    %c0_67 = arith.constant 0 : index
    %166 = vector.load %arg3[%c0_66, %c0_67] : memref<128x512xbf16, #tpu.memory_space<vmem>>, vector<128x256xbf16>
    %cst_68 = arith.constant dense<0.000000e+00> : vector<16x256xf32>
    %167 = tpu.matmul %161, %166, %cst_68 {dimension_numbers = #tpu.dot_dimension_numbers<[1], [0], [0], [1], [0, 0, 1, 1], [], []>} : vector<16x128xbf16>, vector<128x256xbf16>, vector<16x256xf32> -> vector<16x256xf32>
    %168 = arith.addf %165, %167 : vector<16x256xf32>
    %169 = arith.index_cast %c3_i32 : i32 to index
    %c0_69 = arith.constant 0 : index
    %c256_70 = arith.constant 256 : index
    %170 = vector.load %arg8[%169, %c0_69, %c256_70] : memref<12x16x512xbf16, #tpu.memory_space<vmem>>, vector<1x16x256xbf16>
    %171 = vector.shape_cast %170 : vector<1x16x256xbf16> to vector<16x256xbf16>
    %172 = arith.extf %171 : vector<16x256xbf16> to vector<16x256xf32>
    %c0_71 = arith.constant 0 : index
    %c256_72 = arith.constant 256 : index
    %173 = vector.load %arg3[%c0_71, %c256_72] : memref<128x512xbf16, #tpu.memory_space<vmem>>, vector<128x256xbf16>
    %cst_73 = arith.constant dense<0.000000e+00> : vector<16x256xf32>
    %174 = tpu.matmul %161, %173, %cst_73 {dimension_numbers = #tpu.dot_dimension_numbers<[1], [0], [0], [1], [0, 0, 1, 1], [], []>} : vector<16x128xbf16>, vector<128x256xbf16>, vector<16x256xf32> -> vector<16x256xf32>
    %175 = arith.addf %172, %174 : vector<16x256xf32>
    %176 = vector.extract_strided_slice %168 {offsets = [0, 0], sizes = [16, 128], strides = [1, 1]} : vector<16x256xf32> to vector<16x128xf32>
    %cst_74 = arith.constant 5.000000e-01 : f32
    %177 = vector.broadcast %cst_74 : f32 to vector<16x128xf32>
    %178 = arith.mulf %177, %176 : vector<16x128xf32>
    %179 = math.tanh %178 : vector<16x128xf32>
    %cst_75 = arith.constant 5.000000e-01 : f32
    %180 = vector.broadcast %cst_75 : f32 to vector<16x128xf32>
    %181 = arith.mulf %180, %179 : vector<16x128xf32>
    %cst_76 = arith.constant 5.000000e-01 : f32
    %182 = vector.broadcast %cst_76 : f32 to vector<16x128xf32>
    %183 = arith.addf %181, %182 : vector<16x128xf32>
    %184 = vector.extract_strided_slice %168 {offsets = [0, 128], sizes = [16, 128], strides = [1, 1]} : vector<16x256xf32> to vector<16x128xf32>
    %cst_77 = arith.constant 5.000000e-01 : f32
    %185 = vector.broadcast %cst_77 : f32 to vector<16x128xf32>
    %186 = arith.mulf %185, %184 : vector<16x128xf32>
    %187 = math.tanh %186 : vector<16x128xf32>
    %cst_78 = arith.constant 5.000000e-01 : f32
    %188 = vector.broadcast %cst_78 : f32 to vector<16x128xf32>
    %189 = arith.mulf %188, %187 : vector<16x128xf32>
    %cst_79 = arith.constant 5.000000e-01 : f32
    %190 = vector.broadcast %cst_79 : f32 to vector<16x128xf32>
    %191 = arith.addf %189, %190 : vector<16x128xf32>
    %192 = vector.extract_strided_slice %175 {offsets = [0, 0], sizes = [16, 128], strides = [1, 1]} : vector<16x256xf32> to vector<16x128xf32>
    %193 = math.tanh %192 : vector<16x128xf32>
    %194 = vector.extract_strided_slice %175 {offsets = [0, 128], sizes = [16, 128], strides = [1, 1]} : vector<16x256xf32> to vector<16x128xf32>
    %cst_80 = arith.constant 5.000000e-01 : f32
    %195 = vector.broadcast %cst_80 : f32 to vector<16x128xf32>
    %196 = arith.mulf %195, %194 : vector<16x128xf32>
    %197 = math.tanh %196 : vector<16x128xf32>
    %cst_81 = arith.constant 5.000000e-01 : f32
    %198 = vector.broadcast %cst_81 : f32 to vector<16x128xf32>
    %199 = arith.mulf %198, %197 : vector<16x128xf32>
    %cst_82 = arith.constant 5.000000e-01 : f32
    %200 = vector.broadcast %cst_82 : f32 to vector<16x128xf32>
    %201 = arith.addf %199, %200 : vector<16x128xf32>
    %202 = arith.mulf %191, %153 : vector<16x128xf32>
    %203 = arith.mulf %183, %193 : vector<16x128xf32>
    %204 = arith.addf %202, %203 : vector<16x128xf32>
    %205 = math.tanh %204 : vector<16x128xf32>
    %206 = arith.mulf %201, %205 : vector<16x128xf32>
    %207 = arith.index_cast %c3_i32 : i32 to index
    %208 = memref.load %arg5[%207] : memref<12xf32, #tpu.memory_space<smem>>
    %209 = vector.broadcast %208 : f32 to vector<16x128xf32>
    %210 = arith.mulf %209, %206 : vector<16x128xf32>
    %211 = arith.addf %160, %210 : vector<16x128xf32>
    %c4_i32 = arith.constant 4 : i32
    %212 = arith.truncf %206 : vector<16x128xf32> to vector<16x128xbf16>
    %213 = arith.index_cast %c4_i32 : i32 to index
    %c0_83 = arith.constant 0 : index
    %c0_84 = arith.constant 0 : index
    %214 = vector.load %arg8[%213, %c0_83, %c0_84] : memref<12x16x512xbf16, #tpu.memory_space<vmem>>, vector<1x16x256xbf16>
    %215 = vector.shape_cast %214 : vector<1x16x256xbf16> to vector<16x256xbf16>
    %216 = arith.extf %215 : vector<16x256xbf16> to vector<16x256xf32>
    %c0_85 = arith.constant 0 : index
    %c0_86 = arith.constant 0 : index
    %217 = vector.load %arg3[%c0_85, %c0_86] : memref<128x512xbf16, #tpu.memory_space<vmem>>, vector<128x256xbf16>
    %cst_87 = arith.constant dense<0.000000e+00> : vector<16x256xf32>
    %218 = tpu.matmul %212, %217, %cst_87 {dimension_numbers = #tpu.dot_dimension_numbers<[1], [0], [0], [1], [0, 0, 1, 1], [], []>} : vector<16x128xbf16>, vector<128x256xbf16>, vector<16x256xf32> -> vector<16x256xf32>
    %219 = arith.addf %216, %218 : vector<16x256xf32>
    %220 = arith.index_cast %c4_i32 : i32 to index
    %c0_88 = arith.constant 0 : index
    %c256_89 = arith.constant 256 : index
    %221 = vector.load %arg8[%220, %c0_88, %c256_89] : memref<12x16x512xbf16, #tpu.memory_space<vmem>>, vector<1x16x256xbf16>
    %222 = vector.shape_cast %221 : vector<1x16x256xbf16> to vector<16x256xbf16>
    %223 = arith.extf %222 : vector<16x256xbf16> to vector<16x256xf32>
    %c0_90 = arith.constant 0 : index
    %c256_91 = arith.constant 256 : index
    %224 = vector.load %arg3[%c0_90, %c256_91] : memref<128x512xbf16, #tpu.memory_space<vmem>>, vector<128x256xbf16>
    %cst_92 = arith.constant dense<0.000000e+00> : vector<16x256xf32>
    %225 = tpu.matmul %212, %224, %cst_92 {dimension_numbers = #tpu.dot_dimension_numbers<[1], [0], [0], [1], [0, 0, 1, 1], [], []>} : vector<16x128xbf16>, vector<128x256xbf16>, vector<16x256xf32> -> vector<16x256xf32>
    %226 = arith.addf %223, %225 : vector<16x256xf32>
    %227 = vector.extract_strided_slice %219 {offsets = [0, 0], sizes = [16, 128], strides = [1, 1]} : vector<16x256xf32> to vector<16x128xf32>
    %cst_93 = arith.constant 5.000000e-01 : f32
    %228 = vector.broadcast %cst_93 : f32 to vector<16x128xf32>
    %229 = arith.mulf %228, %227 : vector<16x128xf32>
    %230 = math.tanh %229 : vector<16x128xf32>
    %cst_94 = arith.constant 5.000000e-01 : f32
    %231 = vector.broadcast %cst_94 : f32 to vector<16x128xf32>
    %232 = arith.mulf %231, %230 : vector<16x128xf32>
    %cst_95 = arith.constant 5.000000e-01 : f32
    %233 = vector.broadcast %cst_95 : f32 to vector<16x128xf32>
    %234 = arith.addf %232, %233 : vector<16x128xf32>
    %235 = vector.extract_strided_slice %219 {offsets = [0, 128], sizes = [16, 128], strides = [1, 1]} : vector<16x256xf32> to vector<16x128xf32>
    %cst_96 = arith.constant 5.000000e-01 : f32
    %236 = vector.broadcast %cst_96 : f32 to vector<16x128xf32>
    %237 = arith.mulf %236, %235 : vector<16x128xf32>
    %238 = math.tanh %237 : vector<16x128xf32>
    %cst_97 = arith.constant 5.000000e-01 : f32
    %239 = vector.broadcast %cst_97 : f32 to vector<16x128xf32>
    %240 = arith.mulf %239, %238 : vector<16x128xf32>
    %cst_98 = arith.constant 5.000000e-01 : f32
    %241 = vector.broadcast %cst_98 : f32 to vector<16x128xf32>
    %242 = arith.addf %240, %241 : vector<16x128xf32>
    %243 = vector.extract_strided_slice %226 {offsets = [0, 0], sizes = [16, 128], strides = [1, 1]} : vector<16x256xf32> to vector<16x128xf32>
    %244 = math.tanh %243 : vector<16x128xf32>
    %245 = vector.extract_strided_slice %226 {offsets = [0, 128], sizes = [16, 128], strides = [1, 1]} : vector<16x256xf32> to vector<16x128xf32>
    %cst_99 = arith.constant 5.000000e-01 : f32
    %246 = vector.broadcast %cst_99 : f32 to vector<16x128xf32>
    %247 = arith.mulf %246, %245 : vector<16x128xf32>
    %248 = math.tanh %247 : vector<16x128xf32>
    %cst_100 = arith.constant 5.000000e-01 : f32
    %249 = vector.broadcast %cst_100 : f32 to vector<16x128xf32>
    %250 = arith.mulf %249, %248 : vector<16x128xf32>
    %cst_101 = arith.constant 5.000000e-01 : f32
    %251 = vector.broadcast %cst_101 : f32 to vector<16x128xf32>
    %252 = arith.addf %250, %251 : vector<16x128xf32>
    %253 = arith.mulf %242, %204 : vector<16x128xf32>
    %254 = arith.mulf %234, %244 : vector<16x128xf32>
    %255 = arith.addf %253, %254 : vector<16x128xf32>
    %256 = math.tanh %255 : vector<16x128xf32>
    %257 = arith.mulf %252, %256 : vector<16x128xf32>
    %258 = arith.index_cast %c4_i32 : i32 to index
    %259 = memref.load %arg5[%258] : memref<12xf32, #tpu.memory_space<smem>>
    %260 = vector.broadcast %259 : f32 to vector<16x128xf32>
    %261 = arith.mulf %260, %257 : vector<16x128xf32>
    %262 = arith.addf %211, %261 : vector<16x128xf32>
    %c5_i32 = arith.constant 5 : i32
    %263 = arith.truncf %257 : vector<16x128xf32> to vector<16x128xbf16>
    %264 = arith.index_cast %c5_i32 : i32 to index
    %c0_102 = arith.constant 0 : index
    %c0_103 = arith.constant 0 : index
    %265 = vector.load %arg8[%264, %c0_102, %c0_103] : memref<12x16x512xbf16, #tpu.memory_space<vmem>>, vector<1x16x256xbf16>
    %266 = vector.shape_cast %265 : vector<1x16x256xbf16> to vector<16x256xbf16>
    %267 = arith.extf %266 : vector<16x256xbf16> to vector<16x256xf32>
    %c0_104 = arith.constant 0 : index
    %c0_105 = arith.constant 0 : index
    %268 = vector.load %arg3[%c0_104, %c0_105] : memref<128x512xbf16, #tpu.memory_space<vmem>>, vector<128x256xbf16>
    %cst_106 = arith.constant dense<0.000000e+00> : vector<16x256xf32>
    %269 = tpu.matmul %263, %268, %cst_106 {dimension_numbers = #tpu.dot_dimension_numbers<[1], [0], [0], [1], [0, 0, 1, 1], [], []>} : vector<16x128xbf16>, vector<128x256xbf16>, vector<16x256xf32> -> vector<16x256xf32>
    %270 = arith.addf %267, %269 : vector<16x256xf32>
    %271 = arith.index_cast %c5_i32 : i32 to index
    %c0_107 = arith.constant 0 : index
    %c256_108 = arith.constant 256 : index
    %272 = vector.load %arg8[%271, %c0_107, %c256_108] : memref<12x16x512xbf16, #tpu.memory_space<vmem>>, vector<1x16x256xbf16>
    %273 = vector.shape_cast %272 : vector<1x16x256xbf16> to vector<16x256xbf16>
    %274 = arith.extf %273 : vector<16x256xbf16> to vector<16x256xf32>
    %c0_109 = arith.constant 0 : index
    %c256_110 = arith.constant 256 : index
    %275 = vector.load %arg3[%c0_109, %c256_110] : memref<128x512xbf16, #tpu.memory_space<vmem>>, vector<128x256xbf16>
    %cst_111 = arith.constant dense<0.000000e+00> : vector<16x256xf32>
    %276 = tpu.matmul %263, %275, %cst_111 {dimension_numbers = #tpu.dot_dimension_numbers<[1], [0], [0], [1], [0, 0, 1, 1], [], []>} : vector<16x128xbf16>, vector<128x256xbf16>, vector<16x256xf32> -> vector<16x256xf32>
    %277 = arith.addf %274, %276 : vector<16x256xf32>
    %278 = vector.extract_strided_slice %270 {offsets = [0, 0], sizes = [16, 128], strides = [1, 1]} : vector<16x256xf32> to vector<16x128xf32>
    %cst_112 = arith.constant 5.000000e-01 : f32
    %279 = vector.broadcast %cst_112 : f32 to vector<16x128xf32>
    %280 = arith.mulf %279, %278 : vector<16x128xf32>
    %281 = math.tanh %280 : vector<16x128xf32>
    %cst_113 = arith.constant 5.000000e-01 : f32
    %282 = vector.broadcast %cst_113 : f32 to vector<16x128xf32>
    %283 = arith.mulf %282, %281 : vector<16x128xf32>
    %cst_114 = arith.constant 5.000000e-01 : f32
    %284 = vector.broadcast %cst_114 : f32 to vector<16x128xf32>
    %285 = arith.addf %283, %284 : vector<16x128xf32>
    %286 = vector.extract_strided_slice %270 {offsets = [0, 128], sizes = [16, 128], strides = [1, 1]} : vector<16x256xf32> to vector<16x128xf32>
    %cst_115 = arith.constant 5.000000e-01 : f32
    %287 = vector.broadcast %cst_115 : f32 to vector<16x128xf32>
    %288 = arith.mulf %287, %286 : vector<16x128xf32>
    %289 = math.tanh %288 : vector<16x128xf32>
    %cst_116 = arith.constant 5.000000e-01 : f32
    %290 = vector.broadcast %cst_116 : f32 to vector<16x128xf32>
    %291 = arith.mulf %290, %289 : vector<16x128xf32>
    %cst_117 = arith.constant 5.000000e-01 : f32
    %292 = vector.broadcast %cst_117 : f32 to vector<16x128xf32>
    %293 = arith.addf %291, %292 : vector<16x128xf32>
    %294 = vector.extract_strided_slice %277 {offsets = [0, 0], sizes = [16, 128], strides = [1, 1]} : vector<16x256xf32> to vector<16x128xf32>
    %295 = math.tanh %294 : vector<16x128xf32>
    %296 = vector.extract_strided_slice %277 {offsets = [0, 128], sizes = [16, 128], strides = [1, 1]} : vector<16x256xf32> to vector<16x128xf32>
    %cst_118 = arith.constant 5.000000e-01 : f32
    %297 = vector.broadcast %cst_118 : f32 to vector<16x128xf32>
    %298 = arith.mulf %297, %296 : vector<16x128xf32>
    %299 = math.tanh %298 : vector<16x128xf32>
    %cst_119 = arith.constant 5.000000e-01 : f32
    %300 = vector.broadcast %cst_119 : f32 to vector<16x128xf32>
    %301 = arith.mulf %300, %299 : vector<16x128xf32>
    %cst_120 = arith.constant 5.000000e-01 : f32
    %302 = vector.broadcast %cst_120 : f32 to vector<16x128xf32>
    %303 = arith.addf %301, %302 : vector<16x128xf32>
    %304 = arith.mulf %293, %255 : vector<16x128xf32>
    %305 = arith.mulf %285, %295 : vector<16x128xf32>
    %306 = arith.addf %304, %305 : vector<16x128xf32>
    %307 = math.tanh %306 : vector<16x128xf32>
    %308 = arith.mulf %303, %307 : vector<16x128xf32>
    %309 = arith.index_cast %c5_i32 : i32 to index
    %310 = memref.load %arg5[%309] : memref<12xf32, #tpu.memory_space<smem>>
    %311 = vector.broadcast %310 : f32 to vector<16x128xf32>
    %312 = arith.mulf %311, %308 : vector<16x128xf32>
    %313 = arith.addf %262, %312 : vector<16x128xf32>
    %c6_i32 = arith.constant 6 : i32
    %314 = arith.truncf %308 : vector<16x128xf32> to vector<16x128xbf16>
    %315 = arith.index_cast %c6_i32 : i32 to index
    %c0_121 = arith.constant 0 : index
    %c0_122 = arith.constant 0 : index
    %316 = vector.load %arg8[%315, %c0_121, %c0_122] : memref<12x16x512xbf16, #tpu.memory_space<vmem>>, vector<1x16x256xbf16>
    %317 = vector.shape_cast %316 : vector<1x16x256xbf16> to vector<16x256xbf16>
    %318 = arith.extf %317 : vector<16x256xbf16> to vector<16x256xf32>
    %c0_123 = arith.constant 0 : index
    %c0_124 = arith.constant 0 : index
    %319 = vector.load %arg3[%c0_123, %c0_124] : memref<128x512xbf16, #tpu.memory_space<vmem>>, vector<128x256xbf16>
    %cst_125 = arith.constant dense<0.000000e+00> : vector<16x256xf32>
    %320 = tpu.matmul %314, %319, %cst_125 {dimension_numbers = #tpu.dot_dimension_numbers<[1], [0], [0], [1], [0, 0, 1, 1], [], []>} : vector<16x128xbf16>, vector<128x256xbf16>, vector<16x256xf32> -> vector<16x256xf32>
    %321 = arith.addf %318, %320 : vector<16x256xf32>
    %322 = arith.index_cast %c6_i32 : i32 to index
    %c0_126 = arith.constant 0 : index
    %c256_127 = arith.constant 256 : index
    %323 = vector.load %arg8[%322, %c0_126, %c256_127] : memref<12x16x512xbf16, #tpu.memory_space<vmem>>, vector<1x16x256xbf16>
    %324 = vector.shape_cast %323 : vector<1x16x256xbf16> to vector<16x256xbf16>
    %325 = arith.extf %324 : vector<16x256xbf16> to vector<16x256xf32>
    %c0_128 = arith.constant 0 : index
    %c256_129 = arith.constant 256 : index
    %326 = vector.load %arg3[%c0_128, %c256_129] : memref<128x512xbf16, #tpu.memory_space<vmem>>, vector<128x256xbf16>
    %cst_130 = arith.constant dense<0.000000e+00> : vector<16x256xf32>
    %327 = tpu.matmul %314, %326, %cst_130 {dimension_numbers = #tpu.dot_dimension_numbers<[1], [0], [0], [1], [0, 0, 1, 1], [], []>} : vector<16x128xbf16>, vector<128x256xbf16>, vector<16x256xf32> -> vector<16x256xf32>
    %328 = arith.addf %325, %327 : vector<16x256xf32>
    %329 = vector.extract_strided_slice %321 {offsets = [0, 0], sizes = [16, 128], strides = [1, 1]} : vector<16x256xf32> to vector<16x128xf32>
    %cst_131 = arith.constant 5.000000e-01 : f32
    %330 = vector.broadcast %cst_131 : f32 to vector<16x128xf32>
    %331 = arith.mulf %330, %329 : vector<16x128xf32>
    %332 = math.tanh %331 : vector<16x128xf32>
    %cst_132 = arith.constant 5.000000e-01 : f32
    %333 = vector.broadcast %cst_132 : f32 to vector<16x128xf32>
    %334 = arith.mulf %333, %332 : vector<16x128xf32>
    %cst_133 = arith.constant 5.000000e-01 : f32
    %335 = vector.broadcast %cst_133 : f32 to vector<16x128xf32>
    %336 = arith.addf %334, %335 : vector<16x128xf32>
    %337 = vector.extract_strided_slice %321 {offsets = [0, 128], sizes = [16, 128], strides = [1, 1]} : vector<16x256xf32> to vector<16x128xf32>
    %cst_134 = arith.constant 5.000000e-01 : f32
    %338 = vector.broadcast %cst_134 : f32 to vector<16x128xf32>
    %339 = arith.mulf %338, %337 : vector<16x128xf32>
    %340 = math.tanh %339 : vector<16x128xf32>
    %cst_135 = arith.constant 5.000000e-01 : f32
    %341 = vector.broadcast %cst_135 : f32 to vector<16x128xf32>
    %342 = arith.mulf %341, %340 : vector<16x128xf32>
    %cst_136 = arith.constant 5.000000e-01 : f32
    %343 = vector.broadcast %cst_136 : f32 to vector<16x128xf32>
    %344 = arith.addf %342, %343 : vector<16x128xf32>
    %345 = vector.extract_strided_slice %328 {offsets = [0, 0], sizes = [16, 128], strides = [1, 1]} : vector<16x256xf32> to vector<16x128xf32>
    %346 = math.tanh %345 : vector<16x128xf32>
    %347 = vector.extract_strided_slice %328 {offsets = [0, 128], sizes = [16, 128], strides = [1, 1]} : vector<16x256xf32> to vector<16x128xf32>
    %cst_137 = arith.constant 5.000000e-01 : f32
    %348 = vector.broadcast %cst_137 : f32 to vector<16x128xf32>
    %349 = arith.mulf %348, %347 : vector<16x128xf32>
    %350 = math.tanh %349 : vector<16x128xf32>
    %cst_138 = arith.constant 5.000000e-01 : f32
    %351 = vector.broadcast %cst_138 : f32 to vector<16x128xf32>
    %352 = arith.mulf %351, %350 : vector<16x128xf32>
    %cst_139 = arith.constant 5.000000e-01 : f32
    %353 = vector.broadcast %cst_139 : f32 to vector<16x128xf32>
    %354 = arith.addf %352, %353 : vector<16x128xf32>
    %355 = arith.mulf %344, %306 : vector<16x128xf32>
    %356 = arith.mulf %336, %346 : vector<16x128xf32>
    %357 = arith.addf %355, %356 : vector<16x128xf32>
    %358 = math.tanh %357 : vector<16x128xf32>
    %359 = arith.mulf %354, %358 : vector<16x128xf32>
    %360 = arith.index_cast %c6_i32 : i32 to index
    %361 = memref.load %arg5[%360] : memref<12xf32, #tpu.memory_space<smem>>
    %362 = vector.broadcast %361 : f32 to vector<16x128xf32>
    %363 = arith.mulf %362, %359 : vector<16x128xf32>
    %364 = arith.addf %313, %363 : vector<16x128xf32>
    %c7_i32 = arith.constant 7 : i32
    %365 = arith.truncf %359 : vector<16x128xf32> to vector<16x128xbf16>
    %366 = arith.index_cast %c7_i32 : i32 to index
    %c0_140 = arith.constant 0 : index
    %c0_141 = arith.constant 0 : index
    %367 = vector.load %arg8[%366, %c0_140, %c0_141] : memref<12x16x512xbf16, #tpu.memory_space<vmem>>, vector<1x16x256xbf16>
    %368 = vector.shape_cast %367 : vector<1x16x256xbf16> to vector<16x256xbf16>
    %369 = arith.extf %368 : vector<16x256xbf16> to vector<16x256xf32>
    %c0_142 = arith.constant 0 : index
    %c0_143 = arith.constant 0 : index
    %370 = vector.load %arg3[%c0_142, %c0_143] : memref<128x512xbf16, #tpu.memory_space<vmem>>, vector<128x256xbf16>
    %cst_144 = arith.constant dense<0.000000e+00> : vector<16x256xf32>
    %371 = tpu.matmul %365, %370, %cst_144 {dimension_numbers = #tpu.dot_dimension_numbers<[1], [0], [0], [1], [0, 0, 1, 1], [], []>} : vector<16x128xbf16>, vector<128x256xbf16>, vector<16x256xf32> -> vector<16x256xf32>
    %372 = arith.addf %369, %371 : vector<16x256xf32>
    %373 = arith.index_cast %c7_i32 : i32 to index
    %c0_145 = arith.constant 0 : index
    %c256_146 = arith.constant 256 : index
    %374 = vector.load %arg8[%373, %c0_145, %c256_146] : memref<12x16x512xbf16, #tpu.memory_space<vmem>>, vector<1x16x256xbf16>
    %375 = vector.shape_cast %374 : vector<1x16x256xbf16> to vector<16x256xbf16>
    %376 = arith.extf %375 : vector<16x256xbf16> to vector<16x256xf32>
    %c0_147 = arith.constant 0 : index
    %c256_148 = arith.constant 256 : index
    %377 = vector.load %arg3[%c0_147, %c256_148] : memref<128x512xbf16, #tpu.memory_space<vmem>>, vector<128x256xbf16>
    %cst_149 = arith.constant dense<0.000000e+00> : vector<16x256xf32>
    %378 = tpu.matmul %365, %377, %cst_149 {dimension_numbers = #tpu.dot_dimension_numbers<[1], [0], [0], [1], [0, 0, 1, 1], [], []>} : vector<16x128xbf16>, vector<128x256xbf16>, vector<16x256xf32> -> vector<16x256xf32>
    %379 = arith.addf %376, %378 : vector<16x256xf32>
    %380 = vector.extract_strided_slice %372 {offsets = [0, 0], sizes = [16, 128], strides = [1, 1]} : vector<16x256xf32> to vector<16x128xf32>
    %cst_150 = arith.constant 5.000000e-01 : f32
    %381 = vector.broadcast %cst_150 : f32 to vector<16x128xf32>
    %382 = arith.mulf %381, %380 : vector<16x128xf32>
    %383 = math.tanh %382 : vector<16x128xf32>
    %cst_151 = arith.constant 5.000000e-01 : f32
    %384 = vector.broadcast %cst_151 : f32 to vector<16x128xf32>
    %385 = arith.mulf %384, %383 : vector<16x128xf32>
    %cst_152 = arith.constant 5.000000e-01 : f32
    %386 = vector.broadcast %cst_152 : f32 to vector<16x128xf32>
    %387 = arith.addf %385, %386 : vector<16x128xf32>
    %388 = vector.extract_strided_slice %372 {offsets = [0, 128], sizes = [16, 128], strides = [1, 1]} : vector<16x256xf32> to vector<16x128xf32>
    %cst_153 = arith.constant 5.000000e-01 : f32
    %389 = vector.broadcast %cst_153 : f32 to vector<16x128xf32>
    %390 = arith.mulf %389, %388 : vector<16x128xf32>
    %391 = math.tanh %390 : vector<16x128xf32>
    %cst_154 = arith.constant 5.000000e-01 : f32
    %392 = vector.broadcast %cst_154 : f32 to vector<16x128xf32>
    %393 = arith.mulf %392, %391 : vector<16x128xf32>
    %cst_155 = arith.constant 5.000000e-01 : f32
    %394 = vector.broadcast %cst_155 : f32 to vector<16x128xf32>
    %395 = arith.addf %393, %394 : vector<16x128xf32>
    %396 = vector.extract_strided_slice %379 {offsets = [0, 0], sizes = [16, 128], strides = [1, 1]} : vector<16x256xf32> to vector<16x128xf32>
    %397 = math.tanh %396 : vector<16x128xf32>
    %398 = vector.extract_strided_slice %379 {offsets = [0, 128], sizes = [16, 128], strides = [1, 1]} : vector<16x256xf32> to vector<16x128xf32>
    %cst_156 = arith.constant 5.000000e-01 : f32
    %399 = vector.broadcast %cst_156 : f32 to vector<16x128xf32>
    %400 = arith.mulf %399, %398 : vector<16x128xf32>
    %401 = math.tanh %400 : vector<16x128xf32>
    %cst_157 = arith.constant 5.000000e-01 : f32
    %402 = vector.broadcast %cst_157 : f32 to vector<16x128xf32>
    %403 = arith.mulf %402, %401 : vector<16x128xf32>
    %cst_158 = arith.constant 5.000000e-01 : f32
    %404 = vector.broadcast %cst_158 : f32 to vector<16x128xf32>
    %405 = arith.addf %403, %404 : vector<16x128xf32>
    %406 = arith.mulf %395, %357 : vector<16x128xf32>
    %407 = arith.mulf %387, %397 : vector<16x128xf32>
    %408 = arith.addf %406, %407 : vector<16x128xf32>
    %409 = math.tanh %408 : vector<16x128xf32>
    %410 = arith.mulf %405, %409 : vector<16x128xf32>
    %411 = arith.index_cast %c7_i32 : i32 to index
    %412 = memref.load %arg5[%411] : memref<12xf32, #tpu.memory_space<smem>>
    %413 = vector.broadcast %412 : f32 to vector<16x128xf32>
    %414 = arith.mulf %413, %410 : vector<16x128xf32>
    %415 = arith.addf %364, %414 : vector<16x128xf32>
    %c8_i32 = arith.constant 8 : i32
    %416 = arith.truncf %410 : vector<16x128xf32> to vector<16x128xbf16>
    %417 = arith.index_cast %c8_i32 : i32 to index
    %c0_159 = arith.constant 0 : index
    %c0_160 = arith.constant 0 : index
    %418 = vector.load %arg8[%417, %c0_159, %c0_160] : memref<12x16x512xbf16, #tpu.memory_space<vmem>>, vector<1x16x256xbf16>
    %419 = vector.shape_cast %418 : vector<1x16x256xbf16> to vector<16x256xbf16>
    %420 = arith.extf %419 : vector<16x256xbf16> to vector<16x256xf32>
    %c0_161 = arith.constant 0 : index
    %c0_162 = arith.constant 0 : index
    %421 = vector.load %arg3[%c0_161, %c0_162] : memref<128x512xbf16, #tpu.memory_space<vmem>>, vector<128x256xbf16>
    %cst_163 = arith.constant dense<0.000000e+00> : vector<16x256xf32>
    %422 = tpu.matmul %416, %421, %cst_163 {dimension_numbers = #tpu.dot_dimension_numbers<[1], [0], [0], [1], [0, 0, 1, 1], [], []>} : vector<16x128xbf16>, vector<128x256xbf16>, vector<16x256xf32> -> vector<16x256xf32>
    %423 = arith.addf %420, %422 : vector<16x256xf32>
    %424 = arith.index_cast %c8_i32 : i32 to index
    %c0_164 = arith.constant 0 : index
    %c256_165 = arith.constant 256 : index
    %425 = vector.load %arg8[%424, %c0_164, %c256_165] : memref<12x16x512xbf16, #tpu.memory_space<vmem>>, vector<1x16x256xbf16>
    %426 = vector.shape_cast %425 : vector<1x16x256xbf16> to vector<16x256xbf16>
    %427 = arith.extf %426 : vector<16x256xbf16> to vector<16x256xf32>
    %c0_166 = arith.constant 0 : index
    %c256_167 = arith.constant 256 : index
    %428 = vector.load %arg3[%c0_166, %c256_167] : memref<128x512xbf16, #tpu.memory_space<vmem>>, vector<128x256xbf16>
    %cst_168 = arith.constant dense<0.000000e+00> : vector<16x256xf32>
    %429 = tpu.matmul %416, %428, %cst_168 {dimension_numbers = #tpu.dot_dimension_numbers<[1], [0], [0], [1], [0, 0, 1, 1], [], []>} : vector<16x128xbf16>, vector<128x256xbf16>, vector<16x256xf32> -> vector<16x256xf32>
    %430 = arith.addf %427, %429 : vector<16x256xf32>
    %431 = vector.extract_strided_slice %423 {offsets = [0, 0], sizes = [16, 128], strides = [1, 1]} : vector<16x256xf32> to vector<16x128xf32>
    %cst_169 = arith.constant 5.000000e-01 : f32
    %432 = vector.broadcast %cst_169 : f32 to vector<16x128xf32>
    %433 = arith.mulf %432, %431 : vector<16x128xf32>
    %434 = math.tanh %433 : vector<16x128xf32>
    %cst_170 = arith.constant 5.000000e-01 : f32
    %435 = vector.broadcast %cst_170 : f32 to vector<16x128xf32>
    %436 = arith.mulf %435, %434 : vector<16x128xf32>
    %cst_171 = arith.constant 5.000000e-01 : f32
    %437 = vector.broadcast %cst_171 : f32 to vector<16x128xf32>
    %438 = arith.addf %436, %437 : vector<16x128xf32>
    %439 = vector.extract_strided_slice %423 {offsets = [0, 128], sizes = [16, 128], strides = [1, 1]} : vector<16x256xf32> to vector<16x128xf32>
    %cst_172 = arith.constant 5.000000e-01 : f32
    %440 = vector.broadcast %cst_172 : f32 to vector<16x128xf32>
    %441 = arith.mulf %440, %439 : vector<16x128xf32>
    %442 = math.tanh %441 : vector<16x128xf32>
    %cst_173 = arith.constant 5.000000e-01 : f32
    %443 = vector.broadcast %cst_173 : f32 to vector<16x128xf32>
    %444 = arith.mulf %443, %442 : vector<16x128xf32>
    %cst_174 = arith.constant 5.000000e-01 : f32
    %445 = vector.broadcast %cst_174 : f32 to vector<16x128xf32>
    %446 = arith.addf %444, %445 : vector<16x128xf32>
    %447 = vector.extract_strided_slice %430 {offsets = [0, 0], sizes = [16, 128], strides = [1, 1]} : vector<16x256xf32> to vector<16x128xf32>
    %448 = math.tanh %447 : vector<16x128xf32>
    %449 = vector.extract_strided_slice %430 {offsets = [0, 128], sizes = [16, 128], strides = [1, 1]} : vector<16x256xf32> to vector<16x128xf32>
    %cst_175 = arith.constant 5.000000e-01 : f32
    %450 = vector.broadcast %cst_175 : f32 to vector<16x128xf32>
    %451 = arith.mulf %450, %449 : vector<16x128xf32>
    %452 = math.tanh %451 : vector<16x128xf32>
    %cst_176 = arith.constant 5.000000e-01 : f32
    %453 = vector.broadcast %cst_176 : f32 to vector<16x128xf32>
    %454 = arith.mulf %453, %452 : vector<16x128xf32>
    %cst_177 = arith.constant 5.000000e-01 : f32
    %455 = vector.broadcast %cst_177 : f32 to vector<16x128xf32>
    %456 = arith.addf %454, %455 : vector<16x128xf32>
    %457 = arith.mulf %446, %408 : vector<16x128xf32>
    %458 = arith.mulf %438, %448 : vector<16x128xf32>
    %459 = arith.addf %457, %458 : vector<16x128xf32>
    %460 = math.tanh %459 : vector<16x128xf32>
    %461 = arith.mulf %456, %460 : vector<16x128xf32>
    %462 = arith.index_cast %c8_i32 : i32 to index
    %463 = memref.load %arg5[%462] : memref<12xf32, #tpu.memory_space<smem>>
    %464 = vector.broadcast %463 : f32 to vector<16x128xf32>
    %465 = arith.mulf %464, %461 : vector<16x128xf32>
    %466 = arith.addf %415, %465 : vector<16x128xf32>
    %c9_i32 = arith.constant 9 : i32
    %467 = arith.truncf %461 : vector<16x128xf32> to vector<16x128xbf16>
    %468 = arith.index_cast %c9_i32 : i32 to index
    %c0_178 = arith.constant 0 : index
    %c0_179 = arith.constant 0 : index
    %469 = vector.load %arg8[%468, %c0_178, %c0_179] : memref<12x16x512xbf16, #tpu.memory_space<vmem>>, vector<1x16x256xbf16>
    %470 = vector.shape_cast %469 : vector<1x16x256xbf16> to vector<16x256xbf16>
    %471 = arith.extf %470 : vector<16x256xbf16> to vector<16x256xf32>
    %c0_180 = arith.constant 0 : index
    %c0_181 = arith.constant 0 : index
    %472 = vector.load %arg3[%c0_180, %c0_181] : memref<128x512xbf16, #tpu.memory_space<vmem>>, vector<128x256xbf16>
    %cst_182 = arith.constant dense<0.000000e+00> : vector<16x256xf32>
    %473 = tpu.matmul %467, %472, %cst_182 {dimension_numbers = #tpu.dot_dimension_numbers<[1], [0], [0], [1], [0, 0, 1, 1], [], []>} : vector<16x128xbf16>, vector<128x256xbf16>, vector<16x256xf32> -> vector<16x256xf32>
    %474 = arith.addf %471, %473 : vector<16x256xf32>
    %475 = arith.index_cast %c9_i32 : i32 to index
    %c0_183 = arith.constant 0 : index
    %c256_184 = arith.constant 256 : index
    %476 = vector.load %arg8[%475, %c0_183, %c256_184] : memref<12x16x512xbf16, #tpu.memory_space<vmem>>, vector<1x16x256xbf16>
    %477 = vector.shape_cast %476 : vector<1x16x256xbf16> to vector<16x256xbf16>
    %478 = arith.extf %477 : vector<16x256xbf16> to vector<16x256xf32>
    %c0_185 = arith.constant 0 : index
    %c256_186 = arith.constant 256 : index
    %479 = vector.load %arg3[%c0_185, %c256_186] : memref<128x512xbf16, #tpu.memory_space<vmem>>, vector<128x256xbf16>
    %cst_187 = arith.constant dense<0.000000e+00> : vector<16x256xf32>
    %480 = tpu.matmul %467, %479, %cst_187 {dimension_numbers = #tpu.dot_dimension_numbers<[1], [0], [0], [1], [0, 0, 1, 1], [], []>} : vector<16x128xbf16>, vector<128x256xbf16>, vector<16x256xf32> -> vector<16x256xf32>
    %481 = arith.addf %478, %480 : vector<16x256xf32>
    %482 = vector.extract_strided_slice %474 {offsets = [0, 0], sizes = [16, 128], strides = [1, 1]} : vector<16x256xf32> to vector<16x128xf32>
    %cst_188 = arith.constant 5.000000e-01 : f32
    %483 = vector.broadcast %cst_188 : f32 to vector<16x128xf32>
    %484 = arith.mulf %483, %482 : vector<16x128xf32>
    %485 = math.tanh %484 : vector<16x128xf32>
    %cst_189 = arith.constant 5.000000e-01 : f32
    %486 = vector.broadcast %cst_189 : f32 to vector<16x128xf32>
    %487 = arith.mulf %486, %485 : vector<16x128xf32>
    %cst_190 = arith.constant 5.000000e-01 : f32
    %488 = vector.broadcast %cst_190 : f32 to vector<16x128xf32>
    %489 = arith.addf %487, %488 : vector<16x128xf32>
    %490 = vector.extract_strided_slice %474 {offsets = [0, 128], sizes = [16, 128], strides = [1, 1]} : vector<16x256xf32> to vector<16x128xf32>
    %cst_191 = arith.constant 5.000000e-01 : f32
    %491 = vector.broadcast %cst_191 : f32 to vector<16x128xf32>
    %492 = arith.mulf %491, %490 : vector<16x128xf32>
    %493 = math.tanh %492 : vector<16x128xf32>
    %cst_192 = arith.constant 5.000000e-01 : f32
    %494 = vector.broadcast %cst_192 : f32 to vector<16x128xf32>
    %495 = arith.mulf %494, %493 : vector<16x128xf32>
    %cst_193 = arith.constant 5.000000e-01 : f32
    %496 = vector.broadcast %cst_193 : f32 to vector<16x128xf32>
    %497 = arith.addf %495, %496 : vector<16x128xf32>
    %498 = vector.extract_strided_slice %481 {offsets = [0, 0], sizes = [16, 128], strides = [1, 1]} : vector<16x256xf32> to vector<16x128xf32>
    %499 = math.tanh %498 : vector<16x128xf32>
    %500 = vector.extract_strided_slice %481 {offsets = [0, 128], sizes = [16, 128], strides = [1, 1]} : vector<16x256xf32> to vector<16x128xf32>
    %cst_194 = arith.constant 5.000000e-01 : f32
    %501 = vector.broadcast %cst_194 : f32 to vector<16x128xf32>
    %502 = arith.mulf %501, %500 : vector<16x128xf32>
    %503 = math.tanh %502 : vector<16x128xf32>
    %cst_195 = arith.constant 5.000000e-01 : f32
    %504 = vector.broadcast %cst_195 : f32 to vector<16x128xf32>
    %505 = arith.mulf %504, %503 : vector<16x128xf32>
    %cst_196 = arith.constant 5.000000e-01 : f32
    %506 = vector.broadcast %cst_196 : f32 to vector<16x128xf32>
    %507 = arith.addf %505, %506 : vector<16x128xf32>
    %508 = arith.mulf %497, %459 : vector<16x128xf32>
    %509 = arith.mulf %489, %499 : vector<16x128xf32>
    %510 = arith.addf %508, %509 : vector<16x128xf32>
    %511 = math.tanh %510 : vector<16x128xf32>
    %512 = arith.mulf %507, %511 : vector<16x128xf32>
    %513 = arith.index_cast %c9_i32 : i32 to index
    %514 = memref.load %arg5[%513] : memref<12xf32, #tpu.memory_space<smem>>
    %515 = vector.broadcast %514 : f32 to vector<16x128xf32>
    %516 = arith.mulf %515, %512 : vector<16x128xf32>
    %517 = arith.addf %466, %516 : vector<16x128xf32>
    %c10_i32 = arith.constant 10 : i32
    %518 = arith.truncf %512 : vector<16x128xf32> to vector<16x128xbf16>
    %519 = arith.index_cast %c10_i32 : i32 to index
    %c0_197 = arith.constant 0 : index
    %c0_198 = arith.constant 0 : index
    %520 = vector.load %arg8[%519, %c0_197, %c0_198] : memref<12x16x512xbf16, #tpu.memory_space<vmem>>, vector<1x16x256xbf16>
    %521 = vector.shape_cast %520 : vector<1x16x256xbf16> to vector<16x256xbf16>
    %522 = arith.extf %521 : vector<16x256xbf16> to vector<16x256xf32>
    %c0_199 = arith.constant 0 : index
    %c0_200 = arith.constant 0 : index
    %523 = vector.load %arg3[%c0_199, %c0_200] : memref<128x512xbf16, #tpu.memory_space<vmem>>, vector<128x256xbf16>
    %cst_201 = arith.constant dense<0.000000e+00> : vector<16x256xf32>
    %524 = tpu.matmul %518, %523, %cst_201 {dimension_numbers = #tpu.dot_dimension_numbers<[1], [0], [0], [1], [0, 0, 1, 1], [], []>} : vector<16x128xbf16>, vector<128x256xbf16>, vector<16x256xf32> -> vector<16x256xf32>
    %525 = arith.addf %522, %524 : vector<16x256xf32>
    %526 = arith.index_cast %c10_i32 : i32 to index
    %c0_202 = arith.constant 0 : index
    %c256_203 = arith.constant 256 : index
    %527 = vector.load %arg8[%526, %c0_202, %c256_203] : memref<12x16x512xbf16, #tpu.memory_space<vmem>>, vector<1x16x256xbf16>
    %528 = vector.shape_cast %527 : vector<1x16x256xbf16> to vector<16x256xbf16>
    %529 = arith.extf %528 : vector<16x256xbf16> to vector<16x256xf32>
    %c0_204 = arith.constant 0 : index
    %c256_205 = arith.constant 256 : index
    %530 = vector.load %arg3[%c0_204, %c256_205] : memref<128x512xbf16, #tpu.memory_space<vmem>>, vector<128x256xbf16>
    %cst_206 = arith.constant dense<0.000000e+00> : vector<16x256xf32>
    %531 = tpu.matmul %518, %530, %cst_206 {dimension_numbers = #tpu.dot_dimension_numbers<[1], [0], [0], [1], [0, 0, 1, 1], [], []>} : vector<16x128xbf16>, vector<128x256xbf16>, vector<16x256xf32> -> vector<16x256xf32>
    %532 = arith.addf %529, %531 : vector<16x256xf32>
    %533 = vector.extract_strided_slice %525 {offsets = [0, 0], sizes = [16, 128], strides = [1, 1]} : vector<16x256xf32> to vector<16x128xf32>
    %cst_207 = arith.constant 5.000000e-01 : f32
    %534 = vector.broadcast %cst_207 : f32 to vector<16x128xf32>
    %535 = arith.mulf %534, %533 : vector<16x128xf32>
    %536 = math.tanh %535 : vector<16x128xf32>
    %cst_208 = arith.constant 5.000000e-01 : f32
    %537 = vector.broadcast %cst_208 : f32 to vector<16x128xf32>
    %538 = arith.mulf %537, %536 : vector<16x128xf32>
    %cst_209 = arith.constant 5.000000e-01 : f32
    %539 = vector.broadcast %cst_209 : f32 to vector<16x128xf32>
    %540 = arith.addf %538, %539 : vector<16x128xf32>
    %541 = vector.extract_strided_slice %525 {offsets = [0, 128], sizes = [16, 128], strides = [1, 1]} : vector<16x256xf32> to vector<16x128xf32>
    %cst_210 = arith.constant 5.000000e-01 : f32
    %542 = vector.broadcast %cst_210 : f32 to vector<16x128xf32>
    %543 = arith.mulf %542, %541 : vector<16x128xf32>
    %544 = math.tanh %543 : vector<16x128xf32>
    %cst_211 = arith.constant 5.000000e-01 : f32
    %545 = vector.broadcast %cst_211 : f32 to vector<16x128xf32>
    %546 = arith.mulf %545, %544 : vector<16x128xf32>
    %cst_212 = arith.constant 5.000000e-01 : f32
    %547 = vector.broadcast %cst_212 : f32 to vector<16x128xf32>
    %548 = arith.addf %546, %547 : vector<16x128xf32>
    %549 = vector.extract_strided_slice %532 {offsets = [0, 0], sizes = [16, 128], strides = [1, 1]} : vector<16x256xf32> to vector<16x128xf32>
    %550 = math.tanh %549 : vector<16x128xf32>
    %551 = vector.extract_strided_slice %532 {offsets = [0, 128], sizes = [16, 128], strides = [1, 1]} : vector<16x256xf32> to vector<16x128xf32>
    %cst_213 = arith.constant 5.000000e-01 : f32
    %552 = vector.broadcast %cst_213 : f32 to vector<16x128xf32>
    %553 = arith.mulf %552, %551 : vector<16x128xf32>
    %554 = math.tanh %553 : vector<16x128xf32>
    %cst_214 = arith.constant 5.000000e-01 : f32
    %555 = vector.broadcast %cst_214 : f32 to vector<16x128xf32>
    %556 = arith.mulf %555, %554 : vector<16x128xf32>
    %cst_215 = arith.constant 5.000000e-01 : f32
    %557 = vector.broadcast %cst_215 : f32 to vector<16x128xf32>
    %558 = arith.addf %556, %557 : vector<16x128xf32>
    %559 = arith.mulf %548, %510 : vector<16x128xf32>
    %560 = arith.mulf %540, %550 : vector<16x128xf32>
    %561 = arith.addf %559, %560 : vector<16x128xf32>
    %562 = math.tanh %561 : vector<16x128xf32>
    %563 = arith.mulf %558, %562 : vector<16x128xf32>
    %564 = arith.index_cast %c10_i32 : i32 to index
    %565 = memref.load %arg5[%564] : memref<12xf32, #tpu.memory_space<smem>>
    %566 = vector.broadcast %565 : f32 to vector<16x128xf32>
    %567 = arith.mulf %566, %563 : vector<16x128xf32>
    %568 = arith.addf %517, %567 : vector<16x128xf32>
    %c11_i32 = arith.constant 11 : i32
    %569 = arith.truncf %563 : vector<16x128xf32> to vector<16x128xbf16>
    %570 = arith.index_cast %c11_i32 : i32 to index
    %c0_216 = arith.constant 0 : index
    %c0_217 = arith.constant 0 : index
    %571 = vector.load %arg8[%570, %c0_216, %c0_217] : memref<12x16x512xbf16, #tpu.memory_space<vmem>>, vector<1x16x256xbf16>
    %572 = vector.shape_cast %571 : vector<1x16x256xbf16> to vector<16x256xbf16>
    %573 = arith.extf %572 : vector<16x256xbf16> to vector<16x256xf32>
    %c0_218 = arith.constant 0 : index
    %c0_219 = arith.constant 0 : index
    %574 = vector.load %arg3[%c0_218, %c0_219] : memref<128x512xbf16, #tpu.memory_space<vmem>>, vector<128x256xbf16>
    %cst_220 = arith.constant dense<0.000000e+00> : vector<16x256xf32>
    %575 = tpu.matmul %569, %574, %cst_220 {dimension_numbers = #tpu.dot_dimension_numbers<[1], [0], [0], [1], [0, 0, 1, 1], [], []>} : vector<16x128xbf16>, vector<128x256xbf16>, vector<16x256xf32> -> vector<16x256xf32>
    %576 = arith.addf %573, %575 : vector<16x256xf32>
    %577 = arith.index_cast %c11_i32 : i32 to index
    %c0_221 = arith.constant 0 : index
    %c256_222 = arith.constant 256 : index
    %578 = vector.load %arg8[%577, %c0_221, %c256_222] : memref<12x16x512xbf16, #tpu.memory_space<vmem>>, vector<1x16x256xbf16>
    %579 = vector.shape_cast %578 : vector<1x16x256xbf16> to vector<16x256xbf16>
    %580 = arith.extf %579 : vector<16x256xbf16> to vector<16x256xf32>
    %c0_223 = arith.constant 0 : index
    %c256_224 = arith.constant 256 : index
    %581 = vector.load %arg3[%c0_223, %c256_224] : memref<128x512xbf16, #tpu.memory_space<vmem>>, vector<128x256xbf16>
    %cst_225 = arith.constant dense<0.000000e+00> : vector<16x256xf32>
    %582 = tpu.matmul %569, %581, %cst_225 {dimension_numbers = #tpu.dot_dimension_numbers<[1], [0], [0], [1], [0, 0, 1, 1], [], []>} : vector<16x128xbf16>, vector<128x256xbf16>, vector<16x256xf32> -> vector<16x256xf32>
    %583 = arith.addf %580, %582 : vector<16x256xf32>
    %584 = vector.extract_strided_slice %576 {offsets = [0, 0], sizes = [16, 128], strides = [1, 1]} : vector<16x256xf32> to vector<16x128xf32>
    %cst_226 = arith.constant 5.000000e-01 : f32
    %585 = vector.broadcast %cst_226 : f32 to vector<16x128xf32>
    %586 = arith.mulf %585, %584 : vector<16x128xf32>
    %587 = math.tanh %586 : vector<16x128xf32>
    %cst_227 = arith.constant 5.000000e-01 : f32
    %588 = vector.broadcast %cst_227 : f32 to vector<16x128xf32>
    %589 = arith.mulf %588, %587 : vector<16x128xf32>
    %cst_228 = arith.constant 5.000000e-01 : f32
    %590 = vector.broadcast %cst_228 : f32 to vector<16x128xf32>
    %591 = arith.addf %589, %590 : vector<16x128xf32>
    %592 = vector.extract_strided_slice %576 {offsets = [0, 128], sizes = [16, 128], strides = [1, 1]} : vector<16x256xf32> to vector<16x128xf32>
    %cst_229 = arith.constant 5.000000e-01 : f32
    %593 = vector.broadcast %cst_229 : f32 to vector<16x128xf32>
    %594 = arith.mulf %593, %592 : vector<16x128xf32>
    %595 = math.tanh %594 : vector<16x128xf32>
    %cst_230 = arith.constant 5.000000e-01 : f32
    %596 = vector.broadcast %cst_230 : f32 to vector<16x128xf32>
    %597 = arith.mulf %596, %595 : vector<16x128xf32>
    %cst_231 = arith.constant 5.000000e-01 : f32
    %598 = vector.broadcast %cst_231 : f32 to vector<16x128xf32>
    %599 = arith.addf %597, %598 : vector<16x128xf32>
    %600 = vector.extract_strided_slice %583 {offsets = [0, 0], sizes = [16, 128], strides = [1, 1]} : vector<16x256xf32> to vector<16x128xf32>
    %601 = math.tanh %600 : vector<16x128xf32>
    %602 = vector.extract_strided_slice %583 {offsets = [0, 128], sizes = [16, 128], strides = [1, 1]} : vector<16x256xf32> to vector<16x128xf32>
    %cst_232 = arith.constant 5.000000e-01 : f32
    %603 = vector.broadcast %cst_232 : f32 to vector<16x128xf32>
    %604 = arith.mulf %603, %602 : vector<16x128xf32>
    %605 = math.tanh %604 : vector<16x128xf32>
    %cst_233 = arith.constant 5.000000e-01 : f32
    %606 = vector.broadcast %cst_233 : f32 to vector<16x128xf32>
    %607 = arith.mulf %606, %605 : vector<16x128xf32>
    %cst_234 = arith.constant 5.000000e-01 : f32
    %608 = vector.broadcast %cst_234 : f32 to vector<16x128xf32>
    %609 = arith.addf %607, %608 : vector<16x128xf32>
    %610 = arith.mulf %599, %561 : vector<16x128xf32>
    %611 = arith.mulf %591, %601 : vector<16x128xf32>
    %612 = arith.addf %610, %611 : vector<16x128xf32>
    %613 = math.tanh %612 : vector<16x128xf32>
    %614 = arith.mulf %609, %613 : vector<16x128xf32>
    %615 = arith.index_cast %c11_i32 : i32 to index
    %616 = memref.load %arg5[%615] : memref<12xf32, #tpu.memory_space<smem>>
    %617 = vector.broadcast %616 : f32 to vector<16x128xf32>
    %618 = arith.mulf %617, %614 : vector<16x128xf32>
    %619 = arith.addf %568, %618 : vector<16x128xf32>
    %c12_i32 = arith.constant 12 : i32
    %c0_235 = arith.constant 0 : index
    %620 = memref.load %arg6[%c0_235] : memref<2xf32, #tpu.memory_space<smem>>
    %621 = vector.broadcast %620 : f32 to vector<16x128xf32>
    %622 = arith.addf %619, %621 : vector<16x128xf32>
    %c0_236 = arith.constant 0 : index
    %c0_237 = arith.constant 0 : index
    %623 = vector.load %arg4[%c0_236, %c0_237] : memref<1x128xf32, #tpu.memory_space<vmem>>, vector<1x128xf32>
    %624 = vector.broadcast %623 : vector<1x128xf32> to vector<16x128xf32>
    %625 = arith.mulf %622, %624 : vector<16x128xf32>
    %cst_238 = arith.constant dense<0.000000e+00> : vector<16xf32>
    %626 = vector.multi_reduction <add>, %625, %cst_238 [1] : vector<16x128xf32> to vector<16xf32>
    %c1 = arith.constant 1 : index
    %627 = memref.load %arg6[%c1] : memref<2xf32, #tpu.memory_space<smem>>
    %628 = vector.broadcast %627 : f32 to vector<16xf32>
    %629 = arith.addf %626, %628 : vector<16xf32>
    %630 = vector.shape_cast %629 : vector<16xf32> to vector<1x1x16xf32>
    %c0_239 = arith.constant 0 : index
    %c0_240 = arith.constant 0 : index
    %c0_241 = arith.constant 0 : index
    %631 = vector.load %arg7[%c0_239, %c0_240, %c0_241] : memref<1x1x16xf32, #tpu.memory_space<vmem>>, vector<1x1x16xf32>
    tpu.vector_store %arg7[%c0_239, %c0_240, %c0_241], %630 {strides = array<i32>} : memref<1x1x16xf32, #tpu.memory_space<vmem>>, vector<1x1x16xf32>,
    return
  }
  func.func @transform_0(%arg0: i32) -> (i32, i32, i32) {
    %c0_i32 = arith.constant 0 : i32
    %c0_i32_0 = arith.constant 0 : i32
    %c0_i32_1 = arith.constant 0 : i32
    return %c0_i32, %arg0, %c0_i32_0 : i32, i32, i32
  }
  func.func @transform_1(%arg0: i32) -> (i32, i32) {
    %c0_i32 = arith.constant 0 : i32
    %c0_i32_0 = arith.constant 0 : i32
    %c0_i32_1 = arith.constant 0 : i32
    return %c0_i32, %c0_i32_0 : i32, i32
  }
  func.func @transform_2(%arg0: i32) -> (i32, i32) {
    %c0_i32 = arith.constant 0 : i32
    %c0_i32_0 = arith.constant 0 : i32
    %c0_i32_1 = arith.constant 0 : i32
    return %c0_i32, %c0_i32_0 : i32, i32
  }
  func.func @transform_3(%arg0: i32) -> (i32, i32) {
    %c0_i32 = arith.constant 0 : i32
    %c0_i32_0 = arith.constant 0 : i32
    %c0_i32_1 = arith.constant 0 : i32
    return %c0_i32, %c0_i32_0 : i32, i32
  }
  func.func @transform_4(%arg0: i32) -> i32 {
    %c0_i32 = arith.constant 0 : i32
    %c0_i32_0 = arith.constant 0 : i32
    return %c0_i32 : i32
  }
  func.func @transform_5(%arg0: i32) -> i32 {
    %c0_i32 = arith.constant 0 : i32
    %c0_i32_0 = arith.constant 0 : i32
    return %c0_i32 : i32
  }
  func.func @transform_6(%arg0: i32) -> (i32, i32, i32) {
    %c0_i32 = arith.constant 0 : i32
    %c0_i32_0 = arith.constant 0 : i32
    %c0_i32_1 = arith.constant 0 : i32
    return %arg0, %c0_i32, %c0_i32_0 : i32, i32, i32
  }
}

</mosaic_0001>

<bundles_post_ra>
// kernel: neg.2
= control target key start
LH: loop header
LB: loop body
LE: loop exit
PB: predicated region body
PF: predicated region fallthrough
CT: control target
= control target key end

     0   :  { %s24_s0 = inlined_call_operand.vmem [shape: f32[2,16], index: 0, kind: input, shape index: {}]   ;;  %s25_s1 = inlined_call_operand.vmem [shape: f32[2,16], index: 1, kind: output, shape index: {}]  }
   0x1   :  { %v2_v0 = vld [vmem:[%s24_s0] sm:$0x3] }
   0x2   :  { %v5_v1 = vxor.u32 2147483648, %v2_v0 }
   0x4   :  { %7 = vst [vmem:[%s25_s1] sm:$0x3] %v5_v1 }

// kernel: pgnetwork_forward.1
= control target key start
LH: loop header
LB: loop body
LE: loop exit
PB: predicated region body
PF: predicated region fallthrough
CT: control target
= control target key end

     0   :  { %11 = vsyncpa [#allocation5], 0  ;;  %s5146_s0 = inlined_call_operand.vmem [shape: bf16[12,32,30], index: 0, kind: input, shape index: {}]   ;;  %s5147_s1 = inlined_call_operand.vmem [shape: bf16[30,512], index: 1, kind: input, shape index: {}]   ;;  %s5148_s2 = inlined_call_operand.vmem [shape: bf16[128,512], index: 2, kind: input, shape index: {}]   ;;  %s5149_s3 = inlined_call_operand.vmem [shape: f32[1,128], index: 3, kind: input, shape index: {}]   ;;  %s5150_s4 = inlined_call_operand.vmem [shape: f32[12], index: 4, kind: input, shape index: {}]   ;;  %s5151_s5 = inlined_call_operand.vmem [shape: f32[2], index: 5, kind: input, shape index: {}]   ;;  %s5152_s6 = inlined_call_operand.vmem [shape: f32[2,1,16], index: 6, kind: output, shape index: {}]  }
   0x1   :  { %12 = vsyncpa [#allocation7], 0  ;;  %s3724_s21 = smov 0   ;;  %s3726_s22 = smov 0  }
   0x2   :  { %s3728_s23 = smov 0  }
   0x3 LB: > { %s3740_s24 = sadd.s32 4294967295, %s3684_s23   ;;  %s3743_s25 = sadd.s32 1, %s3684_s23   ;;  %s3684_s23 = sphi %s3728_s23, %s5283_s23   ;;  %s3680_s22 = sphi %s3726_s22, %s5282_s22   ;;  %s3676_s21 = sphi %s3724_s21, %s5281_s21  }
   0x4   : > { %s22_s26 = ssub.s32 %s3684_s23, %s3743_s25  ;;  %s25_s27 = sadd.s32 1, %s3680_s22 }
   0x5   : > { %p23_p0 = scmp.eq.s32.totalorder %s22_s26, 0  ;;  %p32_p1 = scmp.ne.s32.totalorder %s3680_s22, %s3676_s21 }
   0x6   : > { %p33_p2 = scmp.eq.s32.totalorder %s3684_s23, 0  ;;  %p3097_p3 = scmp.ge.s32.totalorder %s3684_s23, 1 }
   0x7   : > { %s3753_s28 = scalar_select %p23_p0, %s3680_s22, %s25_s27  }
   0x8   : > { %p3755_p4 = por %p33_p2, %p32_p1  ;;  %p180_p5 = scmp.lt.s32.totalorder %s3684_s23, 3 }
   0x9   : > { %p5153_p6 = scmp.eq.s32.totalorder %s3740_s24, 0  ;;  %s202_s9 = sshll.u32 %s5150_s4, 4  ;;  %s203_s9 = int_to_ptr.vmem [resolvable:$true] %s202_s9 }
   0xa   : > { %s5195_s29 = scalar_select %p3755_p4, 1, 0 }
   0xb   : > { %p3761_p7 = pnand %p3097_p3, %p180_p5  ;;  %s213_s12 = sshll.u32 %s5151_s5, 4  ;;  %s214_s12 = int_to_ptr.vmem [resolvable:$true] %s213_s12 }
   0xc   : > { %s3624_s14 = scalar_lea.vmem %s203_s9, 16  ;;  %p3632_p0 = scmp.lt.s32.totalorder %s203_s9, %s203_s9 }
   0xd   : > { %s5196_s30 = scalar_select %p3761_p7, 1, 0 }
   0xe   : > { %p3210_p8 = pneg %p3761_p7  ;;  %p3625_p10 = scmp.ne.s32.totalorder %s203_s9, %s3624_s14 }
   0xf   : > { %p3633_p1 = scmp.lt.s32.totalorder %s3624_s14, %s3624_s14 }
  0x10   : > { %p3775_p9 = pnand %p5153_p6, %p3210_p8 }
  0x11   : > { %p3634_p2 = por %p3633_p1, %p3632_p0 }
  0x12   : > { %p3626_p11 = pneg %p3775_p9 }
  0x14   : > { %p3627_p12 = pnand %p3626_p11, %p3625_p10 }
  0x16   : > { %p3628_p13 = pneg %p3627_p12 }
  0x18   : > { %p3635_p3 = pnand %p3634_p2, %p3628_p13 }
  0x1a   : > { %3638 = shalt.err (!%p3635_p3)
}
  0x1b   : > { %s3686_s15 = smov [#allocation4]   ;;  %s3639_s16 = scalar_lea.vmem %s214_s12, 16 }
  0x1c   : > { %3213 = dma.vmem_to_smem (!%p3775_p9), %s203_s9, 16, %s3686_s15, [#allocation5]  }
  0x1d   : > { %p3640_p5 = scmp.ne.s32.totalorder %s214_s12, %s3639_s16  ;;  %p3647_p7 = scmp.lt.s32.totalorder %s214_s12, %s214_s12 }
  0x1e   : > { %p3648_p4 = scmp.lt.s32.totalorder %s3639_s16, %s3639_s16 }
  0x1f   : > { %p3642_p8 = pnand %p3640_p5, %p3626_p11 }
  0x20   : > { %p3649_p10 = por %p3648_p4, %p3647_p7 }
  0x21   : > { %p3643_p6 = pneg %p3642_p8 }
  0x23   : > { %p3650_p12 = pnand %p3649_p10, %p3643_p6 }
  0x25   : > { %3653 = shalt.err (!%p3650_p12)
}
  0x26   : > { %s3687_s17 = smov [#allocation6]   ;;  %p3100_p13 = scmp.ge.s32.totalorder %s3684_s23, 2 }
  0x27   : > { %3216 = dma.vmem_to_smem (!%p3775_p9), %s214_s12, 16, %s3687_s17, [#allocation7]  }
  0x28   : > { %220 = sbr.rel (%p3100_p13) target bundleno = 57 (0x39), region = 36  ;;  %p5198_p0 = scmp.ne.s32.totalorder (!%p3100_p13), %s5195_s29, 0 }
  0x2f   : > { %223 = sbr.rel (!%p5198_p0) target bundleno = 57 (0x39), region = 40  ;;  %s225_s18 = sand.u32 (%p5198_p0), 1, %s3680_s22  }
  0x30   : > { %s3199_s19 = sshll.u32 (%p5198_p0), %s3684_s23, 3  ;;  %s3200_s20 = smul.u32 (%p5198_p0), 96, %s225_s18 }
  0x31   : > { %s230_s7 = scalar_lea.vmem (%p5198_p0), %s5146_s0, %s3199_s19 }
  0x32   : > { %v246_v0 = vld [vmem:[%s230_s7] sm:$0xff] (%p5198_p0)   ;;  %v250_v1 = vld [vmem:[%s230_s7 + $0x10] sm:$0xff] (%p5198_p0)   ;;  %s227_s8 = scalar_lea.vmem (%p5198_p0), [#allocation3], %s3200_s20 }
  0x33   : > { %v254_v2 = vld [vmem:[%s230_s7 + $0x20] sm:$0xff] (%p5198_p0)   ;;  %v258_v3 = vld [vmem:[%s230_s7 + $0x30] sm:$0xff] (%p5198_p0)   ;;  %247 = vst [vmem:[%s227_s8] sm:$0xff] (%p5198_p0), %v246_v0   ;;  %251 = vst [vmem:[%s227_s8 + $0x8] sm:$0xff] (%p5198_p0), %v250_v1  }
  0x34   : > { %v262_v4 = vld [vmem:[%s230_s7 + $0x40] sm:$0xff] (%p5198_p0)   ;;  %v266_v5 = vld [vmem:[%s230_s7 + $0x50] sm:$0xff] (%p5198_p0)   ;;  %255 = vst [vmem:[%s227_s8 + $0x10] sm:$0xff] (%p5198_p0), %v254_v2   ;;  %259 = vst [vmem:[%s227_s8 + $0x18] sm:$0xff] (%p5198_p0), %v258_v3  }
  0x35   : > { %263 = vst [vmem:[%s227_s8 + $0x20] sm:$0xff] (%p5198_p0), %v262_v4   ;;  %267 = vst [vmem:[%s227_s8 + $0x28] sm:$0xff] (%p5198_p0), %v266_v5   ;;  %v270_v6 = vld [vmem:[%s230_s7 + $0x60] sm:$0xff] (%p5198_p0)   ;;  %v274_v7 = vld [vmem:[%s230_s7 + $0x70] sm:$0xff] (%p5198_p0)  }
  0x36   : > { %v278_v8 = vld [vmem:[%s230_s7 + $0x80] sm:$0xff]   ;;  %271 = vst [vmem:[%s227_s8 + $0x30] sm:$0xff] %v270_v6   ;;  %275 = vst [vmem:[%s227_s8 + $0x38] sm:$0xff] %v274_v7   ;;  %v282_v9 = vld [vmem:[%s230_s7 + $0x90] sm:$0xff]  }
  0x37   : > { %279 = vst [vmem:[%s227_s8 + $0x40] sm:$0xff] %v278_v8   ;;  %v286_v10 = vld [vmem:[%s230_s7 + $0xa0] sm:$0xff]   ;;  %v290_v11 = vld [vmem:[%s230_s7 + $0xb0] sm:$0xff]   ;;  %283 = vst [vmem:[%s227_s8 + $0x48] sm:$0xff] %v282_v9  }
  0x38   : > { %287 = vst [vmem:[%s227_s8 + $0x50] sm:$0xff] %v286_v10   ;;  %291 = vst [vmem:[%s227_s8 + $0x58] sm:$0xff] %v290_v11  }
  0x39 PF: > { %p5199_p4 = scmp.ne.s32.totalorder %s5196_s30, 0 }
  0x3b   : > { %367 = sbr.rel (%p5199_p4) target bundleno = 3386 (0xd3a), region = 81 }
  0x42   : > { %s370_s23 = sand.u32 1, %s3676_s21   ;;  %p5200_p6 = scmp.eq.s32.totalorder %s3740_s24, 0 }
  0x43   : > { %s3201_s29 = smul.u32 96, %s370_s23 }
  0x45   : > { %s3796_s9 = scalar_lea.vmem [#allocation3], %s3201_s29 }
  0x46   : > { %3667 = dma.done.wait (%p5200_p6), [#allocation5], 16   ;;  %p5201_p7 = pmov %p5200_p6 }
  0x47   : > { %p5202_p9 = pmov %p5200_p6 }
  0x48   : > { %3669 = vsyncadd (%p5201_p7), [#allocation5], 4294967280 }
  0x49   : > { %3671 = dma.done.wait (%p5202_p9), [#allocation7], 16   ;;  %p5203_p11 = pmov %p5200_p6 }
  0x4b   : > { %3673 = vsyncadd (%p5203_p11), [#allocation7], 4294967280 }
  0x4c   : > { %384 = sfence }
  0x4d   : > { %v3248_v12 = vld [vmem:[%s5147_s1 + $0x4] ss:$16 sps:$4 sm:$0xff]   ;;  %v3250_v13 = vld [vmem:[%s5147_s1 + $0xc] ss:$16 sps:$4 sm:$0xff]   ;;  %v5155_v14 = vmov 0   ;;  %vm576_vm0 = vcmask 1046528  }
  0x4e   : > { %621 = vmatprep.mubr.bf16.mxu0 %v5155_v14  ;;  %774 = vmatprep.mubr.bf16.mxu1 %v5155_v14  ;;  %v3252_v15 = vld [vmem:[%s5147_s1] ss:$16 sps:$4 sm:$0xff]   ;;  %v3253_v16 = vld [vmem:[%s5147_s1 + $0x8] ss:$16 sps:$4 sm:$0xff]   ;;  %v3836_v24 = vld [vmem:[%s5148_s2 + $0x4] ss:$16 sps:$4 sm:$0xff]  }
  0x4f   : > { %589 = vmatprep.subr.bf16.mxu0 %v3248_v12  ;;  %742 = vmatprep.subr.bf16.mxu1 %v3250_v13  ;;  %v3254_v17 = vld [vmem:[%s5147_s1 + $0x24] ss:$16 sps:$4 sm:$0x7f]   ;;  %v3256_v18 = vld [vmem:[%s5147_s1 + $0x2c] ss:$16 sps:$4 sm:$0x7f]  }
  0x50   : > { %590 = vmatpush1.bf16.msra.mxu0 %v3252_v15  ;;  %743 = vmatpush1.bf16.msra.mxu1 %v3253_v16  ;;  %v3258_v19 = vld [vmem:[%s5147_s1 + $0x20] ss:$16 sps:$4 sm:$0x7f]   ;;  %v3259_v20 = vld [vmem:[%s5147_s1 + $0x28] ss:$16 sps:$4 sm:$0x7f]  }
  0x51   : > { %3126 = vmatprep.subr.msk.bf16.mxu0 %vm576_vm0, %v3254_v17  ;;  %v3260_v21 = vld [vmem:[%s3796_s9] sm:$0xff]   ;;  %3139 = vmatprep.subr.msk.bf16.mxu1 %vm576_vm0, %v3256_v18  ;;  %v578_v22 = vsel %vm576_vm0, %v3258_v19, 0  ;;  %v584_v23 = vsel %vm576_vm0, %v3259_v20, 0  ;;  %vm539_vm1 = vcmask 244736   ;;  %v3846_v26 = vld [vmem:[%s5148_s2 + $0xc] ss:$16 sps:$4 sm:$0xff]  }
  0x52   : > { %v3841_v25 = vld [vmem:[%s5148_s2] ss:$16 sps:$4 sm:$0xff]   ;;  %v3853_v27 = vld [vmem:[%s5148_s2 + $0x8] ss:$16 sps:$4 sm:$0xff]   ;;  %v3860_v28 = vld [vmem:[%s5148_s2 + $0x24] ss:$16 sps:$4 sm:$0xff]  }
  0x53   : > { %v3867_v29 = vld [vmem:[%s5148_s2 + $0x20] ss:$16 sps:$4 sm:$0xff]   ;;  %v3874_v30 = vld [vmem:[%s5148_s2 + $0x2c] ss:$16 sps:$4 sm:$0xff]   ;;  %v3879_v31 = vld [vmem:[%s5148_s2 + $0x28] ss:$16 sps:$4 sm:$0xff]  }
  0x54   : > { %592 = vmatpush1.bf16.msra.mxu0 %v578_v22  ;;  %745 = vmatpush1.bf16.msra.mxu1 %v584_v23  ;;  %v3266_v32 = vld [vmem:[%s3796_s9 + $0x8] sm:$0xff]   ;;  %v3887_v33 = vld [vmem:[%s5148_s2 + $0x44] ss:$16 sps:$4 sm:$0xff]   ;;  %v3893_v34 = vld [vmem:[%s5148_s2 + $0x40] ss:$16 sps:$4 sm:$0xff]   ;;  %s3184_s12 = sld [smem:[#allocation4 + $0x1]] }
  0x55   : > { %1093 = vmatprep.subr.bf16.mxu0 %v3836_v24  ;;  %1242 = vmatprep.subr.bf16.mxu1 %v3846_v26  ;;  %v3900_v35 = vld [vmem:[%s5148_s2 + $0x4c] ss:$16 sps:$4 sm:$0xff]   ;;  %v3905_v36 = vld [vmem:[%s5148_s2 + $0x48] ss:$16 sps:$4 sm:$0xff]   ;;  %v3912_v37 = vld [vmem:[%s5148_s2 + $0x64] ss:$16 sps:$4 sm:$0xff]  }
  0x56   : > { %v3919_v38 = vld [vmem:[%s5148_s2 + $0x60] ss:$16 sps:$4 sm:$0xff]   ;;  %v3926_v39 = vld [vmem:[%s5148_s2 + $0x6c] ss:$16 sps:$4 sm:$0xff]   ;;  %v3933_v40 = vld [vmem:[%s5148_s2 + $0x68] ss:$16 sps:$4 sm:$0xff]  }
  0x57   : > { %3127 = vmatmul.mubr.msk.bf16.vlgmr.msra.gmra.mrb[0].mxu0 %vm539_vm1, %v3260_v21  ;;  %3140 = vmatmul.mubr.msk.bf16.vlgmr.msra.gmra.mrb[0].mxu1 %vm539_vm1, %v3260_v21  ;;  %v3271_v41 = vld [vmem:[%s3796_s9 + $0x10] sm:$0xff]   ;;  %v3951_v44 = vld [vmem:[%s5148_s2 + $0x8c] ss:$16 sps:$4 sm:$0xff]   ;;  %v3958_v45 = vld [vmem:[%s5148_s2 + $0x88] ss:$16 sps:$4 sm:$0xff]   ;;  %s3185_s17 = sld [smem:[#allocation4 + $0x2]] }
  0x58   : > { %1094 = vmatpush1.bf16.msra.mxu0 %v3841_v25  ;;  %631 = vmatprep.mubr.bf16.mxu0 %v5155_v14  ;;  %v3940_v42 = vld [vmem:[%s5148_s2 + $0x84] ss:$16 sps:$4 sm:$0xff]   ;;  %v3945_v43 = vld [vmem:[%s5148_s2 + $0x80] ss:$16 sps:$4 sm:$0xff]   ;;  %v3981_v48 = vld [vmem:[%s5148_s2 + $0xac] ss:$16 sps:$4 sm:$0xff]  }
  0x59   : > { %784 = vmatprep.mubr.bf16.mxu1 %v5155_v14  ;;  %1243 = vmatpush1.bf16.msra.mxu1 %v3853_v27  ;;  %v3965_v46 = vld [vmem:[%s5148_s2 + $0xa4] ss:$16 sps:$4 sm:$0xff]   ;;  %v3974_v47 = vld [vmem:[%s5148_s2 + $0xa0] ss:$16 sps:$4 sm:$0xff]   ;;  %v3986_v49 = vld [vmem:[%s5148_s2 + $0xa8] ss:$16 sps:$4 sm:$0xff]  }
  0x5a   : > { %1095 = vmatprep.subr.bf16.mxu0 %v3860_v28  ;;  %1244 = vmatprep.subr.bf16.mxu1 %v3874_v30  ;;  %v3275_v50 = vld [vmem:[%s3796_s9 + $0x18] sm:$0xff]   ;;  %v3993_v51 = vld [vmem:[%s5148_s2 + $0xc4] ss:$16 sps:$4 sm:$0xff]   ;;  %v3998_v52 = vld [vmem:[%s5148_s2 + $0xc0] ss:$16 sps:$4 sm:$0xff]   ;;  %s3186_s18 = sld [smem:[#allocation4 + $0x3]] }
  0x5b   : > { %v4004_v53 = vld [vmem:[%s5148_s2 + $0xcc] ss:$16 sps:$4 sm:$0xff]   ;;  %v4013_v54 = vld [vmem:[%s5148_s2 + $0xc8] ss:$16 sps:$4 sm:$0xff]   ;;  %v4020_v55 = vld [vmem:[%s5148_s2 + $0xe4] ss:$16 sps:$4 sm:$0xff]  }
  0x5c   : > { %1096 = vmatpush1.bf16.msra.mxu0 %v3867_v29  ;;  %v4027_v56 = vld [vmem:[%s5148_s2 + $0xe0] ss:$16 sps:$4 sm:$0xff]   ;;  %v4034_v57 = vld [vmem:[%s5148_s2 + $0xec] ss:$16 sps:$4 sm:$0xff]   ;;  %v4039_v58 = vld [vmem:[%s5148_s2 + $0xe8] ss:$16 sps:$4 sm:$0xff]  }
  0x5d   : > { %1245 = vmatpush1.bf16.msra.mxu1 %v3879_v31  ;;  %1097 = vmatprep.subr.bf16.mxu0 %v3887_v33  ;;  %v3281_v59 = vld [vmem:[%s3796_s9 + $0x20] sm:$0xff]   ;;  %v3286_v60 = vld [vmem:[%s3796_s9 + $0x28] sm:$0xff]   ;;  %v3290_v61 = vld [vmem:[%s3796_s9 + $0x30] sm:$0xff]   ;;  %s3187_s19 = sld [smem:[#allocation4 + $0x4]]  ;;  %s3188_s20 = sld [smem:[#allocation4 + $0x5]]  ;;  %vm3015_vm2 = vcmask 130112  }
  0x5e   : > { %1246 = vmatprep.subr.bf16.mxu1 %v3900_v35  ;;  %v3296_v62 = vld [vmem:[%s3796_s9 + $0x38] sm:$0xff]   ;;  %v3301_v63 = vld [vmem:[%s3796_s9 + $0x40] sm:$0xff]   ;;  %v3305_v0 = vld [vmem:[%s3796_s9 + $0x48] sm:$0xff]   ;;  %s3189_s26 = sld [smem:[#allocation4 + $0x6]]  ;;  %s3190_s29 = sld [smem:[#allocation4 + $0x7]]  ;;  %vm3018_vm3 = vcmask 122880  }
  0x5f   : > { %3128 = vmatmul.mubr.msk.bf16.gmra.mrb[4].mxu0 %vm539_vm1, %v3266_v32  ;;  %3141 = vmatmul.mubr.msk.bf16.gmra.mrb[4].mxu1 %vm539_vm1, %v3266_v32  ;;  %v3311_v1 = vld [vmem:[%s3796_s9 + $0x50] sm:$0xff]   ;;  %v3316_v2 = vld [vmem:[%s3796_s9 + $0x58] sm:$0xff]   ;;  %s1325_s9 = sld [smem:[#allocation4]]  ;;  %s3192_s10 = sld [smem:[#allocation4 + $0x9]] }
  0x60   : > { %641 = vmatprep.mubr.bf16.mxu0 %v5155_v14  ;;  %794 = vmatprep.mubr.bf16.mxu1 %v5155_v14  ;;  %s3191_s30 = sld [smem:[#allocation4 + $0x8]]  ;;  %s3193_s21 = sld [smem:[#allocation4 + $0xa]] }
  0x61   : > { %1098 = vmatpush1.bf16.msra.mxu0 %v3893_v34  ;;  %1247 = vmatpush1.bf16.msra.mxu1 %v3905_v36  ;;  %s3194_s11 = sld [smem:[#allocation4 + $0xb]]  ;;  %s3196_s14 = sld [smem:[#allocation6 + $0x1]] }
  0x62   : > { %1099 = vmatprep.subr.bf16.mxu0 %v3912_v37  ;;  %1248 = vmatprep.subr.bf16.mxu1 %v3926_v39  ;;  %p407_p1 = scmp.lt.s32.totalorder %s3740_s24, 1 }
  0x64   : > { %s5285_s24 = smov (!%p407_p1, %s3740_s24), 1 }
  0x65   : > { %1100 = vmatpush1.bf16.msra.mxu0 %v3919_v38  ;;  %1249 = vmatpush1.bf16.msra.mxu1 %v3933_v40 }
  0x66   : > { %1101 = vmatprep.subr.bf16.mxu0 %v3940_v42  ;;  %1250 = vmatprep.subr.bf16.mxu1 %v3951_v44 }
  0x67   : > { %3129 = vmatmul.mubr.msk.bf16.gmra.mrb[8].mxu0 %vm539_vm1, %v3271_v41  ;;  %3142 = vmatmul.mubr.msk.bf16.gmra.mrb[8].mxu1 %vm539_vm1, %v3271_v41 }
  0x68   : > { %651 = vmatprep.mubr.bf16.mxu0 %v5155_v14  ;;  %804 = vmatprep.mubr.bf16.mxu1 %v5155_v14 }
  0x69   : > { %1102 = vmatpush1.bf16.msra.mxu0 %v3945_v43  ;;  %1251 = vmatpush1.bf16.msra.mxu1 %v3958_v45 }
  0x6a   : > { %1103 = vmatprep.subr.bf16.mxu0 %v3965_v46  ;;  %1252 = vmatprep.subr.bf16.mxu1 %v3981_v48 }
  0x6d   : > { %1104 = vmatpush1.bf16.msra.mxu0 %v3974_v47  ;;  %1253 = vmatpush1.bf16.msra.mxu1 %v3986_v49 }
  0x6e   : > { %1105 = vmatprep.subr.bf16.mxu0 %v3993_v51  ;;  %1254 = vmatprep.subr.bf16.mxu1 %v4004_v53 }
  0x6f   : > { %3130 = vmatmul.mubr.msk.bf16.gmra.mrb[12].mxu0 %vm539_vm1, %v3275_v50  ;;  %3143 = vmatmul.mubr.msk.bf16.gmra.mrb[12].mxu1 %vm539_vm1, %v3275_v50 }
  0x70   : > { %661 = vmatprep.mubr.bf16.mxu0 %v5155_v14  ;;  %814 = vmatprep.mubr.bf16.mxu1 %v5155_v14 }
  0x71   : > { %1106 = vmatpush1.bf16.msra.mxu0 %v3998_v52  ;;  %1255 = vmatpush1.bf16.msra.mxu1 %v4013_v54 }
  0x72   : > { %1107 = vmatprep.subr.bf16.mxu0 %v4020_v55  ;;  %1256 = vmatprep.subr.bf16.mxu1 %v4034_v57 }
  0x75   : > { %1108 = vmatpush1.bf16.msra.mxu0 %v4027_v56  ;;  %1257 = vmatpush1.bf16.msra.mxu1 %v4039_v58 }
  0x76   : > { %1339 = vmatprep.subr.bf16.mxu0 %v3836_v24  ;;  %1392 = vmatprep.subr.bf16.mxu1 %v3846_v26 }
  0x77   : > { %3131 = vmatmul.mubr.msk.bf16.gmra.mrb[16].mxu0 %vm539_vm1, %v3281_v59  ;;  %3144 = vmatmul.mubr.msk.bf16.gmra.mrb[16].mxu1 %vm539_vm1, %v3281_v59 }
  0x78   : > { %671 = vmatprep.mubr.bf16.mxu0 %v5155_v14  ;;  %824 = vmatprep.mubr.bf16.mxu1 %v5155_v14 }
  0x7f   : > { %3132 = vmatmul.mubr.msk.bf16.gmra.mrb[20].mxu0 %vm539_vm1, %v3286_v60  ;;  %3145 = vmatmul.mubr.msk.bf16.gmra.mrb[20].mxu1 %vm539_vm1, %v3286_v60 }
  0x80   : > { %681 = vmatprep.mubr.bf16.mxu0 %v5155_v14  ;;  %834 = vmatprep.mubr.bf16.mxu1 %v5155_v14 }
  0x87   : > { %3133 = vmatmul.mubr.msk.bf16.gmra.mrb[24].mxu0 %vm539_vm1, %v3290_v61  ;;  %3146 = vmatmul.mubr.msk.bf16.gmra.mrb[24].mxu1 %vm539_vm1, %v3290_v61 }
  0x88   : > { %691 = vmatprep.mubr.bf16.mxu0 %v5155_v14  ;;  %844 = vmatprep.mubr.bf16.mxu1 %v5155_v14 }
  0x8f   : > { %3134 = vmatmul.mubr.msk.bf16.gmra.mrb[28].mxu0 %vm539_vm1, %v3296_v62  ;;  %3147 = vmatmul.mubr.msk.bf16.gmra.mrb[28].mxu1 %vm539_vm1, %v3296_v62 }
  0x90   : > { %701 = vmatprep.mubr.bf16.mxu0 %v5155_v14  ;;  %854 = vmatprep.mubr.bf16.mxu1 %v5155_v14 }
  0x97   : > { %3135 = vmatmul.mubr.msk.bf16.gmra.mrb[32].mxu0 %vm539_vm1, %v3301_v63  ;;  %3148 = vmatmul.mubr.msk.bf16.gmra.mrb[32].mxu1 %vm539_vm1, %v3301_v63 }
  0x98   : > { %711 = vmatprep.mubr.bf16.mxu0 %v5155_v14  ;;  %864 = vmatprep.mubr.bf16.mxu1 %v5155_v14 }
  0x9f   : > { %3136 = vmatmul.mubr.msk.bf16.gmra.mrb[36].mxu0 %vm539_vm1, %v3305_v0  ;;  %3149 = vmatmul.mubr.msk.bf16.gmra.mrb[36].mxu1 %vm539_vm1, %v3305_v0 }
  0xa0   : > { %721 = vmatprep.mubr.bf16.mxu0 %v5155_v14  ;;  %874 = vmatprep.mubr.bf16.mxu1 %v5155_v14 }
  0xa7   : > { %3137 = vmatmul.mubr.msk.bf16.gmra.mrb[40].mxu0 %vm539_vm1, %v3311_v1  ;;  %3150 = vmatmul.mubr.msk.bf16.gmra.mrb[40].mxu1 %vm539_vm1, %v3311_v1 }
  0xa8   : > { %731 = vmatprep.mubr.bf16.mxu0 %v5155_v14  ;;  %884 = vmatprep.mubr.bf16.mxu1 %v5155_v14 }
  0xaf   : > { %3138 = vmatmul.mubr.msk.bf16.gmra.mrb[44].mxu0 %vm539_vm1, %v3316_v2  ;;  %3151 = vmatmul.mubr.msk.bf16.gmra.mrb[44].mxu1 %vm539_vm1, %v3316_v2 }
  0xb0   : > { %1125 = vmatprep.mubr.bf16.mxu0 %v5155_v14  ;;  %1274 = vmatprep.mubr.bf16.mxu1 %v5155_v14 }
  0xb7   : > { %1126 = vmatmul.mubr.bf16.vlgmr.msra.gmra.mrb[48].mxu0 %v5155_v14  ;;  %1275 = vmatmul.mubr.bf16.vlgmr.msra.gmra.mrb[48].mxu1 %v5155_v14 }
  0xb8   : > { %1340 = vmatpush1.bf16.msra.mxu0 %v3841_v25  ;;  %1393 = vmatpush1.bf16.msra.mxu1 %v3853_v27 }
  0xb9   : > { %1341 = vmatprep.subr.bf16.mxu0 %v3860_v28  ;;  %1394 = vmatprep.subr.bf16.mxu1 %v3874_v30 }
  0xba   : > { %1371 = vmatprep.mubr.bf16.mxu0 %v5155_v14  ;;  %1424 = vmatprep.mubr.bf16.mxu1 %v5155_v14 }
  0xbc   : > { %1342 = vmatpush1.bf16.msra.mxu0 %v3867_v29  ;;  %1395 = vmatpush1.bf16.msra.mxu1 %v3879_v31 }
  0xbd   : > { %1343 = vmatprep.subr.bf16.mxu0 %v3887_v33  ;;  %1396 = vmatprep.subr.bf16.mxu1 %v3900_v35 }
  0xc0   : > { %1344 = vmatpush1.bf16.msra.mxu0 %v3893_v34  ;;  %1397 = vmatpush1.bf16.msra.mxu1 %v3905_v36 }
  0xc1   : > { %1345 = vmatprep.subr.bf16.mxu0 %v3912_v37  ;;  %1398 = vmatprep.subr.bf16.mxu1 %v3926_v39 }
  0xc4   : > { %1346 = vmatpush1.bf16.msra.mxu0 %v3919_v38  ;;  %1399 = vmatpush1.bf16.msra.mxu1 %v3933_v40 }
  0xc5   : > { %1347 = vmatprep.subr.bf16.mxu0 %v3940_v42  ;;  %1400 = vmatprep.subr.bf16.mxu1 %v3951_v44 }
  0xc8   : > { %1348 = vmatpush1.bf16.msra.mxu0 %v3945_v43  ;;  %1401 = vmatpush1.bf16.msra.mxu1 %v3958_v45 }
  0xc9   : > { %1349 = vmatprep.subr.bf16.mxu0 %v3965_v46  ;;  %1402 = vmatprep.subr.bf16.mxu1 %v3981_v48 }
  0xcc   : > { %1350 = vmatpush1.bf16.msra.mxu0 %v3974_v47  ;;  %1403 = vmatpush1.bf16.msra.mxu1 %v3986_v49 }
  0xcd   : > { %1351 = vmatprep.subr.bf16.mxu0 %v3993_v51  ;;  %1404 = vmatprep.subr.bf16.mxu1 %v4004_v53 }
  0xd0   : > { %1352 = vmatpush1.bf16.msra.mxu0 %v3998_v52  ;;  %1405 = vmatpush1.bf16.msra.mxu1 %v4013_v54 }
  0xd1   : > { %1353 = vmatprep.subr.bf16.mxu0 %v4020_v55  ;;  %1406 = vmatprep.subr.bf16.mxu1 %v4034_v57 }
  0xd4   : > { %1354 = vmatpush1.bf16.msra.mxu0 %v4027_v56  ;;  %1407 = vmatpush1.bf16.msra.mxu1 %v4039_v58 }
  0xd5   : > { %1489 = vmatprep.subr.bf16.mxu0 %v3836_v24  ;;  %1542 = vmatprep.subr.bf16.mxu1 %v3846_v26 }
 0x12a   : > { %v623_v3 = vpop.f32.mrb[0].mxu0  ;;  %v776_v4 = vpop.f32.mrb[0].mxu1 }
 0x12b   : > { %v625_v5 = vpop.f32.mrb[1].mxu0  ;;  %v778_v6 = vpop.f32.mrb[1].mxu1 }
 0x12c   : > { %v627_v7 = vpop.f32.mrb[2].mxu0  ;;  %v780_v8 = vpop.f32.mrb[2].mxu1 }
 0x12d   : > { %v4122_v9 = vpack.c.bf16 %v627_v7, %v623_v3  ;;  %v629_v10 = vpop.f32.mrb[3].mxu0  ;;  %v4124_v11 = vpack.c.bf16 %v780_v8, %v776_v4  ;;  %v782_v12 = vpop.f32.mrb[3].mxu1 }
 0x12e   : > { %v4126_v13 = vpack.c.bf16 %v629_v10, %v625_v5  ;;  %v4128_v15 = vpack.c.bf16 %v782_v12, %v778_v6 }
 0x132   : > { %v633_v16 = vpop.f32.mrb[4].mxu0  ;;  %v786_v17 = vpop.f32.mrb[4].mxu1 }
 0x133   : > { %v635_v18 = vpop.f32.mrb[5].mxu0  ;;  %v788_v19 = vpop.f32.mrb[5].mxu1 }
 0x134   : > { %v637_v20 = vpop.f32.mrb[6].mxu0  ;;  %v790_v21 = vpop.f32.mrb[6].mxu1 }
 0x135   : > { %v4130_v22 = vpack.c.bf16 %v637_v20, %v633_v16  ;;  %v639_v23 = vpop.f32.mrb[7].mxu0  ;;  %v4132_v32 = vpack.c.bf16 %v790_v21, %v786_v17  ;;  %v792_v41 = vpop.f32.mrb[7].mxu1 }
 0x136   : > { %v4134_v50 = vpack.c.bf16 %v639_v23, %v635_v18  ;;  %v4136_v59 = vpack.c.bf16 %v792_v41, %v788_v19 }
 0x13a   : > { %v643_v60 = vpop.f32.mrb[8].mxu0  ;;  %v796_v61 = vpop.f32.mrb[8].mxu1 }
 0x13b   : > { %v645_v62 = vpop.f32.mrb[9].mxu0  ;;  %v798_v63 = vpop.f32.mrb[9].mxu1 }
 0x13c   : > { %v647_v0 = vpop.f32.mrb[10].mxu0  ;;  %v800_v1 = vpop.f32.mrb[10].mxu1 }
 0x13d   : > { %v4138_v2 = vpack.c.bf16 %v647_v0, %v643_v60  ;;  %v649_v3 = vpop.f32.mrb[11].mxu0  ;;  %v4140_v4 = vpack.c.bf16 %v800_v1, %v796_v61  ;;  %v802_v5 = vpop.f32.mrb[11].mxu1 }
 0x13e   : > { %v4142_v6 = vpack.c.bf16 %v649_v3, %v645_v62  ;;  %v4144_v7 = vpack.c.bf16 %v802_v5, %v798_v63 }
 0x140   : > { %5204 = vst [vmem:[#allocation10_spill] sm:$0xff] %v4142_v6  ;;  %5205 = vst [vmem:[#allocation11_spill] sm:$0xff] %v4144_v7 }
 0x142   : > { %v653_v8 = vpop.f32.mrb[12].mxu0  ;;  %v806_v10 = vpop.f32.mrb[12].mxu1 }
 0x143   : > { %v655_v12 = vpop.f32.mrb[13].mxu0  ;;  %v808_v16 = vpop.f32.mrb[13].mxu1 }
 0x144   : > { %v657_v17 = vpop.f32.mrb[14].mxu0  ;;  %v810_v18 = vpop.f32.mrb[14].mxu1 }
 0x145   : > { %v4146_v19 = vpack.c.bf16 %v657_v17, %v653_v8  ;;  %v659_v20 = vpop.f32.mrb[15].mxu0  ;;  %v4148_v21 = vpack.c.bf16 %v810_v18, %v806_v10  ;;  %v812_v23 = vpop.f32.mrb[15].mxu1 }
 0x146   : > { %v4150_v41 = vpack.c.bf16 %v659_v20, %v655_v12  ;;  %v4152_v60 = vpack.c.bf16 %v812_v23, %v808_v16 }
 0x147   : > { %5206 = vst [vmem:[#allocation12_spill] sm:$0xff] %v4146_v19  ;;  %5207 = vst [vmem:[#allocation13_spill] sm:$0xff] %v4148_v21 }
 0x148   : > { %5208 = vst [vmem:[#allocation14_spill] sm:$0xff] %v4150_v41  ;;  %5209 = vst [vmem:[#allocation15_spill] sm:$0xff] %v4152_v60 }
 0x14a   : > { %v663_v61 = vpop.f32.mrb[16].mxu0  ;;  %v816_v62 = vpop.f32.mrb[16].mxu1 }
 0x14b   : > { %v665_v63 = vpop.f32.mrb[17].mxu0  ;;  %v818_v0 = vpop.f32.mrb[17].mxu1 }
 0x14c   : > { %v667_v1 = vpop.f32.mrb[18].mxu0  ;;  %v820_v3 = vpop.f32.mrb[18].mxu1 }
 0x14d   : > { %v4154_v5 = vpack.c.bf16 %v667_v1, %v663_v61  ;;  %v669_v14 = vpop.f32.mrb[19].mxu0  ;;  %v4156_v7 = vpack.c.bf16 %v820_v3, %v816_v62  ;;  %v822_v8 = vpop.f32.mrb[19].mxu1 }
 0x14e   : > { %v4158_v17 = vpack.c.bf16 %v669_v14, %v665_v63  ;;  %v4160_v10 = vpack.c.bf16 %v822_v8, %v818_v0 }
 0x14f   : > { %5210 = vst [vmem:[#allocation16_spill] sm:$0xff] %v4154_v5  ;;  %5211 = vst [vmem:[#allocation17_spill] sm:$0xff] %v4156_v7 }
 0x150   : > { %5212 = vst [vmem:[#allocation18_spill] sm:$0xff] %v4158_v17  ;;  %5213 = vst [vmem:[#allocation19_spill] sm:$0xff] %v4160_v10 }
 0x152   : > { %v673_v12 = vpop.f32.mrb[20].mxu0  ;;  %v826_v18 = vpop.f32.mrb[20].mxu1 }
 0x153   : > { %v675_v16 = vpop.f32.mrb[21].mxu0  ;;  %v828_v20 = vpop.f32.mrb[21].mxu1 }
 0x154   : > { %v677_v23 = vpop.f32.mrb[22].mxu0  ;;  %v830_v60 = vpop.f32.mrb[22].mxu1 }
 0x155   : > { %v4162_v41 = vpack.c.bf16 %v677_v23, %v673_v12  ;;  %v679_v21 = vpop.f32.mrb[23].mxu0  ;;  %v4164_v19 = vpack.c.bf16 %v830_v60, %v826_v18  ;;  %v832_v61 = vpop.f32.mrb[23].mxu1 }
 0x156   : > { %v4166_v1 = vpack.c.bf16 %v679_v21, %v675_v16  ;;  %v4168_v62 = vpack.c.bf16 %v832_v61, %v828_v20 }
 0x157   : > { %5214 = vst [vmem:[#allocation20_spill] sm:$0xff] %v4162_v41  ;;  %5215 = vst [vmem:[#allocation21_spill] sm:$0xff] %v4164_v19 }
 0x158   : > { %5216 = vst [vmem:[#allocation22_spill] sm:$0xff] %v4166_v1  ;;  %5217 = vst [vmem:[#allocation23_spill] sm:$0xff] %v4168_v62 }
 0x15a   : > { %v683_v14 = vpop.f32.mrb[24].mxu0  ;;  %v836_v63 = vpop.f32.mrb[24].mxu1 }
 0x15b   : > { %v685_v0 = vpop.f32.mrb[25].mxu0  ;;  %v838_v3 = vpop.f32.mrb[25].mxu1 }
 0x15c   : > { %v687_v8 = vpop.f32.mrb[26].mxu0  ;;  %v840_v10 = vpop.f32.mrb[26].mxu1 }
 0x15d   : > { %v4170_v17 = vpack.c.bf16 %v687_v8, %v683_v14  ;;  %v689_v7 = vpop.f32.mrb[27].mxu0  ;;  %v4172_v5 = vpack.c.bf16 %v840_v10, %v836_v63  ;;  %v842_v12 = vpop.f32.mrb[27].mxu1 }
 0x15e   : > { %v4174_v23 = vpack.c.bf16 %v689_v7, %v685_v0  ;;  %v4176_v60 = vpack.c.bf16 %v842_v12, %v838_v3 }
 0x15f   : > { %5218 = vst [vmem:[#allocation24_spill] sm:$0xff] %v4170_v17  ;;  %5219 = vst [vmem:[#allocation25_spill] sm:$0xff] %v4172_v5 }
 0x160   : > { %5220 = vst [vmem:[#allocation26_spill] sm:$0xff] %v4174_v23  ;;  %5221 = vst [vmem:[#allocation27_spill] sm:$0xff] %v4176_v60 }
 0x162   : > { %v693_v21 = vpop.f32.mrb[28].mxu0  ;;  %v846_v18 = vpop.f32.mrb[28].mxu1 }
 0x163   : > { %v695_v16 = vpop.f32.mrb[29].mxu0  ;;  %v848_v20 = vpop.f32.mrb[29].mxu1 }
 0x164   : > { %v697_v61 = vpop.f32.mrb[30].mxu0  ;;  %v850_v62 = vpop.f32.mrb[30].mxu1 }
 0x165   : > { %v4178_v1 = vpack.c.bf16 %v697_v61, %v693_v21  ;;  %v699_v19 = vpop.f32.mrb[31].mxu0  ;;  %v4180_v41 = vpack.c.bf16 %v850_v62, %v846_v18  ;;  %v852_v14 = vpop.f32.mrb[31].mxu1 }
 0x166   : > { %v4182_v8 = vpack.c.bf16 %v699_v19, %v695_v16  ;;  %v4184_v10 = vpack.c.bf16 %v852_v14, %v848_v20 }
 0x167   : > { %5222 = vst [vmem:[#allocation28_spill] sm:$0xff] %v4178_v1  ;;  %5223 = vst [vmem:[#allocation29_spill] sm:$0xff] %v4180_v41 }
 0x168   : > { %5224 = vst [vmem:[#allocation30_spill] sm:$0xff] %v4182_v8  ;;  %5225 = vst [vmem:[#allocation31_spill] sm:$0xff] %v4184_v10 }
 0x16a   : > { %v703_v7 = vpop.f32.mrb[32].mxu0  ;;  %v856_v63 = vpop.f32.mrb[32].mxu1 }
 0x16b   : > { %v705_v0 = vpop.f32.mrb[33].mxu0  ;;  %v858_v3 = vpop.f32.mrb[33].mxu1 }
 0x16c   : > { %v707_v12 = vpop.f32.mrb[34].mxu0  ;;  %v860_v60 = vpop.f32.mrb[34].mxu1 }
 0x16d   : > { %v4186_v23 = vpack.c.bf16 %v707_v12, %v703_v7  ;;  %v709_v5 = vpop.f32.mrb[35].mxu0  ;;  %v4188_v17 = vpack.c.bf16 %v860_v60, %v856_v63  ;;  %v862_v21 = vpop.f32.mrb[35].mxu1 }
 0x16e   : > { %v4190_v61 = vpack.c.bf16 %v709_v5, %v705_v0  ;;  %v4192_v62 = vpack.c.bf16 %v862_v21, %v858_v3 }
 0x16f   : > { %5226 = vst [vmem:[#allocation32_spill] sm:$0xff] %v4186_v23  ;;  %5227 = vst [vmem:[#allocation33_spill] sm:$0xff] %v4188_v17 }
 0x170   : > { %5228 = vst [vmem:[#allocation34_spill] sm:$0xff] %v4190_v61  ;;  %5229 = vst [vmem:[#allocation35_spill] sm:$0xff] %v4192_v62 }
 0x172   : > { %v713_v19 = vpop.f32.mrb[36].mxu0  ;;  %v866_v18 = vpop.f32.mrb[36].mxu1 }
 0x173   : > { %v715_v16 = vpop.f32.mrb[37].mxu0  ;;  %v868_v20 = vpop.f32.mrb[37].mxu1 }
 0x174   : > { %v717_v14 = vpop.f32.mrb[38].mxu0  ;;  %v870_v10 = vpop.f32.mrb[38].mxu1 }
 0x175   : > { %v4194_v8 = vpack.c.bf16 %v717_v14, %v713_v19  ;;  %v719_v41 = vpop.f32.mrb[39].mxu0  ;;  %v4196_v1 = vpack.c.bf16 %v870_v10, %v866_v18  ;;  %v872_v7 = vpop.f32.mrb[39].mxu1 }
 0x176   : > { %v4198_v12 = vpack.c.bf16 %v719_v41, %v715_v16  ;;  %v4200_v60 = vpack.c.bf16 %v872_v7, %v868_v20 }
 0x177   : > { %5230 = vst [vmem:[#allocation36_spill] sm:$0xff] %v4194_v8  ;;  %5231 = vst [vmem:[#allocation37_spill] sm:$0xff] %v4196_v1 }
 0x178   : > { %5232 = vst [vmem:[#allocation38_spill] sm:$0xff] %v4198_v12  ;;  %5233 = vst [vmem:[#allocation39_spill] sm:$0xff] %v4200_v60 }
 0x17a   : > { %v723_v5 = vpop.f32.mrb[40].mxu0  ;;  %v876_v63 = vpop.f32.mrb[40].mxu1 }
 0x17b   : > { %v725_v0 = vpop.f32.mrb[41].mxu0  ;;  %v878_v3 = vpop.f32.mrb[41].mxu1 }
 0x17c   : > { %v727_v21 = vpop.f32.mrb[42].mxu0  ;;  %v880_v62 = vpop.f32.mrb[42].mxu1 }
 0x17d   : > { %v4202_v61 = vpack.c.bf16 %v727_v21, %v723_v5  ;;  %v729_v17 = vpop.f32.mrb[43].mxu0  ;;  %v4204_v23 = vpack.c.bf16 %v880_v62, %v876_v63  ;;  %v882_v19 = vpop.f32.mrb[43].mxu1  ;;  %v1142_v63 = vunpack.c.l.bf16 %v4124_v11 }
 0x17e   : > { %v4206_v14 = vpack.c.bf16 %v729_v17, %v725_v0  ;;  %v4208_v10 = vpack.c.bf16 %v882_v19, %v878_v3  ;;  %v993_v17 = vunpack.c.l.bf16 %v4122_v9  ;;  %v994_v19 = vunpack.c.l.bf16 %v4126_v13 }
 0x17f   : > { %5234 = vst [vmem:[#allocation40_spill] sm:$0xff] %v4202_v61  ;;  %5235 = vst [vmem:[#allocation41_spill] sm:$0xff] %v4204_v23 }
 0x180   : > { %5236 = vst [vmem:[#allocation42_spill] sm:$0xff] %v4206_v14  ;;  %5237 = vst [vmem:[#allocation43_spill] sm:$0xff] %v4208_v10  ;;  %v1143_v10 = vunpack.c.l.bf16 %v4128_v15 }
 0x182   : > { %v733_v41 = vpop.f32.mrb[44].mxu0  ;;  %v886_v18 = vpop.f32.mrb[44].mxu1 }
 0x183   : > { %v735_v16 = vpop.f32.mrb[45].mxu0  ;;  %v888_v20 = vpop.f32.mrb[45].mxu1 }
 0x184   : > { %v737_v7 = vpop.f32.mrb[46].mxu0  ;;  %v890_v60 = vpop.f32.mrb[46].mxu1 }
 0x185   : > { %v4210_v12 = vpack.c.bf16 %v737_v7, %v733_v41  ;;  %v739_v1 = vpop.f32.mrb[47].mxu0  ;;  %v4212_v8 = vpack.c.bf16 %v890_v60, %v886_v18  ;;  %v892_v5 = vpop.f32.mrb[47].mxu1  ;;  %v995_v18 = vunpack.c.h.bf16 %v4122_v9 }
 0x186   : > { %v4214_v21 = vpack.c.bf16 %v739_v1, %v735_v16  ;;  %v4216_v62 = vpack.c.bf16 %v892_v5, %v888_v20  ;;  %v1144_v1 = vunpack.c.h.bf16 %v4124_v11 }
 0x187   : > { %5238 = vst [vmem:[#allocation44_spill] sm:$0xff] %v4210_v12  ;;  %5239 = vst [vmem:[#allocation45_spill] sm:$0xff] %v4212_v8  ;;  %v1145_v8 = vunpack.c.h.bf16 %v4128_v15 }
 0x188   : > { %5240 = vst [vmem:[#allocation46_spill] sm:$0xff] %v4214_v21  ;;  %5241 = vst [vmem:[#allocation47_spill] sm:$0xff] %v4216_v62  ;;  %v996_v21 = vunpack.c.h.bf16 %v4126_v13 }
 0x18a   : > { %v1127_v0 = vpop.f32.mrb[48].mxu0  ;;  %v1276_v3 = vpop.f32.mrb[48].mxu1 }
 0x18b   : > { %v1136_v41 = vadd.f32 %v1127_v0, %v993_v17  ;;  %v1285_v7 = vadd.f32 %v1276_v3, %v1142_v63  ;;  %v1129_v12 = vpop.f32.mrb[49].mxu0  ;;  %v1278_v60 = vpop.f32.mrb[49].mxu1 }
 0x18c   : > { %v1137_v16 = vadd.f32 %v1129_v12, %v994_v19  ;;  %v1286_v20 = vadd.f32 %v1278_v60, %v1143_v10  ;;  %v1131_v5 = vpop.f32.mrb[50].mxu0  ;;  %v1280_v62 = vpop.f32.mrb[50].mxu1 }
 0x18d   : > { %v1289_v14 = vmul.f32 0.5, %v1136_v41  ;;  %v1138_v23 = vadd.f32 %v1131_v5, %v995_v18  ;;  %v1287_v61 = vadd.f32 %v1280_v62, %v1144_v1  ;;  %v1133_v6 = vpop.f32.mrb[51].mxu0  ;;  %v1282_v17 = vpop.f32.mrb[51].mxu1 }
 0x18e   : > { %v1297_v63 = vmul.f32 0.5, %v1137_v16  ;;  %v1139_v0 = vadd.f32 %v1133_v6, %v996_v21  ;;  %v1288_v3 = vadd.f32 %v1282_v17, %v1145_v8  ;;  %v1307_v15 = vmul.f32 0.5, %v1286_v20 }
 0x18f   : > { %3320 = vtanh.f32 %v1289_v14  ;;  %v1290_v9 = vmul.f32 0.5, %v1138_v23 }
 0x190   : > { %3322 = vtanh.f32 %v1297_v63  ;;  %v1298_v11 = vmul.f32 0.5, %v1139_v0  ;;  %v1308_v41 = vmul.f32 0.5, %v1288_v3 }
 0x191   : > { %3324 = vtanh.f32 %v1290_v9 }
 0x192   : > { %3326 = vtanh.f32 %v1285_v7 }
 0x193   : > { %3328 = vtanh.f32 %v1298_v11 }
 0x194   : > { %3330 = vtanh.f32 %v1287_v61 }
 0x195   : > { %3332 = vtanh.f32 %v1307_v15 }
 0x196   : > { %3334 = vtanh.f32 %v1308_v41 }
 0x199   : > { %v3321_v12 = vpop.eup %3320 }
 0x19a   : > { %v3323_v13 = vpop.eup %3322  ;;  %v1293_v10 = vmul.f32 0.5, %v3321_v12 }
 0x19b   : > { %v1301_v19 = vmul.f32 0.5, %v3323_v13  ;;  %v3325_v62 = vpop.eup %3324 }
 0x19c   : > { %v1295_v60 = vadd.f32 0.5, %v1293_v10  ;;  %v3327_v18 = vpop.eup %3326  ;;  %v1294_v6 = vmul.f32 0.5, %v3325_v62 }
 0x19d   : > { %v1303_v1 = vadd.f32 0.5, %v1301_v19  ;;  %v3329_v8 = vpop.eup %3328 }
 0x19e   : > { %v1317_v14 = vmul.f32 %v3327_v18, %v1295_v60  ;;  %v1296_v21 = vadd.f32 0.5, %v1294_v6  ;;  %v1302_v16 = vmul.f32 0.5, %v3329_v8  ;;  %v3331_v7 = vpop.eup %3330  ;;  %v5242_v60 = vmov 0  }
 0x19f   : > { %v1315_v23 = vmul.f32 0.0, %v1303_v1  ;;  %v3333_v0 = vpop.eup %3332  ;;  %v1337_v18 = vunpack.c.h.bf16 %v4130_v22 }
 0x1a0   : > { %v1304_v5 = vadd.f32 0.5, %v1302_v16  ;;  %v1318_v17 = vmul.f32 %v3331_v7, %v1296_v21  ;;  %v3335_v3 = vpop.eup %3334  ;;  %v1311_v9 = vmul.f32 0.5, %v3333_v0 }
 0x1a1   : > { %v4226_v61 = vadd.f32 %v1317_v14, %v1315_v23  ;;  %v1312_v11 = vmul.f32 0.5, %v3335_v3  ;;  %v1338_v14 = vunpack.c.h.bf16 %v4134_v50  ;;  %v1391_v23 = vunpack.c.h.bf16 %v4136_v59 }
 0x1a2   : > { %v1316_v20 = vmul.f32 0.0, %v1304_v5  ;;  %v1313_v13 = vadd.f32 0.5, %v1311_v9 }
 0x1a3   : > { %3336 = vtanh.f32 %v4226_v61  ;;  %v1314_v10 = vadd.f32 0.5, %v1312_v11 }
 0x1a4   : > { %v4229_v63 = vadd.f32 %v1318_v17, %v1316_v20 }
 0x1a6   : > { %3338 = vtanh.f32 %v4229_v63 }
 0x1ad   : > { %v3337_v12 = vpop.eup %3336 }
 0x1ae   : > { %v4232_v19 = vmul.f32 %v3337_v12, %v1313_v13 }
 0x1b0   : > { %v3339_v15 = vpop.eup %3338 }
 0x1b1   : > { %v4234_v41 = vmul.f32 %v3339_v15, %v1314_v10 }
 0x1b3   : > { %v1331_v62 = vpack.c.bf16 %v4234_v41, %v4232_v19 }
 0x1b5   : > { %1372 = vmatmul.mubr.bf16.vlgmr.msra.gmra.mrb[52].mxu0 %v1331_v62  ;;  %1425 = vmatmul.mubr.bf16.vlgmr.msra.gmra.mrb[52].mxu1 %v1331_v62 }
 0x1b6   : > { %1490 = vmatpush1.bf16.msra.mxu0 %v3841_v25  ;;  %1543 = vmatpush1.bf16.msra.mxu1 %v3853_v27  ;;  %v1335_v25 = vunpack.c.l.bf16 %v4130_v22  ;;  %v1388_v27 = vunpack.c.l.bf16 %v4132_v32 }
 0x1b7   : > { %1491 = vmatprep.subr.bf16.mxu0 %v3860_v28  ;;  %1544 = vmatprep.subr.bf16.mxu1 %v3874_v30  ;;  %v1336_v30 = vunpack.c.l.bf16 %v4134_v50 }
 0x1b8   : > { %1521 = vmatprep.mubr.bf16.mxu0 %v5242_v60  ;;  %1574 = vmatprep.mubr.bf16.mxu1 %v5242_v60 }
 0x1ba   : > { %1492 = vmatpush1.bf16.msra.mxu0 %v3867_v29  ;;  %1545 = vmatpush1.bf16.msra.mxu1 %v3879_v31  ;;  %v1389_v31 = vunpack.c.l.bf16 %v4136_v59 }
 0x1bb   : > { %1493 = vmatprep.subr.bf16.mxu0 %v3887_v33  ;;  %1546 = vmatprep.subr.bf16.mxu1 %v3900_v35 }
 0x1be   : > { %1494 = vmatpush1.bf16.msra.mxu0 %v3893_v34  ;;  %1547 = vmatpush1.bf16.msra.mxu1 %v3905_v36 }
 0x1bf   : > { %1495 = vmatprep.subr.bf16.mxu0 %v3912_v37  ;;  %1548 = vmatprep.subr.bf16.mxu1 %v3926_v39 }
 0x1c2   : > { %1496 = vmatpush1.bf16.msra.mxu0 %v3919_v38  ;;  %1549 = vmatpush1.bf16.msra.mxu1 %v3933_v40 }
 0x1c3   : > { %1497 = vmatprep.subr.bf16.mxu0 %v3940_v42  ;;  %1550 = vmatprep.subr.bf16.mxu1 %v3951_v44 }
 0x1c6   : > { %1498 = vmatpush1.bf16.msra.mxu0 %v3945_v43  ;;  %1551 = vmatpush1.bf16.msra.mxu1 %v3958_v45 }
 0x1c7   : > { %1499 = vmatprep.subr.bf16.mxu0 %v3965_v46  ;;  %1552 = vmatprep.subr.bf16.mxu1 %v3981_v48 }
 0x1ca   : > { %1500 = vmatpush1.bf16.msra.mxu0 %v3974_v47  ;;  %1553 = vmatpush1.bf16.msra.mxu1 %v3986_v49 }
 0x1cb   : > { %1501 = vmatprep.subr.bf16.mxu0 %v3993_v51  ;;  %1554 = vmatprep.subr.bf16.mxu1 %v4004_v53 }
 0x1ce   : > { %1502 = vmatpush1.bf16.msra.mxu0 %v3998_v52  ;;  %1555 = vmatpush1.bf16.msra.mxu1 %v4013_v54 }
 0x1cf   : > { %1503 = vmatprep.subr.bf16.mxu0 %v4020_v55  ;;  %1556 = vmatprep.subr.bf16.mxu1 %v4034_v57 }
 0x1d2   : > { %1504 = vmatpush1.bf16.msra.mxu0 %v4027_v56  ;;  %1557 = vmatpush1.bf16.msra.mxu1 %v4039_v58 }
 0x1d3   : > { %1639 = vmatprep.subr.bf16.mxu0 %v3836_v24  ;;  %1692 = vmatprep.subr.bf16.mxu1 %v3846_v26  ;;  %v1390_v24 = vunpack.c.h.bf16 %v4132_v32 }
 0x288   : > { %v1373_v28 = vpop.f32.mrb[52].mxu0  ;;  %v1426_v29 = vpop.f32.mrb[52].mxu1 }
 0x289   : > { %v1382_v33 = vadd.f32 %v1373_v28, %v1335_v25  ;;  %v1435_v34 = vadd.f32 %v1426_v29, %v1388_v27  ;;  %v1375_v35 = vpop.f32.mrb[53].mxu0  ;;  %v1428_v36 = vpop.f32.mrb[53].mxu1 }
 0x28a   : > { %v1383_v1 = vadd.f32 %v1375_v35, %v1336_v30  ;;  %v1436_v26 = vadd.f32 %v1428_v36, %v1389_v31  ;;  %v1377_v6 = vpop.f32.mrb[54].mxu0  ;;  %v1430_v8 = vpop.f32.mrb[54].mxu1 }
 0x28b   : > { %v1439_v21 = vmul.f32 0.5, %v1382_v33  ;;  %v1384_v16 = vadd.f32 %v1377_v6, %v1337_v18  ;;  %v1437_v7 = vadd.f32 %v1430_v8, %v1390_v24  ;;  %v1379_v5 = vpop.f32.mrb[55].mxu0  ;;  %v1432_v17 = vpop.f32.mrb[55].mxu1 }
 0x28c   : > { %v1447_v20 = vmul.f32 0.5, %v1383_v1  ;;  %v1385_v0 = vadd.f32 %v1379_v5, %v1338_v14  ;;  %v1438_v3 = vadd.f32 %v1432_v17, %v1391_v23  ;;  %v1457_v9 = vmul.f32 0.5, %v1436_v26 }
 0x28d   : > { %3340 = vtanh.f32 %v1439_v21  ;;  %v1440_v22 = vmul.f32 0.5, %v1384_v16  ;;  %v1326_v21 = vstv %s1325_s9  ;;  %v1476_v16 = vstv %s3184_s12  ;;  %s2981_s9 = sld [smem:[#allocation6]] }
 0x28e   : > { %3342 = vtanh.f32 %v1447_v20  ;;  %v1448_v32 = vmul.f32 0.5, %v1385_v0  ;;  %v1458_v13 = vmul.f32 0.5, %v1438_v3  ;;  %v1327_v5 = vmul.f32 %v1326_v21, %v4232_v19  ;;  %v4303_v19 = vld [vmem:[%s5148_s2 + $0x8] ss:$16 sps:$4 sm:$0xff]  }
 0x28f   : > { %3344 = vtanh.f32 %v1440_v22  ;;  %v1328_v22 = vmul.f32 %v1326_v21, %v4234_v41  ;;  %v4309_v41 = vld [vmem:[%s5148_s2 + $0x24] ss:$16 sps:$4 sm:$0xff]  }
 0x290   : > { %3346 = vtanh.f32 %v1435_v34 }
 0x291   : > { %3348 = vtanh.f32 %v1448_v32 }
 0x292   : > { %3350 = vtanh.f32 %v1437_v7 }
 0x293   : > { %3352 = vtanh.f32 %v1457_v9 }
 0x294   : > { %3354 = vtanh.f32 %v1458_v13  ;;  %v4329_v13 = vld [vmem:[%s5148_s2 + $0x28] ss:$16 sps:$4 sm:$0xff]  }
 0x297   : > { %v3341_v50 = vpop.eup %3340 }
 0x298   : > { %v3343_v11 = vpop.eup %3342  ;;  %v1443_v59 = vmul.f32 0.5, %v3341_v50 }
 0x299   : > { %v1451_v12 = vmul.f32 0.5, %v3343_v11  ;;  %v3345_v10 = vpop.eup %3344  ;;  %v4297_v11 = vld [vmem:[%s5148_s2] ss:$16 sps:$4 sm:$0xff]  }
 0x29a   : > { %v1445_v15 = vadd.f32 0.5, %v1443_v59  ;;  %v3347_v62 = vpop.eup %3346  ;;  %v1444_v27 = vmul.f32 0.5, %v3345_v10  ;;  %v4315_v59 = vld [vmem:[%s5148_s2 + $0x2c] ss:$16 sps:$4 sm:$0xff]   ;;  %v4335_v10 = vld [vmem:[%s5148_s2 + $0x44] ss:$16 sps:$4 sm:$0xff]  }
 0x29b   : > { %v1453_v25 = vadd.f32 0.5, %v1451_v12  ;;  %v3349_v28 = vpop.eup %3348  ;;  %v4323_v12 = vld [vmem:[%s5148_s2 + $0x20] ss:$16 sps:$4 sm:$0xff]  }
 0x29c   : > { %v1467_v29 = vmul.f32 %v3347_v62, %v1445_v15  ;;  %v1446_v31 = vadd.f32 0.5, %v1444_v27  ;;  %v1452_v33 = vmul.f32 0.5, %v3349_v28  ;;  %v3351_v34 = vpop.eup %3350  ;;  %v4341_v15 = vld [vmem:[%s5148_s2 + $0x4c] ss:$16 sps:$4 sm:$0xff]   ;;  %v4347_v62 = vld [vmem:[%s5148_s2 + $0x40] ss:$16 sps:$4 sm:$0xff]  }
 0x29d   : > { %v1465_v30 = vmul.f32 %v1453_v25, %v4226_v61  ;;  %v3353_v1 = vpop.eup %3352  ;;  %v4353_v25 = vld [vmem:[%s5148_s2 + $0x48] ss:$16 sps:$4 sm:$0xff]  }
 0x29e   : > { %v1454_v36 = vadd.f32 0.5, %v1452_v33  ;;  %v1468_v18 = vmul.f32 %v3351_v34, %v1446_v31  ;;  %v1461_v61 = vmul.f32 0.5, %v3353_v1  ;;  %v3355_v6 = vpop.eup %3354 }
 0x29f   : > { %v4281_v35 = vadd.f32 %v1467_v29, %v1465_v30  ;;  %v1462_v14 = vmul.f32 0.5, %v3355_v6 }
 0x2a0   : > { %v1466_v24 = vmul.f32 %v1454_v36, %v4229_v63  ;;  %v1463_v8 = vadd.f32 0.5, %v1461_v61 }
 0x2a1   : > { %3356 = vtanh.f32 %v4281_v35  ;;  %v1464_v20 = vadd.f32 0.5, %v1462_v14 }
 0x2a2   : > { %v4285_v26 = vadd.f32 %v1468_v18, %v1466_v24 }
 0x2a4   : > { %3358 = vtanh.f32 %v4285_v26 }
 0x2ab   : > { %v3357_v23 = vpop.eup %3356 }
 0x2ac   : > { %v1473_v7 = vmul.f32 %v3357_v23, %v1463_v8 }
 0x2ae   : > { %v1477_v17 = vmul.f32 %v1476_v16, %v1473_v7  ;;  %v3359_v63 = vpop.eup %3358 }
 0x2af   : > { %v1474_v3 = vmul.f32 %v3359_v63, %v1464_v20 }
 0x2b0   : > { %v4289_v0 = vadd.f32 %v1477_v17, %v1327_v5 }
 0x2b1   : > { %v1478_v32 = vmul.f32 %v1476_v16, %v1474_v3  ;;  %v1481_v9 = vpack.c.bf16 %v1474_v3, %v1473_v7 }
 0x2b3   : > { %v4292_v50 = vadd.f32 %v1478_v32, %v1328_v22  ;;  %1522 = vmatmul.mubr.bf16.vlgmr.msra.gmra.mrb[56].mxu0 %v1481_v9  ;;  %1575 = vmatmul.mubr.bf16.vlgmr.msra.gmra.mrb[56].mxu1 %v1481_v9 }
 0x2b4   : > { %1640 = vmatpush1.bf16.msra.mxu0 %v4297_v11  ;;  %1693 = vmatpush1.bf16.msra.mxu1 %v4303_v19 }
 0x2b5   : > { %1641 = vmatprep.subr.bf16.mxu0 %v4309_v41  ;;  %1694 = vmatprep.subr.bf16.mxu1 %v4315_v59 }
 0x2b6   : > { %1671 = vmatprep.mubr.bf16.mxu0 %v5242_v60  ;;  %1724 = vmatprep.mubr.bf16.mxu1 %v5242_v60 }
 0x2b8   : > { %1642 = vmatpush1.bf16.msra.mxu0 %v4323_v12  ;;  %1695 = vmatpush1.bf16.msra.mxu1 %v4329_v13 }
 0x2b9   : > { %1643 = vmatprep.subr.bf16.mxu0 %v4335_v10  ;;  %1696 = vmatprep.subr.bf16.mxu1 %v4341_v15 }
 0x2bc   : > { %1644 = vmatpush1.bf16.msra.mxu0 %v4347_v62  ;;  %1697 = vmatpush1.bf16.msra.mxu1 %v4353_v25 }
 0x2bd   : > { %1645 = vmatprep.subr.bf16.mxu0 %v3912_v37  ;;  %1698 = vmatprep.subr.bf16.mxu1 %v3926_v39  ;;  %v4379_v37 = vld [vmem:[%s5148_s2 + $0x4] ss:$16 sps:$4 sm:$0xff]   ;;  %v1485_v39 = vunpack.c.l.bf16 %v4138_v2 }
 0x2c0   : > { %1646 = vmatpush1.bf16.msra.mxu0 %v3919_v38  ;;  %1699 = vmatpush1.bf16.msra.mxu1 %v3933_v40  ;;  %v4385_v38 = vld [vmem:[%s5148_s2 + $0xc] ss:$16 sps:$4 sm:$0xff]   ;;  %v1538_v40 = vunpack.c.l.bf16 %v4140_v4 }
 0x2c1   : > { %1647 = vmatprep.subr.bf16.mxu0 %v3940_v42  ;;  %1700 = vmatprep.subr.bf16.mxu1 %v3951_v44  ;;  %v5243_v44 = vld [vmem:[#allocation10_spill] sm:$0xff] }
 0x2c2   : > { %v1488_v27 = vunpack.c.h.bf16 %v5243_v44 }
 0x2c4   : > { %1648 = vmatpush1.bf16.msra.mxu0 %v3945_v43  ;;  %1701 = vmatpush1.bf16.msra.mxu1 %v3958_v45  ;;  %v1486_v45 = vunpack.c.l.bf16 %v5243_v44 }
 0x2c5   : > { %1649 = vmatprep.subr.bf16.mxu0 %v3965_v46  ;;  %1702 = vmatprep.subr.bf16.mxu1 %v3981_v48  ;;  %v5244_v46 = vld [vmem:[#allocation11_spill] sm:$0xff] }
 0x2c6   : > { %v1541_v28 = vunpack.c.h.bf16 %v5244_v46 }
 0x2c8   : > { %1650 = vmatpush1.bf16.msra.mxu0 %v3974_v47  ;;  %1703 = vmatpush1.bf16.msra.mxu1 %v3986_v49  ;;  %v1539_v47 = vunpack.c.l.bf16 %v5244_v46 }
 0x2c9   : > { %1651 = vmatprep.subr.bf16.mxu0 %v3993_v51  ;;  %1704 = vmatprep.subr.bf16.mxu1 %v4004_v53  ;;  %v1487_v53 = vunpack.c.h.bf16 %v4138_v2 }
 0x2cc   : > { %1652 = vmatpush1.bf16.msra.mxu0 %v3998_v52  ;;  %1705 = vmatpush1.bf16.msra.mxu1 %v4013_v54  ;;  %v1540_v54 = vunpack.c.h.bf16 %v4140_v4 }
 0x2cd   : > { %1653 = vmatprep.subr.bf16.mxu0 %v4020_v55  ;;  %1706 = vmatprep.subr.bf16.mxu1 %v4034_v57 }
 0x2d0   : > { %1654 = vmatpush1.bf16.msra.mxu0 %v4027_v56  ;;  %1707 = vmatpush1.bf16.msra.mxu1 %v4039_v58 }
 0x2d1   : > { %1789 = vmatprep.subr.bf16.mxu0 %v4379_v37  ;;  %1842 = vmatprep.subr.bf16.mxu1 %v4385_v38 }
 0x386   : > { %v1523_v42 = vpop.f32.mrb[56].mxu0  ;;  %v1576_v43 = vpop.f32.mrb[56].mxu1 }
 0x387   : > { %v1532_v48 = vadd.f32 %v1523_v42, %v1485_v39  ;;  %v1585_v49 = vadd.f32 %v1576_v43, %v1538_v40  ;;  %v1525_v51 = vpop.f32.mrb[57].mxu0  ;;  %v1578_v52 = vpop.f32.mrb[57].mxu1 }
 0x388   : > { %v1533_v55 = vadd.f32 %v1525_v51, %v1486_v45  ;;  %v1586_v56 = vadd.f32 %v1578_v52, %v1539_v47  ;;  %v1527_v57 = vpop.f32.mrb[58].mxu0  ;;  %v1580_v58 = vpop.f32.mrb[58].mxu1  ;;  %v1626_v51 = vstv %s3185_s17  ;;  %s409_s17 = scalar_lea.vmem %s5152_s6, %s5285_s24 }
 0x389   : > { %v1589_v29 = vmul.f32 0.5, %v1532_v48  ;;  %v1534_v30 = vadd.f32 %v1527_v57, %v1487_v53  ;;  %v1587_v31 = vadd.f32 %v1580_v58, %v1540_v54  ;;  %v1529_v33 = vpop.f32.mrb[59].mxu0  ;;  %v1582_v34 = vpop.f32.mrb[59].mxu1 }
 0x38a   : > { %v1597_v36 = vmul.f32 0.5, %v1533_v55  ;;  %v1535_v18 = vadd.f32 %v1529_v33, %v1488_v27  ;;  %v1588_v24 = vadd.f32 %v1582_v34, %v1541_v28  ;;  %v1607_v1 = vmul.f32 0.5, %v1586_v56  ;;  %v4437_v28 = vld [vmem:[%s5148_s2 + $0x60] ss:$16 sps:$4 sm:$0xff]   ;;  %v4467_v34 = vld [vmem:[%s5148_s2 + $0x88] ss:$16 sps:$4 sm:$0xff]  }
 0x38b   : > { %3360 = vtanh.f32 %v1589_v29  ;;  %v1590_v2 = vmul.f32 0.5, %v1534_v30  ;;  %v4443_v29 = vld [vmem:[%s5148_s2 + $0x68] ss:$16 sps:$4 sm:$0xff]   ;;  %v4449_v30 = vld [vmem:[%s5148_s2 + $0x84] ss:$16 sps:$4 sm:$0xff]  }
 0x38c   : > { %3362 = vtanh.f32 %v1597_v36  ;;  %v1598_v4 = vmul.f32 0.5, %v1535_v18  ;;  %v1608_v23 = vmul.f32 0.5, %v1588_v24  ;;  %v4461_v33 = vld [vmem:[%s5148_s2 + $0x80] ss:$16 sps:$4 sm:$0xff]   ;;  %v4473_v36 = vld [vmem:[%s5148_s2 + $0xa4] ss:$16 sps:$4 sm:$0xff]  }
 0x38d   : > { %3364 = vtanh.f32 %v1590_v2  ;;  %v4479_v18 = vld [vmem:[%s5148_s2 + $0xac] ss:$16 sps:$4 sm:$0xff]   ;;  %v4485_v24 = vld [vmem:[%s5148_s2 + $0xa0] ss:$16 sps:$4 sm:$0xff]   ;;  %v4491_v2 = vld [vmem:[%s5148_s2 + $0xa8] ss:$16 sps:$4 sm:$0xff]  }
 0x38e   : > { %3366 = vtanh.f32 %v1585_v49 }
 0x38f   : > { %3368 = vtanh.f32 %v1598_v4  ;;  %v4497_v4 = vld [vmem:[%s5148_s2 + $0xc4] ss:$16 sps:$4 sm:$0xff]  }
 0x390   : > { %3370 = vtanh.f32 %v1587_v31  ;;  %v4455_v31 = vld [vmem:[%s5148_s2 + $0x8c] ss:$16 sps:$4 sm:$0xff]  }
 0x391   : > { %3372 = vtanh.f32 %v1607_v1  ;;  %v4503_v1 = vld [vmem:[%s5148_s2 + $0xcc] ss:$16 sps:$4 sm:$0xff]  }
 0x392   : > { %3374 = vtanh.f32 %v1608_v23  ;;  %v4533_v23 = vld [vmem:[%s5148_s2 + $0xe0] ss:$16 sps:$4 sm:$0xff]  }
 0x395   : > { %v3361_v61 = vpop.eup %3360 }
 0x396   : > { %v3363_v6 = vpop.eup %3362  ;;  %v1593_v8 = vmul.f32 0.5, %v3361_v61  ;;  %v4509_v61 = vld [vmem:[%s5148_s2 + $0xc0] ss:$16 sps:$4 sm:$0xff]  }
 0x397   : > { %v1601_v14 = vmul.f32 0.5, %v3363_v6  ;;  %v3365_v21 = vpop.eup %3364  ;;  %v4515_v6 = vld [vmem:[%s5148_s2 + $0xc8] ss:$16 sps:$4 sm:$0xff]  }
 0x398   : > { %v1595_v16 = vadd.f32 0.5, %v1593_v8  ;;  %v3367_v7 = vpop.eup %3366  ;;  %v1594_v17 = vmul.f32 0.5, %v3365_v21  ;;  %v4521_v8 = vld [vmem:[%s5148_s2 + $0xe4] ss:$16 sps:$4 sm:$0xff]   ;;  %v4539_v21 = vld [vmem:[%s5148_s2 + $0xe8] ss:$16 sps:$4 sm:$0xff]  }
 0x399   : > { %v1603_v5 = vadd.f32 0.5, %v1601_v14  ;;  %v3369_v20 = vpop.eup %3368  ;;  %v4527_v14 = vld [vmem:[%s5148_s2 + $0xec] ss:$16 sps:$4 sm:$0xff]  }
 0x39a   : > { %v1617_v63 = vmul.f32 %v3367_v7, %v1595_v16  ;;  %v1596_v22 = vadd.f32 0.5, %v1594_v17  ;;  %v1602_v32 = vmul.f32 0.5, %v3369_v20  ;;  %v3371_v9 = vpop.eup %3370  ;;  %v5245_v16 = vld [vmem:[#allocation12_spill] sm:$0xff] }
 0x39b   : > { %v1615_v3 = vmul.f32 %v1603_v5, %v4281_v35  ;;  %v3373_v44 = vpop.eup %3372  ;;  %v1635_v7 = vunpack.c.l.bf16 %v5245_v16  ;;  %v5246_v5 = vld [vmem:[#allocation13_spill] sm:$0xff] }
 0x39c   : > { %v1604_v40 = vadd.f32 0.5, %v1602_v32  ;;  %v1618_v42 = vmul.f32 %v3371_v9, %v1596_v22  ;;  %v1611_v46 = vmul.f32 0.5, %v3373_v44  ;;  %v3375_v35 = vpop.eup %3374  ;;  %v1688_v17 = vunpack.c.l.bf16 %v5246_v5  ;;  %v5248_v32 = vld [vmem:[#allocation15_spill] sm:$0xff] }
 0x39d   : > { %v4397_v39 = vadd.f32 %v1617_v63, %v1615_v3  ;;  %v1612_v48 = vmul.f32 0.5, %v3375_v35  ;;  %v5247_v3 = vld [vmem:[#allocation14_spill] sm:$0xff]  ;;  %v1689_v9 = vunpack.c.l.bf16 %v5248_v32  ;;  %v1690_v35 = vunpack.c.h.bf16 %v5246_v5 }
 0x39e   : > { %v1616_v43 = vmul.f32 %v1604_v40, %v4285_v26  ;;  %v1613_v47 = vadd.f32 0.5, %v1611_v46  ;;  %v1636_v22 = vunpack.c.l.bf16 %v5247_v3  ;;  %v1637_v46 = vunpack.c.h.bf16 %v5245_v16 }
 0x39f   : > { %3376 = vtanh.f32 %v4397_v39  ;;  %v1614_v54 = vadd.f32 0.5, %v1612_v48 }
 0x3a0   : > { %v4401_v45 = vadd.f32 %v1618_v42, %v1616_v43 }
 0x3a2   : > { %3378 = vtanh.f32 %v4401_v45 }
 0x3a9   : > { %v3377_v49 = vpop.eup %3376 }
 0x3aa   : > { %v1623_v52 = vmul.f32 %v3377_v49, %v1613_v47 }
 0x3ac   : > { %v1627_v53 = vmul.f32 %v1626_v51, %v1623_v52  ;;  %v3379_v55 = vpop.eup %3378 }
 0x3ad   : > { %v1624_v26 = vmul.f32 %v3379_v55, %v1614_v54 }
 0x3ae   : > { %v4405_v56 = vadd.f32 %v1627_v53, %v4289_v0  ;;  %v4425_v0 = vld [vmem:[%s5148_s2 + $0x64] ss:$16 sps:$4 sm:$0xff]   ;;  %v1691_v53 = vunpack.c.h.bf16 %v5248_v32 }
 0x3af   : > { %v1628_v57 = vmul.f32 %v1626_v51, %v1624_v26  ;;  %v1631_v58 = vpack.c.bf16 %v1624_v26, %v1623_v52  ;;  %v1638_v52 = vunpack.c.h.bf16 %v5247_v3 }
 0x3b1   : > { %v4408_v27 = vadd.f32 %v1628_v57, %v4292_v50  ;;  %1672 = vmatmul.mubr.bf16.vlgmr.msra.gmra.mrb[60].mxu0 %v1631_v58  ;;  %1725 = vmatmul.mubr.bf16.vlgmr.msra.gmra.mrb[60].mxu1 %v1631_v58  ;;  %v4431_v50 = vld [vmem:[%s5148_s2 + $0x6c] ss:$16 sps:$4 sm:$0xff]  }
 0x3b2   : > { %1790 = vmatpush1.bf16.msra.mxu0 %v4297_v11  ;;  %1843 = vmatpush1.bf16.msra.mxu1 %v4303_v19 }
 0x3b3   : > { %1791 = vmatprep.subr.bf16.mxu0 %v4309_v41  ;;  %1844 = vmatprep.subr.bf16.mxu1 %v4315_v59 }
 0x3b4   : > { %1821 = vmatprep.mubr.bf16.mxu0 %v5242_v60  ;;  %1874 = vmatprep.mubr.bf16.mxu1 %v5242_v60 }
 0x3b6   : > { %1792 = vmatpush1.bf16.msra.mxu0 %v4323_v12  ;;  %1845 = vmatpush1.bf16.msra.mxu1 %v4329_v13 }
 0x3b7   : > { %1793 = vmatprep.subr.bf16.mxu0 %v4335_v10  ;;  %1846 = vmatprep.subr.bf16.mxu1 %v4341_v15 }
 0x3ba   : > { %1794 = vmatpush1.bf16.msra.mxu0 %v4347_v62  ;;  %1847 = vmatpush1.bf16.msra.mxu1 %v4353_v25 }
 0x3bb   : > { %1795 = vmatprep.subr.bf16.mxu0 %v4425_v0  ;;  %1848 = vmatprep.subr.bf16.mxu1 %v4431_v50 }
 0x3be   : > { %1796 = vmatpush1.bf16.msra.mxu0 %v4437_v28  ;;  %1849 = vmatpush1.bf16.msra.mxu1 %v4443_v29 }
 0x3bf   : > { %1797 = vmatprep.subr.bf16.mxu0 %v4449_v30  ;;  %1850 = vmatprep.subr.bf16.mxu1 %v4455_v31 }
 0x3c2   : > { %1798 = vmatpush1.bf16.msra.mxu0 %v4461_v33  ;;  %1851 = vmatpush1.bf16.msra.mxu1 %v4467_v34 }
 0x3c3   : > { %1799 = vmatprep.subr.bf16.mxu0 %v4473_v36  ;;  %1852 = vmatprep.subr.bf16.mxu1 %v4479_v18 }
 0x3c6   : > { %1800 = vmatpush1.bf16.msra.mxu0 %v4485_v24  ;;  %1853 = vmatpush1.bf16.msra.mxu1 %v4491_v2 }
 0x3c7   : > { %1801 = vmatprep.subr.bf16.mxu0 %v4497_v4  ;;  %1854 = vmatprep.subr.bf16.mxu1 %v4503_v1 }
 0x3ca   : > { %1802 = vmatpush1.bf16.msra.mxu0 %v4509_v61  ;;  %1855 = vmatpush1.bf16.msra.mxu1 %v4515_v6 }
 0x3cb   : > { %1803 = vmatprep.subr.bf16.mxu0 %v4521_v8  ;;  %1856 = vmatprep.subr.bf16.mxu1 %v4527_v14 }
 0x3ce   : > { %1804 = vmatpush1.bf16.msra.mxu0 %v4533_v23  ;;  %1857 = vmatpush1.bf16.msra.mxu1 %v4539_v21 }
 0x3cf   : > { %1939 = vmatprep.subr.bf16.mxu0 %v4379_v37  ;;  %1992 = vmatprep.subr.bf16.mxu1 %v4385_v38 }
 0x484   : > { %v1673_v20 = vpop.f32.mrb[60].mxu0  ;;  %v1726_v63 = vpop.f32.mrb[60].mxu1 }
 0x485   : > { %v1682_v40 = vadd.f32 %v1673_v20, %v1635_v7  ;;  %v1735_v42 = vadd.f32 %v1726_v63, %v1688_v17  ;;  %v1675_v43 = vpop.f32.mrb[61].mxu0  ;;  %v1728_v44 = vpop.f32.mrb[61].mxu1 }
 0x486   : > { %v1683_v47 = vadd.f32 %v1675_v43, %v1636_v22  ;;  %v1736_v48 = vadd.f32 %v1728_v44, %v1689_v9  ;;  %v1677_v49 = vpop.f32.mrb[62].mxu0  ;;  %v1730_v51 = vpop.f32.mrb[62].mxu1 }
 0x487   : > { %v1739_v54 = vmul.f32 0.5, %v1682_v40  ;;  %v1684_v55 = vadd.f32 %v1677_v49, %v1637_v46  ;;  %v1737_v26 = vadd.f32 %v1730_v51, %v1690_v35  ;;  %v1679_v57 = vpop.f32.mrb[63].mxu0  ;;  %v1732_v58 = vpop.f32.mrb[63].mxu1 }
 0x488   : > { %v1747_v7 = vmul.f32 0.5, %v1683_v47  ;;  %v1685_v17 = vadd.f32 %v1679_v57, %v1638_v52  ;;  %v1738_v20 = vadd.f32 %v1732_v58, %v1691_v53  ;;  %v1757_v63 = vmul.f32 0.5, %v1736_v48 }
 0x489   : > { %3380 = vtanh.f32 %v1739_v54  ;;  %v1740_v16 = vmul.f32 0.5, %v1684_v55 }
 0x48a   : > { %3382 = vtanh.f32 %v1747_v7  ;;  %v1748_v5 = vmul.f32 0.5, %v1685_v17  ;;  %v1758_v40 = vmul.f32 0.5, %v1738_v20 }
 0x48b   : > { %3384 = vtanh.f32 %v1740_v16 }
 0x48c   : > { %3386 = vtanh.f32 %v1735_v42 }
 0x48d   : > { %3388 = vtanh.f32 %v1748_v5 }
 0x48e   : > { %3390 = vtanh.f32 %v1737_v26 }
 0x48f   : > { %3392 = vtanh.f32 %v1757_v63  ;;  %v1776_v63 = vstv %s3186_s18 }
 0x490   : > { %3394 = vtanh.f32 %v1758_v40 }
 0x493   : > { %v3381_v3 = vpop.eup %3380 }
 0x494   : > { %v3383_v22 = vpop.eup %3382  ;;  %v1743_v32 = vmul.f32 0.5, %v3381_v3 }
 0x495   : > { %v1751_v9 = vmul.f32 0.5, %v3383_v22  ;;  %v3385_v43 = vpop.eup %3384 }
 0x496   : > { %v1745_v44 = vadd.f32 0.5, %v1743_v32  ;;  %v3387_v46 = vpop.eup %3386  ;;  %v1744_v47 = vmul.f32 0.5, %v3385_v43 }
 0x497   : > { %v1753_v35 = vadd.f32 0.5, %v1751_v9  ;;  %v3389_v49 = vpop.eup %3388 }
 0x498   : > { %v1767_v51 = vmul.f32 %v3387_v46, %v1745_v44  ;;  %v1746_v53 = vadd.f32 0.5, %v1744_v47  ;;  %v1752_v42 = vmul.f32 0.5, %v3389_v49  ;;  %v3391_v54 = vpop.eup %3390 }
 0x499   : > { %v1765_v52 = vmul.f32 %v1753_v35, %v4397_v39  ;;  %v3393_v58 = vpop.eup %3392  ;;  %v5250_v35 = vld [vmem:[#allocation17_spill] sm:$0xff] }
 0x49a   : > { %v1754_v55 = vadd.f32 0.5, %v1752_v42  ;;  %v1768_v26 = vmul.f32 %v3391_v54, %v1746_v53  ;;  %v1761_v17 = vmul.f32 0.5, %v3393_v58  ;;  %v3395_v39 = vpop.eup %3394  ;;  %v1838_v47 = vunpack.c.l.bf16 %v5250_v35  ;;  %v5252_v42 = vld [vmem:[#allocation19_spill] sm:$0xff] }
 0x49b   : > { %v4553_v48 = vadd.f32 %v1767_v51, %v1765_v52  ;;  %v1762_v16 = vmul.f32 0.5, %v3395_v39  ;;  %v5251_v52 = vld [vmem:[#allocation18_spill] sm:$0xff]  ;;  %v1839_v54 = vunpack.c.l.bf16 %v5252_v42  ;;  %v1840_v39 = vunpack.c.h.bf16 %v5250_v35 }
 0x49c   : > { %v1766_v57 = vmul.f32 %v1754_v55, %v4401_v45  ;;  %v1763_v20 = vadd.f32 0.5, %v1761_v17  ;;  %v1786_v53 = vunpack.c.l.bf16 %v5251_v52 }
 0x49d   : > { %3396 = vtanh.f32 %v4553_v48  ;;  %v1764_v32 = vadd.f32 0.5, %v1762_v16 }
 0x49e   : > { %v4557_v7 = vadd.f32 %v1768_v26, %v1766_v57 }
 0x4a0   : > { %3398 = vtanh.f32 %v4557_v7 }
 0x4a7   : > { %v3397_v5 = vpop.eup %3396 }
 0x4a8   : > { %v1773_v3 = vmul.f32 %v3397_v5, %v1763_v20 }
 0x4aa   : > { %v1777_v22 = vmul.f32 %v1776_v63, %v1773_v3  ;;  %v3399_v9 = vpop.eup %3398 }
 0x4ab   : > { %v1774_v45 = vmul.f32 %v3399_v9, %v1764_v32 }
 0x4ac   : > { %v4561_v40 = vadd.f32 %v1777_v22, %v4405_v56  ;;  %v5249_v56 = vld [vmem:[#allocation16_spill] sm:$0xff]  ;;  %v1841_v22 = vunpack.c.h.bf16 %v5252_v42 }
 0x4ad   : > { %v1778_v43 = vmul.f32 %v1776_v63, %v1774_v45  ;;  %v1781_v44 = vpack.c.bf16 %v1774_v45, %v1773_v3  ;;  %v1787_v17 = vunpack.c.h.bf16 %v5249_v56  ;;  %v1788_v3 = vunpack.c.h.bf16 %v5251_v52 }
 0x4af   : > { %v4564_v46 = vadd.f32 %v1778_v43, %v4408_v27  ;;  %1822 = vmatmul.mubr.bf16.vlgmr.msra.gmra.mrb[64].mxu0 %v1781_v44  ;;  %1875 = vmatmul.mubr.bf16.vlgmr.msra.gmra.mrb[64].mxu1 %v1781_v44  ;;  %v1785_v27 = vunpack.c.l.bf16 %v5249_v56 }
 0x4b0   : > { %1940 = vmatpush1.bf16.msra.mxu0 %v4297_v11  ;;  %1993 = vmatpush1.bf16.msra.mxu1 %v4303_v19 }
 0x4b1   : > { %1941 = vmatprep.subr.bf16.mxu0 %v4309_v41  ;;  %1994 = vmatprep.subr.bf16.mxu1 %v4315_v59 }
 0x4b2   : > { %1971 = vmatprep.mubr.bf16.mxu0 %v5242_v60  ;;  %2024 = vmatprep.mubr.bf16.mxu1 %v5242_v60 }
 0x4b4   : > { %1942 = vmatpush1.bf16.msra.mxu0 %v4323_v12  ;;  %1995 = vmatpush1.bf16.msra.mxu1 %v4329_v13 }
 0x4b5   : > { %1943 = vmatprep.subr.bf16.mxu0 %v4335_v10  ;;  %1996 = vmatprep.subr.bf16.mxu1 %v4341_v15 }
 0x4b8   : > { %1944 = vmatpush1.bf16.msra.mxu0 %v4347_v62  ;;  %1997 = vmatpush1.bf16.msra.mxu1 %v4353_v25 }
 0x4b9   : > { %1945 = vmatprep.subr.bf16.mxu0 %v4425_v0  ;;  %1998 = vmatprep.subr.bf16.mxu1 %v4431_v50 }
 0x4bc   : > { %1946 = vmatpush1.bf16.msra.mxu0 %v4437_v28  ;;  %1999 = vmatpush1.bf16.msra.mxu1 %v4443_v29 }
 0x4bd   : > { %1947 = vmatprep.subr.bf16.mxu0 %v4449_v30  ;;  %2000 = vmatprep.subr.bf16.mxu1 %v4455_v31 }
 0x4c0   : > { %1948 = vmatpush1.bf16.msra.mxu0 %v4461_v33  ;;  %2001 = vmatpush1.bf16.msra.mxu1 %v4467_v34 }
 0x4c1   : > { %1949 = vmatprep.subr.bf16.mxu0 %v4473_v36  ;;  %2002 = vmatprep.subr.bf16.mxu1 %v4479_v18 }
 0x4c4   : > { %1950 = vmatpush1.bf16.msra.mxu0 %v4485_v24  ;;  %2003 = vmatpush1.bf16.msra.mxu1 %v4491_v2 }
 0x4c5   : > { %1951 = vmatprep.subr.bf16.mxu0 %v4497_v4  ;;  %2004 = vmatprep.subr.bf16.mxu1 %v4503_v1 }
 0x4c8   : > { %1952 = vmatpush1.bf16.msra.mxu0 %v4509_v61  ;;  %2005 = vmatpush1.bf16.msra.mxu1 %v4515_v6 }
 0x4c9   : > { %1953 = vmatprep.subr.bf16.mxu0 %v4521_v8  ;;  %2006 = vmatprep.subr.bf16.mxu1 %v4527_v14 }
 0x4cc   : > { %1954 = vmatpush1.bf16.msra.mxu0 %v4533_v23  ;;  %2007 = vmatpush1.bf16.msra.mxu1 %v4539_v21 }
 0x4cd   : > { %2089 = vmatprep.subr.bf16.mxu0 %v4379_v37  ;;  %2142 = vmatprep.subr.bf16.mxu1 %v4385_v38 }
 0x582   : > { %v1823_v49 = vpop.f32.mrb[64].mxu0  ;;  %v1876_v51 = vpop.f32.mrb[64].mxu1 }
 0x583   : > { %v1832_v55 = vadd.f32 %v1823_v49, %v1785_v27  ;;  %v1885_v26 = vadd.f32 %v1876_v51, %v1838_v47  ;;  %v1825_v57 = vpop.f32.mrb[65].mxu0  ;;  %v1878_v58 = vpop.f32.mrb[65].mxu1 }
 0x584   : > { %v1833_v20 = vadd.f32 %v1825_v57, %v1786_v53  ;;  %v1886_v16 = vadd.f32 %v1878_v58, %v1839_v54  ;;  %v1827_v5 = vpop.f32.mrb[66].mxu0  ;;  %v1880_v63 = vpop.f32.mrb[66].mxu1 }
 0x585   : > { %v1889_v32 = vmul.f32 0.5, %v1832_v55  ;;  %v1834_v9 = vadd.f32 %v1827_v5, %v1787_v17  ;;  %v1887_v45 = vadd.f32 %v1880_v63, %v1840_v39  ;;  %v1829_v43 = vpop.f32.mrb[67].mxu0  ;;  %v1882_v44 = vpop.f32.mrb[67].mxu1 }
 0x586   : > { %v1897_v27 = vmul.f32 0.5, %v1833_v20  ;;  %v1835_v47 = vadd.f32 %v1829_v43, %v1788_v3  ;;  %v1888_v49 = vadd.f32 %v1882_v44, %v1841_v22  ;;  %v1907_v51 = vmul.f32 0.5, %v1886_v16 }
 0x587   : > { %3400 = vtanh.f32 %v1889_v32  ;;  %v1890_v56 = vmul.f32 0.5, %v1834_v9 }
 0x588   : > { %3402 = vtanh.f32 %v1897_v27  ;;  %v1898_v35 = vmul.f32 0.5, %v1835_v47  ;;  %v1908_v55 = vmul.f32 0.5, %v1888_v49 }
 0x589   : > { %3404 = vtanh.f32 %v1890_v56 }
 0x58a   : > { %3406 = vtanh.f32 %v1885_v26 }
 0x58b   : > { %3408 = vtanh.f32 %v1898_v35 }
 0x58c   : > { %3410 = vtanh.f32 %v1887_v45 }
 0x58d   : > { %3412 = vtanh.f32 %v1907_v51  ;;  %v1926_v51 = vstv %s3187_s19 }
 0x58e   : > { %3414 = vtanh.f32 %v1908_v55 }
 0x591   : > { %v3401_v52 = vpop.eup %3400 }
 0x592   : > { %v3403_v53 = vpop.eup %3402  ;;  %v1893_v42 = vmul.f32 0.5, %v3401_v52 }
 0x593   : > { %v1901_v54 = vmul.f32 0.5, %v3403_v53  ;;  %v3405_v57 = vpop.eup %3404 }
 0x594   : > { %v1895_v58 = vadd.f32 0.5, %v1893_v42  ;;  %v3407_v17 = vpop.eup %3406  ;;  %v1894_v20 = vmul.f32 0.5, %v3405_v57 }
 0x595   : > { %v1903_v39 = vadd.f32 0.5, %v1901_v54  ;;  %v3409_v5 = vpop.eup %3408 }
 0x596   : > { %v1917_v63 = vmul.f32 %v3407_v17, %v1895_v58  ;;  %v1896_v22 = vadd.f32 0.5, %v1894_v20  ;;  %v1902_v26 = vmul.f32 0.5, %v3409_v5  ;;  %v3411_v32 = vpop.eup %3410 }
 0x597   : > { %v1915_v3 = vmul.f32 %v1903_v39, %v4553_v48  ;;  %v3413_v44 = vpop.eup %3412  ;;  %v5254_v39 = vld [vmem:[#allocation21_spill] sm:$0xff] }
 0x598   : > { %v1904_v9 = vadd.f32 0.5, %v1902_v26  ;;  %v1918_v45 = vmul.f32 %v3411_v32, %v1896_v22  ;;  %v1911_v47 = vmul.f32 0.5, %v3413_v44  ;;  %v3415_v48 = vpop.eup %3414  ;;  %v1988_v20 = vunpack.c.l.bf16 %v5254_v39  ;;  %v5256_v26 = vld [vmem:[#allocation23_spill] sm:$0xff] }
 0x599   : > { %v4609_v16 = vadd.f32 %v1917_v63, %v1915_v3  ;;  %v1912_v56 = vmul.f32 0.5, %v3415_v48  ;;  %v5255_v3 = vld [vmem:[#allocation22_spill] sm:$0xff]  ;;  %v1989_v32 = vunpack.c.l.bf16 %v5256_v26  ;;  %v1990_v48 = vunpack.c.h.bf16 %v5254_v39 }
 0x59a   : > { %v1916_v43 = vmul.f32 %v1904_v9, %v4557_v7  ;;  %v1913_v49 = vadd.f32 0.5, %v1911_v47  ;;  %v1936_v22 = vunpack.c.l.bf16 %v5255_v3 }
 0x59b   : > { %3416 = vtanh.f32 %v4609_v16  ;;  %v1914_v42 = vadd.f32 0.5, %v1912_v56 }
 0x59c   : > { %v4613_v27 = vadd.f32 %v1918_v45, %v1916_v43 }
 0x59e   : > { %3418 = vtanh.f32 %v4613_v27 }
 0x5a5   : > { %v3417_v35 = vpop.eup %3416 }
 0x5a6   : > { %v1923_v52 = vmul.f32 %v3417_v35, %v1913_v49 }
 0x5a8   : > { %v1927_v53 = vmul.f32 %v1926_v51, %v1923_v52  ;;  %v3419_v54 = vpop.eup %3418 }
 0x5a9   : > { %v1924_v7 = vmul.f32 %v3419_v54, %v1914_v42 }
 0x5aa   : > { %v4617_v55 = vadd.f32 %v1927_v53, %v4561_v40  ;;  %v5253_v40 = vld [vmem:[#allocation20_spill] sm:$0xff]  ;;  %v1991_v53 = vunpack.c.h.bf16 %v5256_v26 }
 0x5ab   : > { %v1928_v57 = vmul.f32 %v1926_v51, %v1924_v7  ;;  %v1931_v58 = vpack.c.bf16 %v1924_v7, %v1923_v52  ;;  %v1937_v47 = vunpack.c.h.bf16 %v5253_v40  ;;  %v1938_v52 = vunpack.c.h.bf16 %v5255_v3 }
 0x5ad   : > { %v4620_v17 = vadd.f32 %v1928_v57, %v4564_v46  ;;  %1972 = vmatmul.mubr.bf16.vlgmr.msra.gmra.mrb[68].mxu0 %v1931_v58  ;;  %2025 = vmatmul.mubr.bf16.vlgmr.msra.gmra.mrb[68].mxu1 %v1931_v58  ;;  %v1935_v46 = vunpack.c.l.bf16 %v5253_v40 }
 0x5ae   : > { %2090 = vmatpush1.bf16.msra.mxu0 %v4297_v11  ;;  %2143 = vmatpush1.bf16.msra.mxu1 %v4303_v19 }
 0x5af   : > { %2091 = vmatprep.subr.bf16.mxu0 %v4309_v41  ;;  %2144 = vmatprep.subr.bf16.mxu1 %v4315_v59 }
 0x5b0   : > { %2121 = vmatprep.mubr.bf16.mxu0 %v5242_v60  ;;  %2174 = vmatprep.mubr.bf16.mxu1 %v5242_v60 }
 0x5b2   : > { %2092 = vmatpush1.bf16.msra.mxu0 %v4323_v12  ;;  %2145 = vmatpush1.bf16.msra.mxu1 %v4329_v13 }
 0x5b3   : > { %2093 = vmatprep.subr.bf16.mxu0 %v4335_v10  ;;  %2146 = vmatprep.subr.bf16.mxu1 %v4341_v15 }
 0x5b6   : > { %2094 = vmatpush1.bf16.msra.mxu0 %v4347_v62  ;;  %2147 = vmatpush1.bf16.msra.mxu1 %v4353_v25 }
 0x5b7   : > { %2095 = vmatprep.subr.bf16.mxu0 %v4425_v0  ;;  %2148 = vmatprep.subr.bf16.mxu1 %v4431_v50 }
 0x5ba   : > { %2096 = vmatpush1.bf16.msra.mxu0 %v4437_v28  ;;  %2149 = vmatpush1.bf16.msra.mxu1 %v4443_v29 }
 0x5bb   : > { %2097 = vmatprep.subr.bf16.mxu0 %v4449_v30  ;;  %2150 = vmatprep.subr.bf16.mxu1 %v4455_v31 }
 0x5be   : > { %2098 = vmatpush1.bf16.msra.mxu0 %v4461_v33  ;;  %2151 = vmatpush1.bf16.msra.mxu1 %v4467_v34 }
 0x5bf   : > { %2099 = vmatprep.subr.bf16.mxu0 %v4473_v36  ;;  %2152 = vmatprep.subr.bf16.mxu1 %v4479_v18 }
 0x5c2   : > { %2100 = vmatpush1.bf16.msra.mxu0 %v4485_v24  ;;  %2153 = vmatpush1.bf16.msra.mxu1 %v4491_v2 }
 0x5c3   : > { %2101 = vmatprep.subr.bf16.mxu0 %v4497_v4  ;;  %2154 = vmatprep.subr.bf16.mxu1 %v4503_v1 }
 0x5c6   : > { %2102 = vmatpush1.bf16.msra.mxu0 %v4509_v61  ;;  %2155 = vmatpush1.bf16.msra.mxu1 %v4515_v6 }
 0x5c7   : > { %2103 = vmatprep.subr.bf16.mxu0 %v4521_v8  ;;  %2156 = vmatprep.subr.bf16.mxu1 %v4527_v14 }
 0x5ca   : > { %2104 = vmatpush1.bf16.msra.mxu0 %v4533_v23  ;;  %2157 = vmatpush1.bf16.msra.mxu1 %v4539_v21 }
 0x5cb   : > { %2239 = vmatprep.subr.bf16.mxu0 %v4379_v37  ;;  %2292 = vmatprep.subr.bf16.mxu1 %v4385_v38 }
 0x680   : > { %v1973_v5 = vpop.f32.mrb[68].mxu0  ;;  %v2026_v63 = vpop.f32.mrb[68].mxu1 }
 0x681   : > { %v1982_v9 = vadd.f32 %v1973_v5, %v1935_v46  ;;  %v2035_v45 = vadd.f32 %v2026_v63, %v1988_v20  ;;  %v1975_v43 = vpop.f32.mrb[69].mxu0  ;;  %v2028_v44 = vpop.f32.mrb[69].mxu1 }
 0x682   : > { %v1983_v49 = vadd.f32 %v1975_v43, %v1936_v22  ;;  %v2036_v56 = vadd.f32 %v2028_v44, %v1989_v32  ;;  %v1977_v35 = vpop.f32.mrb[70].mxu0  ;;  %v2030_v51 = vpop.f32.mrb[70].mxu1 }
 0x683   : > { %v2039_v42 = vmul.f32 0.5, %v1982_v9  ;;  %v1984_v54 = vadd.f32 %v1977_v35, %v1937_v47  ;;  %v2037_v7 = vadd.f32 %v2030_v51, %v1990_v48  ;;  %v1979_v57 = vpop.f32.mrb[71].mxu0  ;;  %v2032_v58 = vpop.f32.mrb[71].mxu1 }
 0x684   : > { %v2047_v46 = vmul.f32 0.5, %v1983_v49  ;;  %v1985_v20 = vadd.f32 %v1979_v57, %v1938_v52  ;;  %v2038_v5 = vadd.f32 %v2032_v58, %v1991_v53  ;;  %v2057_v63 = vmul.f32 0.5, %v2036_v56 }
 0x685   : > { %3420 = vtanh.f32 %v2039_v42  ;;  %v2040_v40 = vmul.f32 0.5, %v1984_v54 }
 0x686   : > { %3422 = vtanh.f32 %v2047_v46  ;;  %v2048_v39 = vmul.f32 0.5, %v1985_v20  ;;  %v2058_v9 = vmul.f32 0.5, %v2038_v5 }
 0x687   : > { %3424 = vtanh.f32 %v2040_v40 }
 0x688   : > { %3426 = vtanh.f32 %v2035_v45 }
 0x689   : > { %3428 = vtanh.f32 %v2048_v39 }
 0x68a   : > { %3430 = vtanh.f32 %v2037_v7 }
 0x68b   : > { %3432 = vtanh.f32 %v2057_v63  ;;  %v2076_v63 = vstv %s3188_s20 }
 0x68c   : > { %3434 = vtanh.f32 %v2058_v9 }
 0x68f   : > { %v3421_v3 = vpop.eup %3420 }
 0x690   : > { %v3423_v22 = vpop.eup %3422  ;;  %v2043_v26 = vmul.f32 0.5, %v3421_v3 }
 0x691   : > { %v2051_v32 = vmul.f32 0.5, %v3423_v22  ;;  %v3425_v43 = vpop.eup %3424 }
 0x692   : > { %v2045_v44 = vadd.f32 0.5, %v2043_v26  ;;  %v3427_v47 = vpop.eup %3426  ;;  %v2044_v49 = vmul.f32 0.5, %v3425_v43 }
 0x693   : > { %v2053_v48 = vadd.f32 0.5, %v2051_v32  ;;  %v3429_v35 = vpop.eup %3428 }
 0x694   : > { %v2067_v51 = vmul.f32 %v3427_v47, %v2045_v44  ;;  %v2046_v53 = vadd.f32 0.5, %v2044_v49  ;;  %v2052_v45 = vmul.f32 0.5, %v3429_v35  ;;  %v3431_v42 = vpop.eup %3430 }
 0x695   : > { %v2065_v52 = vmul.f32 %v2053_v48, %v4609_v16  ;;  %v3433_v58 = vpop.eup %3432 }
 0x696   : > { %v2054_v54 = vadd.f32 0.5, %v2052_v45  ;;  %v2068_v7 = vmul.f32 %v3431_v42, %v2046_v53  ;;  %v2061_v20 = vmul.f32 0.5, %v3433_v58  ;;  %v3435_v16 = vpop.eup %3434 }
 0x697   : > { %v4665_v56 = vadd.f32 %v2067_v51, %v2065_v52  ;;  %v2062_v40 = vmul.f32 0.5, %v3435_v16 }
 0x698   : > { %v2066_v57 = vmul.f32 %v2054_v54, %v4613_v27  ;;  %v2063_v5 = vadd.f32 0.5, %v2061_v20 }
 0x699   : > { %3436 = vtanh.f32 %v4665_v56  ;;  %v2064_v26 = vadd.f32 0.5, %v2062_v40 }
 0x69a   : > { %v4669_v46 = vadd.f32 %v2068_v7, %v2066_v57 }
 0x69c   : > { %3438 = vtanh.f32 %v4669_v46 }
 0x6a3   : > { %v3437_v39 = vpop.eup %3436 }
 0x6a4   : > { %v2073_v3 = vmul.f32 %v3437_v39, %v2063_v5 }
 0x6a6   : > { %v2077_v22 = vmul.f32 %v2076_v63, %v2073_v3  ;;  %v3439_v32 = vpop.eup %3438 }
 0x6a7   : > { %v2074_v27 = vmul.f32 %v3439_v32, %v2064_v26 }
 0x6a8   : > { %v4673_v9 = vadd.f32 %v2077_v22, %v4617_v55 }
 0x6a9   : > { %v2078_v43 = vmul.f32 %v2076_v63, %v2074_v27  ;;  %v2081_v44 = vpack.c.bf16 %v2074_v27, %v2073_v3 }
 0x6ab   : > { %v4676_v47 = vadd.f32 %v2078_v43, %v4620_v17  ;;  %2122 = vmatmul.mubr.bf16.vlgmr.msra.gmra.mrb[72].mxu0 %v2081_v44  ;;  %2175 = vmatmul.mubr.bf16.vlgmr.msra.gmra.mrb[72].mxu1 %v2081_v44 }
 0x6ac   : > { %2240 = vmatpush1.bf16.msra.mxu0 %v4297_v11  ;;  %2293 = vmatpush1.bf16.msra.mxu1 %v4303_v19  ;;  %v5257_v11 = vld [vmem:[#allocation24_spill] sm:$0xff] }
 0x6ad   : > { %2241 = vmatprep.subr.bf16.mxu0 %v4309_v41  ;;  %2294 = vmatprep.subr.bf16.mxu1 %v4315_v59  ;;  %v2085_v19 = vunpack.c.l.bf16 %v5257_v11  ;;  %v5258_v41 = vld [vmem:[#allocation25_spill] sm:$0xff]  ;;  %v2087_v35 = vunpack.c.h.bf16 %v5257_v11 }
 0x6ae   : > { %2271 = vmatprep.mubr.bf16.mxu0 %v5242_v60  ;;  %2324 = vmatprep.mubr.bf16.mxu1 %v5242_v60  ;;  %v2138_v59 = vunpack.c.l.bf16 %v5258_v41 }
 0x6b0   : > { %2242 = vmatpush1.bf16.msra.mxu0 %v4323_v12  ;;  %2295 = vmatpush1.bf16.msra.mxu1 %v4329_v13 }
 0x6b1   : > { %2243 = vmatprep.subr.bf16.mxu0 %v4335_v10  ;;  %2296 = vmatprep.subr.bf16.mxu1 %v4341_v15  ;;  %v5259_v10 = vld [vmem:[#allocation26_spill] sm:$0xff] }
 0x6b2   : > { %v2086_v15 = vunpack.c.l.bf16 %v5259_v10  ;;  %v2088_v45 = vunpack.c.h.bf16 %v5259_v10 }
 0x6b4   : > { %2244 = vmatpush1.bf16.msra.mxu0 %v4347_v62  ;;  %2297 = vmatpush1.bf16.msra.mxu1 %v4353_v25  ;;  %v5260_v62 = vld [vmem:[#allocation27_spill] sm:$0xff] }
 0x6b5   : > { %2245 = vmatprep.subr.bf16.mxu0 %v4425_v0  ;;  %2298 = vmatprep.subr.bf16.mxu1 %v4431_v50  ;;  %v2139_v25 = vunpack.c.l.bf16 %v5260_v62  ;;  %v2141_v42 = vunpack.c.h.bf16 %v5260_v62 }
 0x6b8   : > { %2246 = vmatpush1.bf16.msra.mxu0 %v4437_v28  ;;  %2299 = vmatpush1.bf16.msra.mxu1 %v4443_v29 }
 0x6b9   : > { %2247 = vmatprep.subr.bf16.mxu0 %v4449_v30  ;;  %2300 = vmatprep.subr.bf16.mxu1 %v4455_v31 }
 0x6bc   : > { %2248 = vmatpush1.bf16.msra.mxu0 %v4461_v33  ;;  %2301 = vmatpush1.bf16.msra.mxu1 %v4467_v34 }
 0x6bd   : > { %2249 = vmatprep.subr.bf16.mxu0 %v4473_v36  ;;  %2302 = vmatprep.subr.bf16.mxu1 %v4479_v18 }
 0x6c0   : > { %2250 = vmatpush1.bf16.msra.mxu0 %v4485_v24  ;;  %2303 = vmatpush1.bf16.msra.mxu1 %v4491_v2 }
 0x6c1   : > { %2251 = vmatprep.subr.bf16.mxu0 %v4497_v4  ;;  %2304 = vmatprep.subr.bf16.mxu1 %v4503_v1 }
 0x6c4   : > { %2252 = vmatpush1.bf16.msra.mxu0 %v4509_v61  ;;  %2305 = vmatpush1.bf16.msra.mxu1 %v4515_v6 }
 0x6c5   : > { %2253 = vmatprep.subr.bf16.mxu0 %v4521_v8  ;;  %2306 = vmatprep.subr.bf16.mxu1 %v4527_v14 }
 0x6c8   : > { %2254 = vmatpush1.bf16.msra.mxu0 %v4533_v23  ;;  %2307 = vmatpush1.bf16.msra.mxu1 %v4539_v21 }
 0x6c9   : > { %2389 = vmatprep.subr.bf16.mxu0 %v4379_v37  ;;  %2442 = vmatprep.subr.bf16.mxu1 %v4385_v38  ;;  %v2140_v37 = vunpack.c.h.bf16 %v5258_v41 }
 0x77e   : > { %v2123_v12 = vpop.f32.mrb[72].mxu0  ;;  %v2176_v13 = vpop.f32.mrb[72].mxu1 }
 0x77f   : > { %v2132_v55 = vadd.f32 %v2123_v12, %v2085_v19  ;;  %v2185_v17 = vadd.f32 %v2176_v13, %v2138_v59  ;;  %v2125_v48 = vpop.f32.mrb[73].mxu0  ;;  %v2178_v49 = vpop.f32.mrb[73].mxu1 }
 0x780   : > { %v2133_v51 = vadd.f32 %v2125_v48, %v2086_v15  ;;  %v2186_v38 = vadd.f32 %v2178_v49, %v2139_v25  ;;  %v2127_v52 = vpop.f32.mrb[74].mxu0  ;;  %v2180_v53 = vpop.f32.mrb[74].mxu1 }
 0x781   : > { %v2189_v54 = vmul.f32 0.5, %v2132_v55  ;;  %v2134_v7 = vadd.f32 %v2127_v52, %v2087_v35  ;;  %v2187_v57 = vadd.f32 %v2180_v53, %v2140_v37  ;;  %v2129_v58 = vpop.f32.mrb[75].mxu0  ;;  %v2182_v20 = vpop.f32.mrb[75].mxu1 }
 0x782   : > { %v2197_v16 = vmul.f32 0.5, %v2133_v51  ;;  %v2135_v5 = vadd.f32 %v2129_v58, %v2088_v45  ;;  %v2188_v40 = vadd.f32 %v2182_v20, %v2141_v42  ;;  %v2207_v3 = vmul.f32 0.5, %v2186_v38 }
 0x783   : > { %3440 = vtanh.f32 %v2189_v54  ;;  %v2190_v39 = vmul.f32 0.5, %v2134_v7  ;;  %v2226_v45 = vstv %s3189_s26 }
 0x784   : > { %3442 = vtanh.f32 %v2197_v16  ;;  %v2198_v63 = vmul.f32 0.5, %v2135_v5  ;;  %v2208_v43 = vmul.f32 0.5, %v2188_v40  ;;  %v4737_v40 = vld [vmem:[%s5148_s2] ss:$16 sps:$4 sm:$0xff]  }
 0x785   : > { %3444 = vtanh.f32 %v2190_v39  ;;  %v4755_v39 = vld [vmem:[%s5148_s2 + $0x2c] ss:$16 sps:$4 sm:$0xff]  }
 0x786   : > { %3446 = vtanh.f32 %v2185_v17 }
 0x787   : > { %3448 = vtanh.f32 %v2198_v63  ;;  %v4763_v63 = vld [vmem:[%s5148_s2 + $0x20] ss:$16 sps:$4 sm:$0xff]  }
 0x788   : > { %3450 = vtanh.f32 %v2187_v57 }
 0x789   : > { %3452 = vtanh.f32 %v2207_v3  ;;  %v4769_v3 = vld [vmem:[%s5148_s2 + $0x28] ss:$16 sps:$4 sm:$0xff]  }
 0x78a   : > { %3454 = vtanh.f32 %v2208_v43 }
 0x78d   : > { %v3441_v22 = vpop.eup %3440 }
 0x78e   : > { %v3443_v26 = vpop.eup %3442  ;;  %v2193_v32 = vmul.f32 0.5, %v3441_v22  ;;  %v4775_v22 = vld [vmem:[%s5148_s2 + $0x44] ss:$16 sps:$4 sm:$0xff]  }
 0x78f   : > { %v2201_v27 = vmul.f32 0.5, %v3443_v26  ;;  %v3445_v44 = vpop.eup %3444  ;;  %v4781_v26 = vld [vmem:[%s5148_s2 + $0x4c] ss:$16 sps:$4 sm:$0xff]  }
 0x790   : > { %v2195_v11 = vadd.f32 0.5, %v2193_v32  ;;  %v3447_v19 = vpop.eup %3446  ;;  %v2194_v59 = vmul.f32 0.5, %v3445_v44  ;;  %v4787_v32 = vld [vmem:[%s5148_s2 + $0x40] ss:$16 sps:$4 sm:$0xff]  }
 0x791   : > { %v2203_v41 = vadd.f32 0.5, %v2201_v27  ;;  %v3449_v12 = vpop.eup %3448  ;;  %v4793_v27 = vld [vmem:[%s5148_s2 + $0x48] ss:$16 sps:$4 sm:$0xff]  }
 0x792   : > { %v2217_v13 = vmul.f32 %v3447_v19, %v2195_v11  ;;  %v2196_v15 = vadd.f32 0.5, %v2194_v59  ;;  %v2202_v62 = vmul.f32 0.5, %v3449_v12  ;;  %v3451_v25 = vpop.eup %3450 }
 0x793   : > { %v2215_v10 = vmul.f32 %v2203_v41, %v4665_v56  ;;  %v3453_v35 = vpop.eup %3452 }
 0x794   : > { %v2204_v17 = vadd.f32 0.5, %v2202_v62  ;;  %v2218_v48 = vmul.f32 %v3451_v25, %v2196_v15  ;;  %v2211_v51 = vmul.f32 0.5, %v3453_v35  ;;  %v3455_v56 = vpop.eup %3454 }
 0x795   : > { %v4721_v55 = vadd.f32 %v2217_v13, %v2215_v10  ;;  %v2212_v52 = vmul.f32 0.5, %v3455_v56 }
 0x796   : > { %v2216_v49 = vmul.f32 %v2204_v17, %v4669_v46  ;;  %v2213_v38 = vadd.f32 0.5, %v2211_v51 }
 0x797   : > { %3456 = vtanh.f32 %v4721_v55  ;;  %v2214_v7 = vadd.f32 0.5, %v2212_v52 }
 0x798   : > { %v4725_v37 = vadd.f32 %v2218_v48, %v2216_v49 }
 0x79a   : > { %3458 = vtanh.f32 %v4725_v37 }
 0x7a1   : > { %v3457_v53 = vpop.eup %3456 }
 0x7a2   : > { %v2223_v42 = vmul.f32 %v3457_v53, %v2213_v38 }
 0x7a4   : > { %v2227_v54 = vmul.f32 %v2226_v45, %v2223_v42  ;;  %v3459_v57 = vpop.eup %3458 }
 0x7a5   : > { %v2224_v46 = vmul.f32 %v3459_v57, %v2214_v7 }
 0x7a6   : > { %v4729_v58 = vadd.f32 %v2227_v54, %v4673_v9  ;;  %v4743_v9 = vld [vmem:[%s5148_s2 + $0x8] ss:$16 sps:$4 sm:$0xff]  }
 0x7a7   : > { %v2228_v20 = vmul.f32 %v2226_v45, %v2224_v46  ;;  %v2231_v16 = vpack.c.bf16 %v2224_v46, %v2223_v42 }
 0x7a9   : > { %v4732_v5 = vadd.f32 %v2228_v20, %v4676_v47  ;;  %2272 = vmatmul.mubr.bf16.vlgmr.msra.gmra.mrb[76].mxu0 %v2231_v16  ;;  %2325 = vmatmul.mubr.bf16.vlgmr.msra.gmra.mrb[76].mxu1 %v2231_v16  ;;  %v4749_v47 = vld [vmem:[%s5148_s2 + $0x24] ss:$16 sps:$4 sm:$0xff]  }
 0x7aa   : > { %2390 = vmatpush1.bf16.msra.mxu0 %v4737_v40  ;;  %2443 = vmatpush1.bf16.msra.mxu1 %v4743_v9 }
 0x7ab   : > { %2391 = vmatprep.subr.bf16.mxu0 %v4749_v47  ;;  %2444 = vmatprep.subr.bf16.mxu1 %v4755_v39 }
 0x7ac   : > { %2421 = vmatprep.mubr.bf16.mxu0 %v5242_v60  ;;  %2474 = vmatprep.mubr.bf16.mxu1 %v5242_v60 }
 0x7ae   : > { %2392 = vmatpush1.bf16.msra.mxu0 %v4763_v63  ;;  %2445 = vmatpush1.bf16.msra.mxu1 %v4769_v3 }
 0x7af   : > { %2393 = vmatprep.subr.bf16.mxu0 %v4775_v22  ;;  %2446 = vmatprep.subr.bf16.mxu1 %v4781_v26 }
 0x7b2   : > { %2394 = vmatpush1.bf16.msra.mxu0 %v4787_v32  ;;  %2447 = vmatpush1.bf16.msra.mxu1 %v4793_v27 }
 0x7b3   : > { %2395 = vmatprep.subr.bf16.mxu0 %v4425_v0  ;;  %2448 = vmatprep.subr.bf16.mxu1 %v4431_v50  ;;  %v4819_v0 = vld [vmem:[%s5148_s2 + $0x4] ss:$16 sps:$4 sm:$0xff]   ;;  %v4825_v50 = vld [vmem:[%s5148_s2 + $0xc] ss:$16 sps:$4 sm:$0xff]  }
 0x7b6   : > { %2396 = vmatpush1.bf16.msra.mxu0 %v4437_v28  ;;  %2449 = vmatpush1.bf16.msra.mxu1 %v4443_v29  ;;  %v5261_v28 = vld [vmem:[#allocation28_spill] sm:$0xff] }
 0x7b7   : > { %2397 = vmatprep.subr.bf16.mxu0 %v4449_v30  ;;  %2450 = vmatprep.subr.bf16.mxu1 %v4455_v31  ;;  %v2235_v29 = vunpack.c.l.bf16 %v5261_v28  ;;  %v5262_v30 = vld [vmem:[#allocation29_spill] sm:$0xff] }
 0x7b8   : > { %v2288_v31 = vunpack.c.l.bf16 %v5262_v30 }
 0x7ba   : > { %2398 = vmatpush1.bf16.msra.mxu0 %v4461_v33  ;;  %2451 = vmatpush1.bf16.msra.mxu1 %v4467_v34 }
 0x7bb   : > { %2399 = vmatprep.subr.bf16.mxu0 %v4473_v36  ;;  %2452 = vmatprep.subr.bf16.mxu1 %v4479_v18  ;;  %v5263_v36 = vld [vmem:[#allocation30_spill] sm:$0xff] }
 0x7bc   : > { %v2236_v18 = vunpack.c.l.bf16 %v5263_v36  ;;  %v2238_v11 = vunpack.c.h.bf16 %v5263_v36 }
 0x7be   : > { %2400 = vmatpush1.bf16.msra.mxu0 %v4485_v24  ;;  %2453 = vmatpush1.bf16.msra.mxu1 %v4491_v2  ;;  %v5264_v24 = vld [vmem:[#allocation31_spill] sm:$0xff] }
 0x7bf   : > { %2401 = vmatprep.subr.bf16.mxu0 %v4497_v4  ;;  %2454 = vmatprep.subr.bf16.mxu1 %v4503_v1  ;;  %v2289_v2 = vunpack.c.l.bf16 %v5264_v24  ;;  %v2291_v19 = vunpack.c.h.bf16 %v5264_v24 }
 0x7c2   : > { %2402 = vmatpush1.bf16.msra.mxu0 %v4509_v61  ;;  %2455 = vmatpush1.bf16.msra.mxu1 %v4515_v6 }
 0x7c3   : > { %2403 = vmatprep.subr.bf16.mxu0 %v4521_v8  ;;  %2456 = vmatprep.subr.bf16.mxu1 %v4527_v14  ;;  %v2237_v8 = vunpack.c.h.bf16 %v5261_v28  ;;  %v2290_v14 = vunpack.c.h.bf16 %v5262_v30 }
 0x7c6   : > { %2404 = vmatpush1.bf16.msra.mxu0 %v4533_v23  ;;  %2457 = vmatpush1.bf16.msra.mxu1 %v4539_v21 }
 0x7c7   : > { %2539 = vmatprep.subr.bf16.mxu0 %v4819_v0  ;;  %2592 = vmatprep.subr.bf16.mxu1 %v4825_v50 }
 0x87c   : > { %v2273_v33 = vpop.f32.mrb[76].mxu0  ;;  %v2326_v34 = vpop.f32.mrb[76].mxu1 }
 0x87d   : > { %v2282_v4 = vadd.f32 %v2273_v33, %v2235_v29  ;;  %v2335_v1 = vadd.f32 %v2326_v34, %v2288_v31  ;;  %v2275_v61 = vpop.f32.mrb[77].mxu0  ;;  %v2328_v6 = vpop.f32.mrb[77].mxu1 }
 0x87e   : > { %v2283_v23 = vadd.f32 %v2275_v61, %v2236_v18  ;;  %v2336_v21 = vadd.f32 %v2328_v6, %v2289_v2  ;;  %v2277_v43 = vpop.f32.mrb[78].mxu0  ;;  %v2330_v44 = vpop.f32.mrb[78].mxu1  ;;  %v2376_v61 = vstv %s3190_s29 }
 0x87f   : > { %v2339_v41 = vmul.f32 0.5, %v2282_v4  ;;  %v2284_v59 = vadd.f32 %v2277_v43, %v2237_v8  ;;  %v2337_v12 = vadd.f32 %v2330_v44, %v2290_v14  ;;  %v2279_v13 = vpop.f32.mrb[79].mxu0  ;;  %v2332_v10 = vpop.f32.mrb[79].mxu1 }
 0x880   : > { %v2347_v15 = vmul.f32 0.5, %v2283_v23  ;;  %v2285_v62 = vadd.f32 %v2279_v13, %v2238_v11  ;;  %v2338_v25 = vadd.f32 %v2332_v10, %v2291_v19  ;;  %v2357_v49 = vmul.f32 0.5, %v2336_v21  ;;  %v4877_v19 = vld [vmem:[%s5148_s2 + $0x60] ss:$16 sps:$4 sm:$0xff]   ;;  %v4907_v10 = vld [vmem:[%s5148_s2 + $0x88] ss:$16 sps:$4 sm:$0xff]  }
 0x881   : > { %3460 = vtanh.f32 %v2339_v41  ;;  %v2340_v17 = vmul.f32 0.5, %v2284_v59  ;;  %v4883_v41 = vld [vmem:[%s5148_s2 + $0x68] ss:$16 sps:$4 sm:$0xff]   ;;  %v4889_v59 = vld [vmem:[%s5148_s2 + $0x84] ss:$16 sps:$4 sm:$0xff]  }
 0x882   : > { %3462 = vtanh.f32 %v2347_v15  ;;  %v2348_v48 = vmul.f32 0.5, %v2285_v62  ;;  %v2358_v52 = vmul.f32 0.5, %v2338_v25  ;;  %v4901_v13 = vld [vmem:[%s5148_s2 + $0x80] ss:$16 sps:$4 sm:$0xff]   ;;  %v4913_v15 = vld [vmem:[%s5148_s2 + $0xa4] ss:$16 sps:$4 sm:$0xff]  }
 0x883   : > { %3464 = vtanh.f32 %v2340_v17  ;;  %v4919_v62 = vld [vmem:[%s5148_s2 + $0xac] ss:$16 sps:$4 sm:$0xff]   ;;  %v4925_v25 = vld [vmem:[%s5148_s2 + $0xa0] ss:$16 sps:$4 sm:$0xff]   ;;  %v4931_v17 = vld [vmem:[%s5148_s2 + $0xa8] ss:$16 sps:$4 sm:$0xff]  }
 0x884   : > { %3466 = vtanh.f32 %v2335_v1 }
 0x885   : > { %3468 = vtanh.f32 %v2348_v48  ;;  %v4937_v48 = vld [vmem:[%s5148_s2 + $0xc4] ss:$16 sps:$4 sm:$0xff]  }
 0x886   : > { %3470 = vtanh.f32 %v2337_v12  ;;  %v4895_v12 = vld [vmem:[%s5148_s2 + $0x8c] ss:$16 sps:$4 sm:$0xff]  }
 0x887   : > { %3472 = vtanh.f32 %v2357_v49  ;;  %v4943_v49 = vld [vmem:[%s5148_s2 + $0xcc] ss:$16 sps:$4 sm:$0xff]  }
 0x888   : > { %3474 = vtanh.f32 %v2358_v52  ;;  %v4973_v52 = vld [vmem:[%s5148_s2 + $0xe0] ss:$16 sps:$4 sm:$0xff]  }
 0x88b   : > { %v3461_v35 = vpop.eup %3460 }
 0x88c   : > { %v3463_v51 = vpop.eup %3462  ;;  %v2343_v56 = vmul.f32 0.5, %v3461_v35  ;;  %v4949_v35 = vld [vmem:[%s5148_s2 + $0xc0] ss:$16 sps:$4 sm:$0xff]  }
 0x88d   : > { %v2351_v38 = vmul.f32 0.5, %v3463_v51  ;;  %v3465_v53 = vpop.eup %3464  ;;  %v4955_v51 = vld [vmem:[%s5148_s2 + $0xc8] ss:$16 sps:$4 sm:$0xff]  }
 0x88e   : > { %v2345_v45 = vadd.f32 0.5, %v2343_v56  ;;  %v3467_v42 = vpop.eup %3466  ;;  %v2344_v7 = vmul.f32 0.5, %v3465_v53  ;;  %v4961_v56 = vld [vmem:[%s5148_s2 + $0xe4] ss:$16 sps:$4 sm:$0xff]   ;;  %v4979_v53 = vld [vmem:[%s5148_s2 + $0xe8] ss:$16 sps:$4 sm:$0xff]  }
 0x88f   : > { %v2353_v54 = vadd.f32 0.5, %v2351_v38  ;;  %v3469_v57 = vpop.eup %3468  ;;  %v4967_v38 = vld [vmem:[%s5148_s2 + $0xec] ss:$16 sps:$4 sm:$0xff]  }
 0x890   : > { %v2367_v46 = vmul.f32 %v3467_v42, %v2345_v45  ;;  %v2346_v16 = vadd.f32 0.5, %v2344_v7  ;;  %v2352_v28 = vmul.f32 0.5, %v3469_v57  ;;  %v3471_v29 = vpop.eup %3470  ;;  %v5265_v45 = vld [vmem:[#allocation32_spill] sm:$0xff] }
 0x891   : > { %v2365_v20 = vmul.f32 %v2353_v54, %v4721_v55  ;;  %v3473_v36 = vpop.eup %3472  ;;  %v2385_v42 = vunpack.c.l.bf16 %v5265_v45  ;;  %v5266_v54 = vld [vmem:[#allocation33_spill] sm:$0xff] }
 0x892   : > { %v2354_v31 = vadd.f32 0.5, %v2352_v28  ;;  %v2368_v33 = vmul.f32 %v3471_v29, %v2346_v16  ;;  %v2361_v24 = vmul.f32 0.5, %v3473_v36  ;;  %v3475_v55 = vpop.eup %3474  ;;  %v2438_v7 = vunpack.c.l.bf16 %v5266_v54  ;;  %v5268_v28 = vld [vmem:[#allocation35_spill] sm:$0xff] }
 0x893   : > { %v4837_v30 = vadd.f32 %v2367_v46, %v2365_v20  ;;  %v2362_v4 = vmul.f32 0.5, %v3475_v55  ;;  %v5267_v20 = vld [vmem:[#allocation34_spill] sm:$0xff]  ;;  %v2439_v29 = vunpack.c.l.bf16 %v5268_v28  ;;  %v2440_v55 = vunpack.c.h.bf16 %v5266_v54 }
 0x894   : > { %v2366_v34 = vmul.f32 %v2354_v31, %v4725_v37  ;;  %v2363_v2 = vadd.f32 0.5, %v2361_v24  ;;  %v2386_v16 = vunpack.c.l.bf16 %v5267_v20  ;;  %v2387_v24 = vunpack.c.h.bf16 %v5265_v45 }
 0x895   : > { %3476 = vtanh.f32 %v4837_v30  ;;  %v2364_v14 = vadd.f32 0.5, %v2362_v4 }
 0x896   : > { %v4841_v18 = vadd.f32 %v2368_v33, %v2366_v34 }
 0x898   : > { %3478 = vtanh.f32 %v4841_v18 }
 0x89f   : > { %v3477_v1 = vpop.eup %3476 }
 0x8a0   : > { %v2373_v6 = vmul.f32 %v3477_v1, %v2363_v2 }
 0x8a2   : > { %v2377_v8 = vmul.f32 %v2376_v61, %v2373_v6  ;;  %v3479_v23 = vpop.eup %3478 }
 0x8a3   : > { %v2374_v37 = vmul.f32 %v3479_v23, %v2364_v14 }
 0x8a4   : > { %v4845_v21 = vadd.f32 %v2377_v8, %v4729_v58  ;;  %v4865_v58 = vld [vmem:[%s5148_s2 + $0x64] ss:$16 sps:$4 sm:$0xff]   ;;  %v2441_v8 = vunpack.c.h.bf16 %v5268_v28 }
 0x8a5   : > { %v2378_v43 = vmul.f32 %v2376_v61, %v2374_v37  ;;  %v2381_v44 = vpack.c.bf16 %v2374_v37, %v2373_v6  ;;  %v2388_v6 = vunpack.c.h.bf16 %v5267_v20 }
 0x8a7   : > { %v4848_v11 = vadd.f32 %v2378_v43, %v4732_v5  ;;  %2422 = vmatmul.mubr.bf16.vlgmr.msra.gmra.mrb[80].mxu0 %v2381_v44  ;;  %2475 = vmatmul.mubr.bf16.vlgmr.msra.gmra.mrb[80].mxu1 %v2381_v44  ;;  %v4871_v5 = vld [vmem:[%s5148_s2 + $0x6c] ss:$16 sps:$4 sm:$0xff]  }
 0x8a8   : > { %2540 = vmatpush1.bf16.msra.mxu0 %v4737_v40  ;;  %2593 = vmatpush1.bf16.msra.mxu1 %v4743_v9 }
 0x8a9   : > { %2541 = vmatprep.subr.bf16.mxu0 %v4749_v47  ;;  %2594 = vmatprep.subr.bf16.mxu1 %v4755_v39 }
 0x8aa   : > { %2571 = vmatprep.mubr.bf16.mxu0 %v5242_v60  ;;  %2624 = vmatprep.mubr.bf16.mxu1 %v5242_v60 }
 0x8ac   : > { %2542 = vmatpush1.bf16.msra.mxu0 %v4763_v63  ;;  %2595 = vmatpush1.bf16.msra.mxu1 %v4769_v3 }
 0x8ad   : > { %2543 = vmatprep.subr.bf16.mxu0 %v4775_v22  ;;  %2596 = vmatprep.subr.bf16.mxu1 %v4781_v26 }
 0x8b0   : > { %2544 = vmatpush1.bf16.msra.mxu0 %v4787_v32  ;;  %2597 = vmatpush1.bf16.msra.mxu1 %v4793_v27 }
 0x8b1   : > { %2545 = vmatprep.subr.bf16.mxu0 %v4865_v58  ;;  %2598 = vmatprep.subr.bf16.mxu1 %v4871_v5 }
 0x8b4   : > { %2546 = vmatpush1.bf16.msra.mxu0 %v4877_v19  ;;  %2599 = vmatpush1.bf16.msra.mxu1 %v4883_v41 }
 0x8b5   : > { %2547 = vmatprep.subr.bf16.mxu0 %v4889_v59  ;;  %2600 = vmatprep.subr.bf16.mxu1 %v4895_v12 }
 0x8b8   : > { %2548 = vmatpush1.bf16.msra.mxu0 %v4901_v13  ;;  %2601 = vmatpush1.bf16.msra.mxu1 %v4907_v10 }
 0x8b9   : > { %2549 = vmatprep.subr.bf16.mxu0 %v4913_v15  ;;  %2602 = vmatprep.subr.bf16.mxu1 %v4919_v62 }
 0x8bc   : > { %2550 = vmatpush1.bf16.msra.mxu0 %v4925_v25  ;;  %2603 = vmatpush1.bf16.msra.mxu1 %v4931_v17 }
 0x8bd   : > { %2551 = vmatprep.subr.bf16.mxu0 %v4937_v48  ;;  %2604 = vmatprep.subr.bf16.mxu1 %v4943_v49 }
 0x8c0   : > { %2552 = vmatpush1.bf16.msra.mxu0 %v4949_v35  ;;  %2605 = vmatpush1.bf16.msra.mxu1 %v4955_v51 }
 0x8c1   : > { %2553 = vmatprep.subr.bf16.mxu0 %v4961_v56  ;;  %2606 = vmatprep.subr.bf16.mxu1 %v4967_v38 }
 0x8c4   : > { %2554 = vmatpush1.bf16.msra.mxu0 %v4973_v52  ;;  %2607 = vmatpush1.bf16.msra.mxu1 %v4979_v53 }
 0x8c5   : > { %2689 = vmatprep.subr.bf16.mxu0 %v4819_v0  ;;  %2742 = vmatprep.subr.bf16.mxu1 %v4825_v50 }
 0x97a   : > { %v2423_v57 = vpop.f32.mrb[80].mxu0  ;;  %v2476_v46 = vpop.f32.mrb[80].mxu1 }
 0x97b   : > { %v2432_v31 = vadd.f32 %v2423_v57, %v2385_v42  ;;  %v2485_v33 = vadd.f32 %v2476_v46, %v2438_v7  ;;  %v2425_v34 = vpop.f32.mrb[81].mxu0  ;;  %v2478_v36 = vpop.f32.mrb[81].mxu1 }
 0x97c   : > { %v2433_v2 = vadd.f32 %v2425_v34, %v2386_v16  ;;  %v2486_v4 = vadd.f32 %v2478_v36, %v2439_v29  ;;  %v2427_v1 = vpop.f32.mrb[82].mxu0  ;;  %v2480_v61 = vpop.f32.mrb[82].mxu1 }
 0x97d   : > { %v2489_v14 = vmul.f32 0.5, %v2432_v31  ;;  %v2434_v23 = vadd.f32 %v2427_v1, %v2387_v24  ;;  %v2487_v37 = vadd.f32 %v2480_v61, %v2440_v55  ;;  %v2429_v43 = vpop.f32.mrb[83].mxu0  ;;  %v2482_v44 = vpop.f32.mrb[83].mxu1 }
 0x97e   : > { %v2497_v42 = vmul.f32 0.5, %v2433_v2  ;;  %v2435_v7 = vadd.f32 %v2429_v43, %v2388_v6  ;;  %v2488_v57 = vadd.f32 %v2482_v44, %v2441_v8  ;;  %v2507_v46 = vmul.f32 0.5, %v2486_v4 }
 0x97f   : > { %3480 = vtanh.f32 %v2489_v14  ;;  %v2490_v45 = vmul.f32 0.5, %v2434_v23 }
 0x980   : > { %3482 = vtanh.f32 %v2497_v42  ;;  %v2498_v54 = vmul.f32 0.5, %v2435_v7  ;;  %v2508_v31 = vmul.f32 0.5, %v2488_v57 }
 0x981   : > { %3484 = vtanh.f32 %v2490_v45 }
 0x982   : > { %3486 = vtanh.f32 %v2485_v33 }
 0x983   : > { %3488 = vtanh.f32 %v2498_v54 }
 0x984   : > { %3490 = vtanh.f32 %v2487_v37 }
 0x985   : > { %3492 = vtanh.f32 %v2507_v46  ;;  %v2526_v46 = vstv %s3191_s30 }
 0x986   : > { %3494 = vtanh.f32 %v2508_v31 }
 0x989   : > { %v3481_v20 = vpop.eup %3480 }
 0x98a   : > { %v3483_v16 = vpop.eup %3482  ;;  %v2493_v28 = vmul.f32 0.5, %v3481_v20 }
 0x98b   : > { %v2501_v29 = vmul.f32 0.5, %v3483_v16  ;;  %v3485_v34 = vpop.eup %3484 }
 0x98c   : > { %v2495_v36 = vadd.f32 0.5, %v2493_v28  ;;  %v3487_v24 = vpop.eup %3486  ;;  %v2494_v2 = vmul.f32 0.5, %v3485_v34 }
 0x98d   : > { %v2503_v55 = vadd.f32 0.5, %v2501_v29  ;;  %v3489_v1 = vpop.eup %3488 }
 0x98e   : > { %v2517_v61 = vmul.f32 %v3487_v24, %v2495_v36  ;;  %v2496_v8 = vadd.f32 0.5, %v2494_v2  ;;  %v2502_v33 = vmul.f32 0.5, %v3489_v1  ;;  %v3491_v14 = vpop.eup %3490 }
 0x98f   : > { %v2515_v6 = vmul.f32 %v2503_v55, %v4837_v30  ;;  %v3493_v44 = vpop.eup %3492  ;;  %v5270_v55 = vld [vmem:[#allocation37_spill] sm:$0xff] }
 0x990   : > { %v2504_v23 = vadd.f32 0.5, %v2502_v33  ;;  %v2518_v37 = vmul.f32 %v3491_v14, %v2496_v8  ;;  %v2511_v7 = vmul.f32 0.5, %v3493_v44  ;;  %v3495_v30 = vpop.eup %3494  ;;  %v2588_v2 = vunpack.c.l.bf16 %v5270_v55  ;;  %v5272_v33 = vld [vmem:[#allocation39_spill] sm:$0xff] }
 0x991   : > { %v4993_v4 = vadd.f32 %v2517_v61, %v2515_v6  ;;  %v2512_v45 = vmul.f32 0.5, %v3495_v30  ;;  %v5271_v6 = vld [vmem:[#allocation38_spill] sm:$0xff]  ;;  %v2589_v14 = vunpack.c.l.bf16 %v5272_v33 }
 0x992   : > { %v2516_v43 = vmul.f32 %v2504_v23, %v4841_v18  ;;  %v2513_v57 = vadd.f32 0.5, %v2511_v7  ;;  %v2536_v8 = vunpack.c.l.bf16 %v5271_v6 }
 0x993   : > { %3496 = vtanh.f32 %v4993_v4  ;;  %v2514_v28 = vadd.f32 0.5, %v2512_v45 }
 0x994   : > { %v4997_v42 = vadd.f32 %v2518_v37, %v2516_v43 }
 0x996   : > { %3498 = vtanh.f32 %v4997_v42 }
 0x99d   : > { %v3497_v54 = vpop.eup %3496 }
 0x99e   : > { %v2523_v20 = vmul.f32 %v3497_v54, %v2513_v57  ;;  %v2538_v54 = vunpack.c.h.bf16 %v5271_v6 }
 0x9a0   : > { %v2527_v16 = vmul.f32 %v2526_v46, %v2523_v20  ;;  %v3499_v29 = vpop.eup %3498 }
 0x9a1   : > { %v2524_v31 = vmul.f32 %v3499_v29, %v2514_v28 }
 0x9a2   : > { %v5001_v34 = vadd.f32 %v2527_v16, %v4845_v21  ;;  %v5269_v21 = vld [vmem:[#allocation36_spill] sm:$0xff] }
 0x9a3   : > { %v2528_v18 = vmul.f32 %v2526_v46, %v2524_v31  ;;  %v2531_v36 = vpack.c.bf16 %v2524_v31, %v2523_v20  ;;  %v2537_v7 = vunpack.c.h.bf16 %v5269_v21  ;;  %v2591_v46 = vunpack.c.h.bf16 %v5272_v33 }
 0x9a5   : > { %v5004_v24 = vadd.f32 %v2528_v18, %v4848_v11  ;;  %2572 = vmatmul.mubr.bf16.vlgmr.msra.gmra.mrb[84].mxu0 %v2531_v36  ;;  %2625 = vmatmul.mubr.bf16.vlgmr.msra.gmra.mrb[84].mxu1 %v2531_v36  ;;  %v2535_v11 = vunpack.c.l.bf16 %v5269_v21 }
 0x9a6   : > { %2690 = vmatpush1.bf16.msra.mxu0 %v4737_v40  ;;  %2743 = vmatpush1.bf16.msra.mxu1 %v4743_v9 }
 0x9a7   : > { %2691 = vmatprep.subr.bf16.mxu0 %v4749_v47  ;;  %2744 = vmatprep.subr.bf16.mxu1 %v4755_v39 }
 0x9a8   : > { %2721 = vmatprep.mubr.bf16.mxu0 %v5242_v60  ;;  %2774 = vmatprep.mubr.bf16.mxu1 %v5242_v60 }
 0x9aa   : > { %2692 = vmatpush1.bf16.msra.mxu0 %v4763_v63  ;;  %2745 = vmatpush1.bf16.msra.mxu1 %v4769_v3 }
 0x9ab   : > { %2693 = vmatprep.subr.bf16.mxu0 %v4775_v22  ;;  %2746 = vmatprep.subr.bf16.mxu1 %v4781_v26 }
 0x9ae   : > { %2694 = vmatpush1.bf16.msra.mxu0 %v4787_v32  ;;  %2747 = vmatpush1.bf16.msra.mxu1 %v4793_v27 }
 0x9af   : > { %2695 = vmatprep.subr.bf16.mxu0 %v4865_v58  ;;  %2748 = vmatprep.subr.bf16.mxu1 %v4871_v5 }
 0x9b2   : > { %2696 = vmatpush1.bf16.msra.mxu0 %v4877_v19  ;;  %2749 = vmatpush1.bf16.msra.mxu1 %v4883_v41 }
 0x9b3   : > { %2697 = vmatprep.subr.bf16.mxu0 %v4889_v59  ;;  %2750 = vmatprep.subr.bf16.mxu1 %v4895_v12 }
 0x9b6   : > { %2698 = vmatpush1.bf16.msra.mxu0 %v4901_v13  ;;  %2751 = vmatpush1.bf16.msra.mxu1 %v4907_v10 }
 0x9b7   : > { %2699 = vmatprep.subr.bf16.mxu0 %v4913_v15  ;;  %2752 = vmatprep.subr.bf16.mxu1 %v4919_v62 }
 0x9ba   : > { %2700 = vmatpush1.bf16.msra.mxu0 %v4925_v25  ;;  %2753 = vmatpush1.bf16.msra.mxu1 %v4931_v17 }
 0x9bb   : > { %2701 = vmatprep.subr.bf16.mxu0 %v4937_v48  ;;  %2754 = vmatprep.subr.bf16.mxu1 %v4943_v49 }
 0x9be   : > { %2702 = vmatpush1.bf16.msra.mxu0 %v4949_v35  ;;  %2755 = vmatpush1.bf16.msra.mxu1 %v4955_v51 }
 0x9bf   : > { %2703 = vmatprep.subr.bf16.mxu0 %v4961_v56  ;;  %2756 = vmatprep.subr.bf16.mxu1 %v4967_v38 }
 0x9c2   : > { %2704 = vmatpush1.bf16.msra.mxu0 %v4973_v52  ;;  %2757 = vmatpush1.bf16.msra.mxu1 %v4979_v53 }
 0x9c3   : > { %2839 = vmatprep.subr.bf16.mxu0 %v4819_v0  ;;  %2892 = vmatprep.subr.bf16.mxu1 %v4825_v50  ;;  %v2590_v0 = vunpack.c.h.bf16 %v5270_v55 }
 0xa78   : > { %v2573_v1 = vpop.f32.mrb[84].mxu0  ;;  %v2626_v61 = vpop.f32.mrb[84].mxu1 }
 0xa79   : > { %v2582_v23 = vadd.f32 %v2573_v1, %v2535_v11  ;;  %v2635_v37 = vadd.f32 %v2626_v61, %v2588_v2  ;;  %v2575_v43 = vpop.f32.mrb[85].mxu0  ;;  %v2628_v44 = vpop.f32.mrb[85].mxu1 }
 0xa7a   : > { %v2583_v30 = vadd.f32 %v2575_v43, %v2536_v8  ;;  %v2636_v50 = vadd.f32 %v2628_v44, %v2589_v14  ;;  %v2577_v57 = vpop.f32.mrb[86].mxu0  ;;  %v2630_v45 = vpop.f32.mrb[86].mxu1 }
 0xa7b   : > { %v2639_v20 = vmul.f32 0.5, %v2582_v23  ;;  %v2584_v16 = vadd.f32 %v2577_v57, %v2537_v7  ;;  %v2637_v28 = vadd.f32 %v2630_v45, %v2590_v0  ;;  %v2579_v29 = vpop.f32.mrb[87].mxu0  ;;  %v2632_v31 = vpop.f32.mrb[87].mxu1 }
 0xa7c   : > { %v2647_v18 = vmul.f32 0.5, %v2583_v30  ;;  %v2585_v36 = vadd.f32 %v2579_v29, %v2538_v54  ;;  %v2638_v11 = vadd.f32 %v2632_v31, %v2591_v46  ;;  %v2657_v2 = vmul.f32 0.5, %v2636_v50 }
 0xa7d   : > { %3500 = vtanh.f32 %v2639_v20  ;;  %v2640_v21 = vmul.f32 0.5, %v2584_v16 }
 0xa7e   : > { %3502 = vtanh.f32 %v2647_v18  ;;  %v2648_v55 = vmul.f32 0.5, %v2585_v36  ;;  %v2658_v33 = vmul.f32 0.5, %v2638_v11 }
 0xa7f   : > { %3504 = vtanh.f32 %v2640_v21  ;;  %v2676_v21 = vstv %s3192_s10 }
 0xa80   : > { %3506 = vtanh.f32 %v2635_v37 }
 0xa81   : > { %3508 = vtanh.f32 %v2648_v55 }
 0xa82   : > { %3510 = vtanh.f32 %v2637_v28 }
 0xa83   : > { %3512 = vtanh.f32 %v2657_v2 }
 0xa84   : > { %3514 = vtanh.f32 %v2658_v33 }
 0xa87   : > { %v3501_v1 = vpop.eup %3500 }
 0xa88   : > { %v3503_v61 = vpop.eup %3502  ;;  %v2643_v6 = vmul.f32 0.5, %v3501_v1 }
 0xa89   : > { %v2651_v8 = vmul.f32 0.5, %v3503_v61  ;;  %v3505_v14 = vpop.eup %3504 }
 0xa8a   : > { %v2645_v23 = vadd.f32 0.5, %v2643_v6  ;;  %v3507_v43 = vpop.eup %3506  ;;  %v2644_v7 = vmul.f32 0.5, %v3505_v14 }
 0xa8b   : > { %v2653_v44 = vadd.f32 0.5, %v2651_v8  ;;  %v3509_v0 = vpop.eup %3508 }
 0xa8c   : > { %v2667_v30 = vmul.f32 %v3507_v43, %v2645_v23  ;;  %v2646_v45 = vadd.f32 0.5, %v2644_v7  ;;  %v2652_v37 = vmul.f32 0.5, %v3509_v0  ;;  %v3511_v54 = vpop.eup %3510 }
 0xa8d   : > { %v2665_v57 = vmul.f32 %v2653_v44, %v4993_v4  ;;  %v3513_v28 = vpop.eup %3512 }
 0xa8e   : > { %v2654_v46 = vadd.f32 0.5, %v2652_v37  ;;  %v2668_v20 = vmul.f32 %v3511_v54, %v2646_v45  ;;  %v2661_v31 = vmul.f32 0.5, %v3513_v28  ;;  %v3515_v4 = vpop.eup %3514 }
 0xa8f   : > { %v5049_v50 = vadd.f32 %v2667_v30, %v2665_v57  ;;  %v2662_v36 = vmul.f32 0.5, %v3515_v4 }
 0xa90   : > { %v2666_v16 = vmul.f32 %v2654_v46, %v4997_v42  ;;  %v2663_v18 = vadd.f32 0.5, %v2661_v31 }
 0xa91   : > { %3516 = vtanh.f32 %v5049_v50  ;;  %v2664_v1 = vadd.f32 0.5, %v2662_v36 }
 0xa92   : > { %v5053_v29 = vadd.f32 %v2668_v20, %v2666_v16 }
 0xa94   : > { %3518 = vtanh.f32 %v5053_v29 }
 0xa9b   : > { %v3517_v11 = vpop.eup %3516 }
 0xa9c   : > { %v2673_v55 = vmul.f32 %v3517_v11, %v2663_v18 }
 0xa9e   : > { %v2677_v2 = vmul.f32 %v2676_v21, %v2673_v55  ;;  %v3519_v61 = vpop.eup %3518 }
 0xa9f   : > { %v2674_v6 = vmul.f32 %v3519_v61, %v2664_v1 }
 0xaa0   : > { %v5057_v8 = vadd.f32 %v2677_v2, %v5001_v34 }
 0xaa1   : > { %v2678_v42 = vmul.f32 %v2676_v21, %v2674_v6  ;;  %v2681_v33 = vpack.c.bf16 %v2674_v6, %v2673_v55 }
 0xaa3   : > { %2722 = vmatmul.mubr.bf16.vlgmr.msra.gmra.mrb[88].mxu0 %v2681_v33  ;;  %2775 = vmatmul.mubr.bf16.vlgmr.msra.gmra.mrb[88].mxu1 %v2681_v33  ;;  %v5060_v14 = vadd.f32 %v2678_v42, %v5004_v24  ;;  %v2826_v33 = vstv %s3193_s21 }
 0xaa4   : > { %2840 = vmatpush1.bf16.msra.mxu0 %v4737_v40  ;;  %2893 = vmatpush1.bf16.msra.mxu1 %v4743_v9  ;;  %v5274_v9 = vld [vmem:[#allocation41_spill] sm:$0xff] }
 0xaa5   : > { %2841 = vmatprep.subr.bf16.mxu0 %v4749_v47  ;;  %2894 = vmatprep.subr.bf16.mxu1 %v4755_v39  ;;  %v2738_v47 = vunpack.c.l.bf16 %v5274_v9 }
 0xaa6   : > { %2871 = vmatprep.mubr.bf16.mxu0 %v5242_v60  ;;  %2924 = vmatprep.mubr.bf16.mxu1 %v5242_v60  ;;  %v5273_v60 = vld [vmem:[#allocation40_spill] sm:$0xff] }
 0xaa7   : > { %v2685_v40 = vunpack.c.l.bf16 %v5273_v60 }
 0xaa8   : > { %2842 = vmatpush1.bf16.msra.mxu0 %v4763_v63  ;;  %2895 = vmatpush1.bf16.msra.mxu1 %v4769_v3  ;;  %v5275_v3 = vld [vmem:[#allocation42_spill] sm:$0xff] }
 0xaa9   : > { %2843 = vmatprep.subr.bf16.mxu0 %v4775_v22  ;;  %2896 = vmatprep.subr.bf16.mxu1 %v4781_v26  ;;  %v2686_v22 = vunpack.c.l.bf16 %v5275_v3  ;;  %v5276_v26 = vld [vmem:[#allocation43_spill] sm:$0xff] }
 0xaac   : > { %2844 = vmatpush1.bf16.msra.mxu0 %v4787_v32  ;;  %2897 = vmatpush1.bf16.msra.mxu1 %v4793_v27  ;;  %v2739_v32 = vunpack.c.l.bf16 %v5276_v26 }
 0xaad   : > { %2845 = vmatprep.subr.bf16.mxu0 %v4865_v58  ;;  %2898 = vmatprep.subr.bf16.mxu1 %v4871_v5 }
 0xab0   : > { %2846 = vmatpush1.bf16.msra.mxu0 %v4877_v19  ;;  %2899 = vmatpush1.bf16.msra.mxu1 %v4883_v41  ;;  %v2687_v41 = vunpack.c.h.bf16 %v5273_v60 }
 0xab1   : > { %2847 = vmatprep.subr.bf16.mxu0 %v4889_v59  ;;  %2900 = vmatprep.subr.bf16.mxu1 %v4895_v12  ;;  %v2740_v59 = vunpack.c.h.bf16 %v5274_v9 }
 0xab4   : > { %2848 = vmatpush1.bf16.msra.mxu0 %v4901_v13  ;;  %2901 = vmatpush1.bf16.msra.mxu1 %v4907_v10 }
 0xab5   : > { %2849 = vmatprep.subr.bf16.mxu0 %v4913_v15  ;;  %2902 = vmatprep.subr.bf16.mxu1 %v4919_v62  ;;  %v2688_v62 = vunpack.c.h.bf16 %v5275_v3 }
 0xab8   : > { %2850 = vmatpush1.bf16.msra.mxu0 %v4925_v25  ;;  %2903 = vmatpush1.bf16.msra.mxu1 %v4931_v17  ;;  %v2741_v25 = vunpack.c.h.bf16 %v5276_v26  ;;  %v5277_v26 = vld [vmem:[#allocation44_spill] sm:$0xff] }
 0xab9   : > { %2851 = vmatprep.subr.bf16.mxu0 %v4937_v48  ;;  %2904 = vmatprep.subr.bf16.mxu1 %v4943_v49 }
 0xabc   : > { %2852 = vmatpush1.bf16.msra.mxu0 %v4949_v35  ;;  %2905 = vmatpush1.bf16.msra.mxu1 %v4955_v51 }
 0xabd   : > { %2853 = vmatprep.subr.bf16.mxu0 %v4961_v56  ;;  %2906 = vmatprep.subr.bf16.mxu1 %v4967_v38 }
 0xac0   : > { %2854 = vmatpush1.bf16.msra.mxu0 %v4973_v52  ;;  %2907 = vmatpush1.bf16.msra.mxu1 %v4979_v53 }
 0xb76   : > { %v2723_v39 = vpop.f32.mrb[88].mxu0  ;;  %v2776_v63 = vpop.f32.mrb[88].mxu1 }
 0xb77   : > { %v2732_v27 = vadd.f32 %v2723_v39, %v2685_v40  ;;  %v2785_v58 = vadd.f32 %v2776_v63, %v2738_v47  ;;  %v2725_v5 = vpop.f32.mrb[89].mxu0  ;;  %v2778_v19 = vpop.f32.mrb[89].mxu1 }
 0xb78   : > { %v2733_v12 = vadd.f32 %v2725_v5, %v2686_v22  ;;  %v2786_v13 = vadd.f32 %v2778_v19, %v2739_v32  ;;  %v2727_v10 = vpop.f32.mrb[90].mxu0  ;;  %v2780_v15 = vpop.f32.mrb[90].mxu1  ;;  %v2835_v32 = vunpack.c.l.bf16 %v5277_v26 }
 0xb79   : > { %v2789_v17 = vmul.f32 0.5, %v2732_v27  ;;  %v2734_v48 = vadd.f32 %v2727_v10, %v2687_v41  ;;  %v2787_v49 = vadd.f32 %v2780_v15, %v2740_v59  ;;  %v2729_v35 = vpop.f32.mrb[91].mxu0  ;;  %v2782_v51 = vpop.f32.mrb[91].mxu1  ;;  %v5278_v27 = vld [vmem:[#allocation45_spill] sm:$0xff]  ;;  %v5279_v41 = vld [vmem:[#allocation46_spill] sm:$0xff] }
 0xb7a   : > { %v2797_v56 = vmul.f32 0.5, %v2733_v12  ;;  %v2735_v38 = vadd.f32 %v2729_v35, %v2688_v62  ;;  %v2788_v52 = vadd.f32 %v2782_v51, %v2741_v25  ;;  %v2807_v24 = vmul.f32 0.5, %v2786_v13  ;;  %v5280_v12 = vld [vmem:[#allocation47_spill] sm:$0xff] }
 0xb7b   : > { %3520 = vtanh.f32 %v2789_v17  ;;  %v2790_v53 = vmul.f32 0.5, %v2734_v48  ;;  %v2836_v59 = vunpack.c.l.bf16 %v5279_v41  ;;  %v2889_v13 = vunpack.c.l.bf16 %v5280_v12 }
 0xb7c   : > { %3522 = vtanh.f32 %v2797_v56  ;;  %v2798_v34 = vmul.f32 0.5, %v2735_v38  ;;  %v2808_v0 = vmul.f32 0.5, %v2788_v52  ;;  %v2837_v25 = vunpack.c.h.bf16 %v5277_v26 }
 0xb7d   : > { %3524 = vtanh.f32 %v2790_v53  ;;  %v2890_v17 = vunpack.c.h.bf16 %v5278_v27  ;;  %v2838_v51 = vunpack.c.h.bf16 %v5279_v41  ;;  %v2891_v56 = vunpack.c.h.bf16 %v5280_v12  ;;  %v3195_v41 = vld [vmem:[%s5149_s3] ss:$0 sm:$0xff] }
 0xb7e   : > { %3526 = vtanh.f32 %v2785_v58  ;;  %v2888_v58 = vunpack.c.l.bf16 %v5278_v27 }
 0xb7f   : > { %3528 = vtanh.f32 %v2798_v34 }
 0xb80   : > { %3530 = vtanh.f32 %v2787_v49 }
 0xb81   : > { %3532 = vtanh.f32 %v2807_v24 }
 0xb82   : > { %3534 = vtanh.f32 %v2808_v0 }
 0xb85   : > { %v3521_v23 = vpop.eup %3520 }
 0xb86   : > { %v3523_v43 = vpop.eup %3522  ;;  %v2793_v44 = vmul.f32 0.5, %v3521_v23 }
 0xb87   : > { %v2801_v7 = vmul.f32 0.5, %v3523_v43  ;;  %v3525_v30 = vpop.eup %3524 }
 0xb88   : > { %v2795_v57 = vadd.f32 0.5, %v2793_v44  ;;  %v3527_v45 = vpop.eup %3526  ;;  %v2794_v54 = vmul.f32 0.5, %v3525_v30 }
 0xb89   : > { %v2803_v37 = vadd.f32 0.5, %v2801_v7  ;;  %v3529_v46 = vpop.eup %3528 }
 0xb8a   : > { %v2817_v20 = vmul.f32 %v3527_v45, %v2795_v57  ;;  %v2796_v28 = vadd.f32 0.5, %v2794_v54  ;;  %v2802_v31 = vmul.f32 0.5, %v3529_v46  ;;  %v3531_v4 = vpop.eup %3530 }
 0xb8b   : > { %v2815_v16 = vmul.f32 %v2803_v37, %v5049_v50  ;;  %v3533_v55 = vpop.eup %3532 }
 0xb8c   : > { %v2804_v36 = vadd.f32 0.5, %v2802_v31  ;;  %v2818_v11 = vmul.f32 %v3531_v4, %v2796_v28  ;;  %v2811_v1 = vmul.f32 0.5, %v3533_v55  ;;  %v3535_v50 = vpop.eup %3534 }
 0xb8d   : > { %v5103_v18 = vadd.f32 %v2817_v20, %v2815_v16  ;;  %v2812_v6 = vmul.f32 0.5, %v3535_v50 }
 0xb8e   : > { %v2816_v21 = vmul.f32 %v2804_v36, %v5053_v29  ;;  %v2813_v61 = vadd.f32 0.5, %v2811_v1 }
 0xb8f   : > { %3536 = vtanh.f32 %v5103_v18  ;;  %v2814_v40 = vadd.f32 0.5, %v2812_v6 }
 0xb90   : > { %v5107_v2 = vadd.f32 %v2818_v11, %v2816_v21 }
 0xb92   : > { %3538 = vtanh.f32 %v5107_v2 }
 0xb99   : > { %v3537_v42 = vpop.eup %3536 }
 0xb9a   : > { %v2823_v60 = vmul.f32 %v3537_v42, %v2813_v61 }
 0xb9c   : > { %v2827_v9 = vmul.f32 %v2826_v33, %v2823_v60  ;;  %v3539_v47 = vpop.eup %3538 }
 0xb9d   : > { %v2824_v39 = vmul.f32 %v3539_v47, %v2814_v40 }
 0xb9e   : > { %v5111_v63 = vadd.f32 %v2827_v9, %v5057_v8 }
 0xb9f   : > { %v2828_v29 = vmul.f32 %v2826_v33, %v2824_v39  ;;  %v2831_v3 = vpack.c.bf16 %v2824_v39, %v2823_v60 }
 0xba1   : > { %2872 = vmatmul.mubr.bf16.vlgmr.msra.gmra.mrb[92].mxu0 %v2831_v3  ;;  %2925 = vmatmul.mubr.bf16.vlgmr.msra.gmra.mrb[92].mxu1 %v2831_v3  ;;  %v5114_v22 = vadd.f32 %v2828_v29, %v5060_v14  ;;  %v2976_v3 = vstv %s3194_s11 }
 0xc74   : > { %v2873_v5 = vpop.f32.mrb[92].mxu0  ;;  %v2926_v19 = vpop.f32.mrb[92].mxu1 }
 0xc75   : > { %v2882_v10 = vadd.f32 %v2873_v5, %v2835_v32  ;;  %v2935_v8 = vadd.f32 %v2926_v19, %v2888_v58  ;;  %v2875_v15 = vpop.f32.mrb[93].mxu0  ;;  %v2928_v62 = vpop.f32.mrb[93].mxu1  ;;  %v2982_v5 = vstv %s2981_s9 }
 0xc76   : > { %v2883_v14 = vadd.f32 %v2875_v15, %v2836_v59  ;;  %v2936_v48 = vadd.f32 %v2928_v62, %v2889_v13  ;;  %v2877_v49 = vpop.f32.mrb[94].mxu0  ;;  %v2930_v35 = vpop.f32.mrb[94].mxu1  ;;  %v3004_v62 = vlaneseq }
 0xc77   : > { %v2939_v38 = vmul.f32 0.5, %v2882_v10  ;;  %v2884_v52 = vadd.f32 %v2877_v49, %v2837_v25  ;;  %v2937_v53 = vadd.f32 %v2930_v35, %v2890_v17  ;;  %v2879_v34 = vpop.f32.mrb[95].mxu0  ;;  %v2932_v24 = vpop.f32.mrb[95].mxu1 }
 0xc78   : > { %v2947_v23 = vmul.f32 0.5, %v2883_v14  ;;  %v2885_v43 = vadd.f32 %v2879_v34, %v2838_v51  ;;  %v2938_v44 = vadd.f32 %v2932_v24, %v2891_v56  ;;  %v2957_v30 = vmul.f32 0.5, %v2936_v48 }
 0xc79   : > { %3540 = vtanh.f32 %v2939_v38  ;;  %v2940_v7 = vmul.f32 0.5, %v2884_v52  ;;  %v3005_v25 = vand.u32 127, %v3004_v62  ;;  %v3007_v17 = vshrl.u32 %v3004_v62, 7 }
 0xc7a   : > { %3542 = vtanh.f32 %v2947_v23  ;;  %v2948_v0 = vmul.f32 0.5, %v2885_v43  ;;  %v2958_v46 = vmul.f32 0.5, %v2938_v44 }
 0xc7b   : > { %3544 = vtanh.f32 %v2940_v7  ;;  %v3010_v14 = vadd.s32 4294967288, %v3005_v25  ;;  %v3008_v49 = vsub.s32 %v3005_v25, %v3007_v17 }
 0xc7c   : > { %3546 = vtanh.f32 %v2935_v8 }
 0xc7d   : > { %3548 = vtanh.f32 %v2948_v0  ;;  %v3013_v51 = vsub.s32 %v3010_v14, %v3007_v17 }
 0xc7e   : > { %3550 = vtanh.f32 %v2937_v53 }
 0xc7f   : > { %3552 = vtanh.f32 %v2957_v30 }
 0xc80   : > { %3554 = vtanh.f32 %v2958_v46 }
 0xc83   : > { %v3541_v57 = vpop.eup %3540 }
 0xc84   : > { %v3543_v45 = vpop.eup %3542  ;;  %v2943_v37 = vmul.f32 0.5, %v3541_v57 }
 0xc85   : > { %v2951_v54 = vmul.f32 0.5, %v3543_v45  ;;  %v3545_v20 = vpop.eup %3544 }
 0xc86   : > { %v2945_v16 = vadd.f32 0.5, %v2943_v37  ;;  %v3547_v28 = vpop.eup %3546  ;;  %v2944_v4 = vmul.f32 0.5, %v3545_v20 }
 0xc87   : > { %v2953_v31 = vadd.f32 0.5, %v2951_v54  ;;  %v3549_v36 = vpop.eup %3548 }
 0xc88   : > { %v2967_v11 = vmul.f32 %v3547_v28, %v2945_v16  ;;  %v2946_v55 = vadd.f32 0.5, %v2944_v4  ;;  %v2952_v1 = vmul.f32 0.5, %v3549_v36  ;;  %v3551_v50 = vpop.eup %3550 }
 0xc89   : > { %v2965_v21 = vmul.f32 %v2953_v31, %v5103_v18  ;;  %v3553_v60 = vpop.eup %3552 }
 0xc8a   : > { %v2954_v6 = vadd.f32 0.5, %v2952_v1  ;;  %v2968_v42 = vmul.f32 %v3551_v50, %v2946_v55  ;;  %v2961_v9 = vmul.f32 0.5, %v3553_v60  ;;  %v3555_v47 = vpop.eup %3554 }
 0xc8b   : > { %v2969_v61 = vadd.f32 %v2967_v11, %v2965_v21  ;;  %v2962_v29 = vmul.f32 0.5, %v3555_v47 }
 0xc8c   : > { %v2966_v33 = vmul.f32 %v2954_v6, %v5107_v2  ;;  %v2963_v39 = vadd.f32 0.5, %v2961_v9 }
 0xc8d   : > { %3556 = vtanh.f32 %v2969_v61  ;;  %v2964_v32 = vadd.f32 0.5, %v2962_v29 }
 0xc8e   : > { %v2970_v40 = vadd.f32 %v2968_v42, %v2966_v33 }
 0xc90   : > { %3558 = vtanh.f32 %v2970_v40 }
 0xc97   : > { %v3557_v18 = vpop.eup %3556 }
 0xc98   : > { %v2973_v26 = vmul.f32 %v3557_v18, %v2963_v39 }
 0xc9a   : > { %v2977_v27 = vmul.f32 %v2976_v3, %v2973_v26  ;;  %v3559_v58 = vpop.eup %3558 }
 0xc9b   : > { %v2974_v19 = vmul.f32 %v3559_v58, %v2964_v32 }
 0xc9c   : > { %v2979_v2 = vadd.f32 %v2977_v27, %v5111_v63  ;;  %v2999_v63 = vstv %s3196_s14 }
 0xc9d   : > { %v2978_v12 = vmul.f32 %v2976_v3, %v2974_v19 }
 0xc9e   : > { %v2983_v59 = vadd.f32 %v2982_v5, %v2979_v2 }
 0xc9f   : > { %v2980_v10 = vadd.f32 %v2978_v12, %v5114_v22 }
 0xca0   : > { %v2992_v13 = vmul.f32 %v3195_v41, %v2983_v59 }
 0xca1   : > { %v2984_v8 = vadd.f32 %v2982_v5, %v2980_v10 }
 0xca2   : > { %2994 = vadd.xlane.f32.xlu0 %v2992_v13 }
 0xca3   : > { %v2993_v15 = vmul.f32 %v3195_v41, %v2984_v8 }
 0xca6   : > { %2996 = vadd.xlane.f32.xlu0 %v2993_v15 }
 0xd2f   : > { %v2995_v48 = vpop.xlane.xlu0 %2994 }
 0xd30   : > { %v3000_v35 = vadd.f32 %v2999_v63, %v2995_v48 }
 0xd32   : > { %v3009_v22 = vrot.slane %v3000_v35, %v3008_v49 }
 0xd33   : > { %v2997_v56 = vpop.xlane.xlu0 %2996 }
 0xd34   : > { %v3001_v38 = vadd.f32 %v2999_v63, %v2997_v56 }
 0xd36   : > { %v3014_v52 = vrot.slane %v3001_v38, %v3013_v51 }
 0xd38   : > { %v3016_v53 = vsel %vm3015_vm2, %v3014_v52, %v3009_v22 }
 0xd39   : > { %3019 = vst.msk [vmem:[%s409_s17] sm:$0x1] %vm3018_vm3, %v3016_v53 }
 0xd3a PF: > { %p15_p2 = scmp.ge.s32.totalorder %s3743_s25, 4   ;;  %s5281_s21 = smov %s3680_s22 }
 0xd3b   : > { %s5282_s22 = smov %s3753_s28  ;;  %s5283_s23 = smov %s3743_s25 }
 0xd3c   :  { %17 = sbr.rel (!%p15_p2) target bundleno = 3 (0x3), region = 140 }
 0xd43   :  { %3037 = vsyncpa [#allocation5], 1 }
 0xd44   :  { %3039 = vsyncpa [#allocation5 + $0x1], 1 }
 0xd45   :  { %3040 = vsyncpa [#allocation7], 1 }

</bundles_post_ra>
